<compile_context>
chip_gen: v7x
topology: tpu7x:2x2x1
jax: 0.10.0
libtpu: 0.0.40
codegen_flags: <defaults>
</compile_context>

<pallas_src>
import functools

import jax
import jax.numpy as jnp
from jax.experimental import pallas as pl
from jax.experimental.pallas import tpu as pltpu

ROI_SIZE = 7
N_CLASS = 4
FC_DIM = 256   # stand-in for VGG's 4096 (scaled for the small synthetic test)
OUT_PAD = 128  # combined (cls_loc | score) head output padded to 128 lanes


# ----------------------------------------------------------------------------
# Kernel 1: RoI max-pool (torchvision RoIPool semantics), separable two-pass.
# grid = (num_rois,).  Scalar-prefetch (SMEM): batch index per RoI and the
# precomputed integer bin boundaries hstart/hend/wstart/wend, each flattened to
# 1D (R*S,) so SMEM padding stays small.  The feature-map block for RoI r is
# selected data-dependently via bidx[r].
# ----------------------------------------------------------------------------
def roi_pool_kernel(bidx_ref, hs_ref, he_ref, ws_ref, we_ref, x_ref, out_ref,
                    colmax_ref):
    del bidx_ref  # only consumed by the input index_map
    r = pl.program_id(0)
    _, H, W, C = x_ref.shape
    S = out_ref.shape[1]
    base = r * S

    # bf16 in HBM/VMEM (halves the DMA); f32 in-register compute (native VPU
    # path on all generations, max is exact).
    # TODO(synk): replace the full-map masked max with a static-width
    # pl.ds(ws, MAX_BIN_W) slice per bin at production C=512 (VALU-bound there).
    x = x_ref[0].astype(jnp.float32)              # (H, W, C), channels on lanes
    neg = jnp.finfo(jnp.float32).min
    col_ids = jax.lax.broadcasted_iota(jnp.int32, (1, W, 1), 1)  # sublane iota
    row_ids = jax.lax.broadcasted_iota(jnp.int32, (1, H, 1), 1)  # sublane iota

    # Pass 1: width-bin max -> colmax_ref[pw] = (H, C).  Each slice is stored
    # as produced, bounding the live range to one (H, C) slice (no stack copy).
    for pw in range(S):
        ws = ws_ref[base + pw]
        we = we_ref[base + pw]
        mask_w = (col_ids >= ws) & (col_ids < we)                 # (1, W, 1)
        cmax = jnp.max(jnp.where(mask_w, x, neg), axis=1)         # (H, C)
        colmax_ref[pw] = jnp.where(we > ws, cmax, 0.0)            # empty w-bin -> 0

    colmax = colmax_ref[...]                                      # (S, H, C)

    # Pass 2: height-bin max over colmax; write each ph row straight into the
    # output block (bf16) instead of stacking in registers.
    for ph in range(S):
        hs = hs_ref[base + ph]
        he = he_ref[base + ph]
        mask_h = (row_ids >= hs) & (row_ids < he)                 # (1, H, 1)
        rmax = jnp.max(jnp.where(mask_h, colmax, neg), axis=1)    # (S, C) = [pw, c]
        out_ref[0, ph] = jnp.where(he > hs, rmax, 0.0).astype(out_ref.dtype)


def roi_pool(x_nhwc, bidx, hstart, hend, wstart, wend, roi_size):
    N, H, W, C = x_nhwc.shape
    R = bidx.shape[0]
    S = roi_size
    grid_spec = pltpu.PrefetchScalarGridSpec(
        num_scalar_prefetch=5,
        grid=(R,),
        in_specs=[
            # TODO(synk): pipeline_mode=pl.Buffered(1) here would save one full
            # feature-map VMEM buffer on v7x (64 MiB budget); most steps reuse
            # the same block after the bidx sort.
            pl.BlockSpec((1, H, W, C),
                         lambda r, bidx, hs, he, ws, we: (bidx[r], 0, 0, 0)),
        ],
        out_specs=pl.BlockSpec((1, S, S, C),
                               lambda r, bidx, hs, he, ws, we: (r, 0, 0, 0)),
        scratch_shapes=[pltpu.VMEM((S, H, C), jnp.float32)],   # colmax scratch
    )
    return pl.pallas_call(
        roi_pool_kernel,
        out_shape=jax.ShapeDtypeStruct((R, S, S, C), jnp.bfloat16),
        grid_spec=grid_spec,
        compiler_params=pltpu.CompilerParams(
            dimension_semantics=("parallel",)),   # RoIs write disjoint blocks
    )(bidx, hstart, hend, wstart, wend, x_nhwc)


# ----------------------------------------------------------------------------
# Kernel 2: fused head MLP, gridded over RoI rows (M).
#   fc6 = relu(pool @ W6 + b6); fc7 = relu(fc6 @ W7 + b7)
#   [roi_cls_locs | roi_scores] = fc7 @ Wo + bo      (lane-dense 128-wide output)
# bf16 MXU operands (pool arrives bf16, no cast), f32 accumulation/bias/ReLU.
# ----------------------------------------------------------------------------
def head_kernel(pool_ref, w6_ref, b6_ref, w7_ref, b7_ref, wo_ref, bo_ref,
                out_ref):
    h = jnp.dot(pool_ref[...], w6_ref[...],
                preferred_element_type=jnp.float32) + b6_ref[...]
    h = jnp.maximum(h, 0.0)
    h = jnp.dot(h.astype(jnp.bfloat16), w7_ref[...],
                preferred_element_type=jnp.float32) + b7_ref[...]
    h = jnp.maximum(h, 0.0)
    out_ref[...] = jnp.dot(h.astype(jnp.bfloat16), wo_ref[...],
                           preferred_element_type=jnp.float32) + bo_ref[...]


def head_mlp(pool_flat, params, tm=16):
    r_pad, k_pad = pool_flat.shape
    fc = params["w6"].shape[1]
    out_pad = params["wo"].shape[1]
    # TODO(synk): at production FC_DIM=4096 / K=25088, w6 (~205 MB bf16) cannot
    # be VMEM-resident: implement a (M, N, K) tiled matmul with an f32 K-reduction
    # accumulator (pl.when init/finalize), dimension_semantics=("parallel",
    # "parallel", "arbitrary"), M tiles 128 (v5e) / 256 (v6e, v7x), tn/tk
    # multiples of 256 (128 on v5e), and a per-generation vmem_limit_bytes
    # (tiles roughly halved for v7x's 64 MiB VMEM vs 128 MiB on v5e/v6e).
    return pl.pallas_call(
        head_kernel,
        out_shape=jax.ShapeDtypeStruct((r_pad, out_pad), jnp.float32),
        grid_spec=pltpu.PrefetchScalarGridSpec(
            num_scalar_prefetch=0,
            grid=(r_pad // tm,),
            in_specs=[
                pl.BlockSpec((tm, k_pad), lambda i: (i, 0)),
                pl.BlockSpec((k_pad, fc), lambda i: (0, 0)),
                pl.BlockSpec((1, fc), lambda i: (0, 0)),
                pl.BlockSpec((fc, fc), lambda i: (0, 0)),
                pl.BlockSpec((1, fc), lambda i: (0, 0)),
                pl.BlockSpec((fc, out_pad), lambda i: (0, 0)),
                pl.BlockSpec((1, out_pad), lambda i: (0, 0)),
            ],
            out_specs=pl.BlockSpec((tm, out_pad), lambda i: (i, 0)),
        ),
        compiler_params=pltpu.CompilerParams(
            dimension_semantics=("parallel",)),   # M rows independent (2x on v7x)
    )(pool_flat, params["w6"], params["b6"], params["w7"], params["b7"],
      params["wo"], params["bo"])


# ----------------------------------------------------------------------------
# Glue: torchvision-RoIPool integer bin boundaries (scalar index math).
# ----------------------------------------------------------------------------
def _roi_bin_bounds(boxes_xyxy, spatial_scale, H, W, S):
    x1, y1, x2, y2 = (boxes_xyxy[:, i] for i in range(4))
    # round() half-away-from-zero for non-negative coords == floor(x + 0.5)
    roi_start_w = jnp.floor(x1 * spatial_scale + 0.5).astype(jnp.int32)
    roi_start_h = jnp.floor(y1 * spatial_scale + 0.5).astype(jnp.int32)
    roi_end_w = jnp.floor(x2 * spatial_scale + 0.5).astype(jnp.int32)
    roi_end_h = jnp.floor(y2 * spatial_scale + 0.5).astype(jnp.int32)
    roi_w = jnp.maximum(roi_end_w - roi_start_w + 1, 1)
    roi_h = jnp.maximum(roi_end_h - roi_start_h + 1, 1)
    bin_h = roi_h.astype(jnp.float32) / S
    bin_w = roi_w.astype(jnp.float32) / S
    p = jnp.arange(S, dtype=jnp.float32)
    hstart = jnp.floor(p[None, :] * bin_h[:, None]).astype(jnp.int32) + roi_start_h[:, None]
    hend = jnp.ceil((p[None, :] + 1.0) * bin_h[:, None]).astype(jnp.int32) + roi_start_h[:, None]
    wstart = jnp.floor(p[None, :] * bin_w[:, None]).astype(jnp.int32) + roi_start_w[:, None]
    wend = jnp.ceil((p[None, :] + 1.0) * bin_w[:, None]).astype(jnp.int32) + roi_start_w[:, None]
    hstart = jnp.clip(hstart, 0, H)
    hend = jnp.clip(hend, 0, H)
    wstart = jnp.clip(wstart, 0, W)
    wend = jnp.clip(wend, 0, W)
    return hstart, hend, wstart, wend


@functools.partial(jax.jit, static_argnames=("roi_size", "n_class"))
def vgg16_roi_head_forward(params, x_nchw, rois, roi_indices,
                           *, roi_size=ROI_SIZE, spatial_scale=1.0 / 16,
                           n_class=N_CLASS):
    # Mirror the PyTorch forward's tensor plumbing exactly.
    roi_indices = roi_indices.astype(jnp.float32)
    rois = rois.astype(jnp.float32)
    indices_and_rois = jnp.concatenate([roi_indices[:, None], rois], axis=1)
    xy_indices_and_rois = indices_and_rois[:, jnp.array([0, 2, 1, 4, 3])]

    bidx = xy_indices_and_rois[:, 0].astype(jnp.int32)
    boxes = xy_indices_and_rois[:, 1:5]          # (x1, y1, x2, y2)

    N, C, H, W = x_nchw.shape
    R = rois.shape[0]
    S = roi_size

    hs, he, ws_, we_ = _roi_bin_bounds(boxes, spatial_scale, H, W, S)

    # Group RoIs by batch index so consecutive grid steps hit the same feature
    # map block (Pallas skips the redundant HBM->VMEM DMA); un-permute at end.
    order = jnp.argsort(bidx)
    inv = jnp.argsort(order)
    bidx_s = bidx[order]
    # 1D (R*S,) SMEM tables indexed as r*S + p inside the kernel.
    hs_s = hs[order].reshape(-1)
    he_s = he[order].reshape(-1)
    ws_s = ws_[order].reshape(-1)
    we_s = we_[order].reshape(-1)

    # NCHW -> NHWC for the pool kernel (channels on lanes), cast once to bf16
    # (halves the dominant feature-map DMA; max-pool is exact in bf16).
    # TODO(synk): have the backbone emit NHWC directly to drop this transpose.
    x_nhwc = jnp.transpose(x_nchw, (0, 2, 3, 1)).astype(jnp.bfloat16)
    pool = roi_pool(x_nhwc, bidx_s, hs_s, he_s, ws_s, we_s, S)   # (R, S, S, C) bf16

    # Flatten in (S, S, C) order; the CHW->HWC permutation is folded into w6's
    # rows in prepare_params, so this equals pool.view(R, -1) @ W6.
    K = S * S * C
    k_pad = params["w6"].shape[0]
    r_pad = ((R + 15) // 16) * 16                # bf16 sublane packing (16 rows)
    # TODO(synk): at production scale, emit the pool directly as a lane-dense
    # (r_pad, k_pad) bf16 slab from the pool kernel to remove this XLA
    # reshape+pad HBM round trip; the in-kernel (S,S,C)->(1,K) sublane->lane
    # fold is not a generally supported Mosaic shape cast (esp. C<128), so it
    # is deferred here (bf16 already halves the traffic; negligible at test scale).
    pool_flat = jnp.pad(pool.reshape(R, K),
                        ((0, r_pad - R), (0, k_pad - K)))

    out = head_mlp(pool_flat, params)            # (r_pad, OUT_PAD) f32
    loc_s = out[:R, : n_class * 4]
    score_s = out[:R, n_class * 4: n_class * 5]
    return loc_s[inv], score_s[inv]


def init_params(key, in_features, fc_dim=FC_DIM, n_class=N_CLASS):
    k6, k7, kl, ks = jax.random.split(key, 4)
    # classifier (synthetic VGG fc layers), eval-mode so no dropout.
    # TODO(synk): `classifier` is an externally supplied module in the original;
    # here it is a deterministic Linear-ReLU-Linear-ReLU stand-in.
    params = {
        # w6 rows are in PyTorch's (C, S, S) flatten order, as the original module expects.
        "w6": 0.01 * jax.random.normal(k6, (in_features, fc_dim), jnp.float32),
        "b6": jnp.zeros((1, fc_dim), jnp.float32),
        "w7": 0.01 * jax.random.normal(k7, (fc_dim, fc_dim), jnp.float32),
        "b7": jnp.zeros((1, fc_dim), jnp.float32),
        # normal_init(cls_loc, 0, 0.001), bias zero
        "wl": 0.001 * jax.random.normal(kl, (fc_dim, n_class * 4), jnp.float32),
        "bl": jnp.zeros((1, n_class * 4), jnp.float32),
        # normal_init(score, 0, 0.01), bias zero
        "ws": 0.01 * jax.random.normal(ks, (fc_dim, n_class), jnp.float32),
        "bs": jnp.zeros((1, n_class), jnp.float32),
    }
    return params


def prepare_params(params, in_channels, roi_size=ROI_SIZE):
    """One-time weight prep: fold the (C,S,S)->(S,S,C) flatten permutation into
    w6's rows, pad K to a lane multiple, fuse cls_loc|score into one lane-dense
    output head, and cast matmul weights to bf16 (biases stay f32)."""
    S, C = roi_size, in_channels
    K = C * S * S
    k_pad = ((K + 127) // 128) * 128
    w6 = params["w6"]
    F = w6.shape[1]
    # row (c, ph, pw) -> row (ph, pw, c): numerically identical to the PyTorch
    # pool.view(R, -1) @ W6 once the pool is flattened in (S, S, C) order.
    w6_hwc = w6.reshape(C, S, S, F).transpose(1, 2, 0, 3).reshape(K, F)
    w6_p = jnp.zeros((k_pad, F), jnp.float32).at[:K].set(w6_hwc)

    wo = jnp.concatenate([params["wl"], params["ws"]], axis=1)   # (F, 5*n_class)
    bo = jnp.concatenate([params["bl"], params["bs"]], axis=1)   # (1, 5*n_class)
    n_out = wo.shape[1]
    wo_p = jnp.zeros((F, OUT_PAD), jnp.float32).at[:, :n_out].set(wo)
    bo_p = jnp.zeros((1, OUT_PAD), jnp.float32).at[:, :n_out].set(bo)

    return {
        "w6": w6_p.astype(jnp.bfloat16), "b6": params["b6"],
        "w7": params["w7"].astype(jnp.bfloat16), "b7": params["b7"],
        "wo": wo_p.astype(jnp.bfloat16), "bo": bo_p,
    }


if __name__ == "__main__":
    key = jax.random.PRNGKey(0)
    kx, kr1, kr2, kp = jax.random.split(key, 4)

    N, C, H, W = 2, 8, 16, 16        # feature map (NCHW), VGG stride-16 scale
    R = 8                            # number of RoIs
    img = H * 16                     # image-space extent (spatial_scale = 1/16)

    x = jax.random.normal(kx, (N, C, H, W), dtype=jnp.float32)

    # rois are (y1, x1, y2, x2) in image coordinates, as in the original code.
    tl = jax.random.uniform(kr1, (R, 2), minval=0.0, maxval=img - 64.0)
    wh = jax.random.uniform(kr2, (R, 2), minval=32.0, maxval=96.0)
    br = jnp.clip(tl + wh, 0.0, img - 1.0)
    rois = jnp.concatenate([tl, br], axis=1)
    roi_indices = jnp.array([0, 1, 0, 1, 1, 0, 1, 0], dtype=jnp.float32)

    raw_params = init_params(kp, C * ROI_SIZE * ROI_SIZE)
    params = prepare_params(raw_params, C, ROI_SIZE)

    roi_cls_locs, roi_scores = vgg16_roi_head_forward(
        params, x, rois, roi_indices,
        roi_size=ROI_SIZE, spatial_scale=1.0 / 16, n_class=N_CLASS)

    jax.block_until_ready((roi_cls_locs, roi_scores))
    assert roi_cls_locs.shape == (R, N_CLASS * 4)
    assert roi_scores.shape == (R, N_CLASS)
    assert bool(jnp.all(jnp.isfinite(roi_cls_locs)))
    assert bool(jnp.all(jnp.isfinite(roi_scores)))
    print("KERNEL_OK")
</pallas_src>

<mosaic_0001>
module attributes {stable_mosaic.version = 11 : i64} {
  func.func @head_kernel(%arg0: i32, %arg1: memref<16x512xbf16, #tpu.memory_space<vmem>>, %arg2: memref<512x256xbf16, #tpu.memory_space<vmem>>, %arg3: memref<1x256xf32, #tpu.memory_space<vmem>>, %arg4: memref<256x256xbf16, #tpu.memory_space<vmem>>, %arg5: memref<1x256xf32, #tpu.memory_space<vmem>>, %arg6: memref<256x128xbf16, #tpu.memory_space<vmem>>, %arg7: memref<1x128xf32, #tpu.memory_space<vmem>>, %arg8: memref<16x128xf32, #tpu.memory_space<vmem>>) attributes {dimension_semantics = [#tpu.dimension_semantics<parallel>], iteration_bounds = array<i64: 1>, scalar_prefetch = 0 : i64, scratch_operands = 0 : i64, tpu.core_type = #tpu.core_type<tc>, window_params = [{transform_indices = @transform_0, window_bounds = array<i64: 16, 512>}, {pipeline_mode = #tpu.pipeline_mode<synchronous>, transform_indices = @transform_1, window_bounds = array<i64: 512, 256>}, {pipeline_mode = #tpu.pipeline_mode<synchronous>, transform_indices = @transform_2, window_bounds = array<i64: 1, 256>}, {pipeline_mode = #tpu.pipeline_mode<synchronous>, transform_indices = @transform_3, window_bounds = array<i64: 256, 256>}, {pipeline_mode = #tpu.pipeline_mode<synchronous>, transform_indices = @transform_4, window_bounds = array<i64: 1, 256>}, {pipeline_mode = #tpu.pipeline_mode<synchronous>, transform_indices = @transform_5, window_bounds = array<i64: 256, 128>}, {pipeline_mode = #tpu.pipeline_mode<synchronous>, transform_indices = @transform_6, window_bounds = array<i64: 1, 128>}, {transform_indices = @transform_7, window_bounds = array<i64: 16, 128>}]} {
    %c0 = arith.constant 0 : index
    %c0_0 = arith.constant 0 : index
    %0 = vector.load %arg1[%c0, %c0_0] : memref<16x512xbf16, #tpu.memory_space<vmem>>, vector<16x512xbf16>
    %c0_1 = arith.constant 0 : index
    %c0_2 = arith.constant 0 : index
    %1 = vector.load %arg2[%c0_1, %c0_2] : memref<512x256xbf16, #tpu.memory_space<vmem>>, vector<512x256xbf16>
    %cst = arith.constant dense<0.000000e+00> : vector<16x256xf32>
    %2 = tpu.matmul %0, %1, %cst {dimension_numbers = #tpu.dot_dimension_numbers<[1], [0], [0], [1], [0, 0, 1, 1], [], []>} : vector<16x512xbf16>, vector<512x256xbf16>, vector<16x256xf32> -> vector<16x256xf32>
    %c0_3 = arith.constant 0 : index
    %c0_4 = arith.constant 0 : index
    %3 = vector.load %arg3[%c0_3, %c0_4] : memref<1x256xf32, #tpu.memory_space<vmem>>, vector<1x256xf32>
    %4 = vector.broadcast %3 : vector<1x256xf32> to vector<16x256xf32>
    %5 = arith.addf %2, %4 : vector<16x256xf32>
    %cst_5 = arith.constant 0.000000e+00 : f32
    %6 = vector.broadcast %cst_5 : f32 to vector<16x256xf32>
    %7 = arith.maximumf %5, %6 : vector<16x256xf32>
    %8 = arith.truncf %7 : vector<16x256xf32> to vector<16x256xbf16>
    %c0_6 = arith.constant 0 : index
    %c0_7 = arith.constant 0 : index
    %9 = vector.load %arg4[%c0_6, %c0_7] : memref<256x256xbf16, #tpu.memory_space<vmem>>, vector<256x256xbf16>
    %cst_8 = arith.constant dense<0.000000e+00> : vector<16x256xf32>
    %10 = tpu.matmul %8, %9, %cst_8 {dimension_numbers = #tpu.dot_dimension_numbers<[1], [0], [0], [1], [0, 0, 1, 1], [], []>} : vector<16x256xbf16>, vector<256x256xbf16>, vector<16x256xf32> -> vector<16x256xf32>
    %c0_9 = arith.constant 0 : index
    %c0_10 = arith.constant 0 : index
    %11 = vector.load %arg5[%c0_9, %c0_10] : memref<1x256xf32, #tpu.memory_space<vmem>>, vector<1x256xf32>
    %12 = vector.broadcast %11 : vector<1x256xf32> to vector<16x256xf32>
    %13 = arith.addf %10, %12 : vector<16x256xf32>
    %cst_11 = arith.constant 0.000000e+00 : f32
    %14 = vector.broadcast %cst_11 : f32 to vector<16x256xf32>
    %15 = arith.maximumf %13, %14 : vector<16x256xf32>
    %16 = arith.truncf %15 : vector<16x256xf32> to vector<16x256xbf16>
    %c0_12 = arith.constant 0 : index
    %c0_13 = arith.constant 0 : index
    %17 = vector.load %arg6[%c0_12, %c0_13] : memref<256x128xbf16, #tpu.memory_space<vmem>>, vector<256x128xbf16>
    %cst_14 = arith.constant dense<0.000000e+00> : vector<16x128xf32>
    %18 = tpu.matmul %16, %17, %cst_14 {dimension_numbers = #tpu.dot_dimension_numbers<[1], [0], [0], [1], [0, 0, 1, 1], [], []>} : vector<16x256xbf16>, vector<256x128xbf16>, vector<16x128xf32> -> vector<16x128xf32>
    %c0_15 = arith.constant 0 : index
    %c0_16 = arith.constant 0 : index
    %19 = vector.load %arg7[%c0_15, %c0_16] : memref<1x128xf32, #tpu.memory_space<vmem>>, vector<1x128xf32>
    %20 = vector.broadcast %19 : vector<1x128xf32> to vector<16x128xf32>
    %21 = arith.addf %18, %20 : vector<16x128xf32>
    %c0_17 = arith.constant 0 : index
    %c0_18 = arith.constant 0 : index
    %22 = vector.load %arg8[%c0_17, %c0_18] : memref<16x128xf32, #tpu.memory_space<vmem>>, vector<16x128xf32>
    tpu.vector_store %arg8[%c0_17, %c0_18], %21 {strides = array<i32>} : memref<16x128xf32, #tpu.memory_space<vmem>>, vector<16x128xf32>,
    return
  }
  func.func @transform_0(%arg0: i32) -> (i32, i32) {
    %c0_i32 = arith.constant 0 : i32
    %c0_i32_0 = arith.constant 0 : i32
    return %arg0, %c0_i32 : i32, i32
  }
  func.func @transform_1(%arg0: i32) -> (i32, i32) {
    %c0_i32 = arith.constant 0 : i32
    %c0_i32_0 = arith.constant 0 : i32
    %c0_i32_1 = arith.constant 0 : i32
    return %c0_i32, %c0_i32_0 : i32, i32
  }
  func.func @transform_2(%arg0: i32) -> (i32, i32) {
    %c0_i32 = arith.constant 0 : i32
    %c0_i32_0 = arith.constant 0 : i32
    %c0_i32_1 = arith.constant 0 : i32
    return %c0_i32, %c0_i32_0 : i32, i32
  }
  func.func @transform_3(%arg0: i32) -> (i32, i32) {
    %c0_i32 = arith.constant 0 : i32
    %c0_i32_0 = arith.constant 0 : i32
    %c0_i32_1 = arith.constant 0 : i32
    return %c0_i32, %c0_i32_0 : i32, i32
  }
  func.func @transform_4(%arg0: i32) -> (i32, i32) {
    %c0_i32 = arith.constant 0 : i32
    %c0_i32_0 = arith.constant 0 : i32
    %c0_i32_1 = arith.constant 0 : i32
    return %c0_i32, %c0_i32_0 : i32, i32
  }
  func.func @transform_5(%arg0: i32) -> (i32, i32) {
    %c0_i32 = arith.constant 0 : i32
    %c0_i32_0 = arith.constant 0 : i32
    %c0_i32_1 = arith.constant 0 : i32
    return %c0_i32, %c0_i32_0 : i32, i32
  }
  func.func @transform_6(%arg0: i32) -> (i32, i32) {
    %c0_i32 = arith.constant 0 : i32
    %c0_i32_0 = arith.constant 0 : i32
    %c0_i32_1 = arith.constant 0 : i32
    return %c0_i32, %c0_i32_0 : i32, i32
  }
  func.func @transform_7(%arg0: i32) -> (i32, i32) {
    %c0_i32 = arith.constant 0 : i32
    %c0_i32_0 = arith.constant 0 : i32
    return %arg0, %c0_i32 : i32, i32
  }
}

module attributes {stable_mosaic.version = 11 : i64} {
  func.func @roi_pool_kernel(%arg0: i32, %arg1: memref<8xi32, #tpu.memory_space<smem>>, %arg2: memref<56xi32, #tpu.memory_space<smem>>, %arg3: memref<56xi32, #tpu.memory_space<smem>>, %arg4: memref<56xi32, #tpu.memory_space<smem>>, %arg5: memref<56xi32, #tpu.memory_space<smem>>, %arg6: memref<1x16x16x8xbf16, #tpu.memory_space<vmem>>, %arg7: memref<1x7x7x8xbf16, #tpu.memory_space<vmem>>, %arg8: memref<7x16x8xf32, #tpu.memory_space<vmem>>) attributes {dimension_semantics = [#tpu.dimension_semantics<parallel>], iteration_bounds = array<i64: 8>, scalar_prefetch = 5 : i64, scratch_operands = 1 : i64, tpu.core_type = #tpu.core_type<tc>, window_params = [{transform_indices = @transform_0, window_bounds = array<i64: 1, 16, 16, 8>}, {transform_indices = @transform_1, window_bounds = array<i64: 1, 7, 7, 8>}]} {
    %c7_i32 = arith.constant 7 : i32
    %0 = arith.muli %arg0, %c7_i32 : i32
    %c0 = arith.constant 0 : index
    %c0_0 = arith.constant 0 : index
    %c0_1 = arith.constant 0 : index
    %c0_2 = arith.constant 0 : index
    %1 = vector.load %arg6[%c0, %c0_0, %c0_1, %c0_2] : memref<1x16x16x8xbf16, #tpu.memory_space<vmem>>, vector<1x16x16x8xbf16>
    %2 = vector.shape_cast %1 : vector<1x16x16x8xbf16> to vector<16x16x8xbf16>
    %3 = arith.extf %2 : vector<16x16x8xbf16> to vector<16x16x8xf32>
    %4 = tpu.iota {dimensions = array<i32: 1>} : vector<1x16x1xi32>
    %5 = tpu.iota {dimensions = array<i32: 1>} : vector<1x16x1xi32>
    %c0_i32 = arith.constant 0 : i32
    %6 = arith.addi %0, %c0_i32 : i32
    %7 = arith.index_cast %6 : i32 to index
    %8 = memref.load %arg4[%7] : memref<56xi32, #tpu.memory_space<smem>>
    %c0_i32_3 = arith.constant 0 : i32
    %9 = arith.addi %0, %c0_i32_3 : i32
    %10 = arith.index_cast %9 : i32 to index
    %11 = memref.load %arg5[%10] : memref<56xi32, #tpu.memory_space<smem>>
    %12 = vector.broadcast %8 : i32 to vector<1x16x1xi32>
    %13 = arith.cmpi sge, %4, %12 : vector<1x16x1xi32>
    %14 = vector.broadcast %11 : i32 to vector<1x16x1xi32>
    %15 = arith.cmpi slt, %4, %14 : vector<1x16x1xi32>
    %16 = arith.andi %13, %15 : vector<1x16x1xi1>
    %cst = arith.constant -3.40282347E+38 : f32
    %17 = vector.shape_cast %16 : vector<1x16x1xi1> to vector<1x16x1xi1>
    %18 = vector.broadcast %17 : vector<1x16x1xi1> to vector<16x16x8xi1>
    %19 = vector.broadcast %cst : f32 to vector<16x16x8xf32>
    %20 = arith.select %18, %3, %19 : vector<16x16x8xi1>, vector<16x16x8xf32>
    %cst_4 = arith.constant dense<0xFF800000> : vector<16x8xf32>
    %21 = vector.multi_reduction <maximumf>, %20, %cst_4 [1] : vector<16x16x8xf32> to vector<16x8xf32>
    %22 = arith.cmpi sgt, %11, %8 : i32
    %cst_5 = arith.constant 0.000000e+00 : f32
    %23 = vector.broadcast %cst_5 : f32 to vector<16x8xf32>
    %24 = arith.select %22, %21, %23 : vector<16x8xf32>
    %c0_6 = arith.constant 0 : index
    %c0_7 = arith.constant 0 : index
    %c0_8 = arith.constant 0 : index
    %25 = vector.load %arg8[%c0_6, %c0_7, %c0_8] : memref<7x16x8xf32, #tpu.memory_space<vmem>>, vector<1x16x8xf32>
    %26 = vector.shape_cast %25 : vector<1x16x8xf32> to vector<16x8xf32>
    %27 = vector.shape_cast %24 : vector<16x8xf32> to vector<1x16x8xf32>
    tpu.vector_store %arg8[%c0_6, %c0_7, %c0_8], %27 {strides = array<i32>} : memref<7x16x8xf32, #tpu.memory_space<vmem>>, vector<1x16x8xf32>,
    %c1_i32 = arith.constant 1 : i32
    %28 = arith.addi %0, %c1_i32 : i32
    %29 = arith.index_cast %28 : i32 to index
    %30 = memref.load %arg4[%29] : memref<56xi32, #tpu.memory_space<smem>>
    %c1_i32_9 = arith.constant 1 : i32
    %31 = arith.addi %0, %c1_i32_9 : i32
    %32 = arith.index_cast %31 : i32 to index
    %33 = memref.load %arg5[%32] : memref<56xi32, #tpu.memory_space<smem>>
    %34 = vector.broadcast %30 : i32 to vector<1x16x1xi32>
    %35 = arith.cmpi sge, %4, %34 : vector<1x16x1xi32>
    %36 = vector.broadcast %33 : i32 to vector<1x16x1xi32>
    %37 = arith.cmpi slt, %4, %36 : vector<1x16x1xi32>
    %38 = arith.andi %35, %37 : vector<1x16x1xi1>
    %cst_10 = arith.constant -3.40282347E+38 : f32
    %39 = vector.shape_cast %38 : vector<1x16x1xi1> to vector<1x16x1xi1>
    %40 = vector.broadcast %39 : vector<1x16x1xi1> to vector<16x16x8xi1>
    %41 = vector.broadcast %cst_10 : f32 to vector<16x16x8xf32>
    %42 = arith.select %40, %3, %41 : vector<16x16x8xi1>, vector<16x16x8xf32>
    %cst_11 = arith.constant dense<0xFF800000> : vector<16x8xf32>
    %43 = vector.multi_reduction <maximumf>, %42, %cst_11 [1] : vector<16x16x8xf32> to vector<16x8xf32>
    %44 = arith.cmpi sgt, %33, %30 : i32
    %cst_12 = arith.constant 0.000000e+00 : f32
    %45 = vector.broadcast %cst_12 : f32 to vector<16x8xf32>
    %46 = arith.select %44, %43, %45 : vector<16x8xf32>
    %c1 = arith.constant 1 : index
    %c0_13 = arith.constant 0 : index
    %c0_14 = arith.constant 0 : index
    %47 = vector.load %arg8[%c1, %c0_13, %c0_14] : memref<7x16x8xf32, #tpu.memory_space<vmem>>, vector<1x16x8xf32>
    %48 = vector.shape_cast %47 : vector<1x16x8xf32> to vector<16x8xf32>
    %49 = vector.shape_cast %46 : vector<16x8xf32> to vector<1x16x8xf32>
    tpu.vector_store %arg8[%c1, %c0_13, %c0_14], %49 {strides = array<i32>} : memref<7x16x8xf32, #tpu.memory_space<vmem>>, vector<1x16x8xf32>,
    %c2_i32 = arith.constant 2 : i32
    %50 = arith.addi %0, %c2_i32 : i32
    %51 = arith.index_cast %50 : i32 to index
    %52 = memref.load %arg4[%51] : memref<56xi32, #tpu.memory_space<smem>>
    %c2_i32_15 = arith.constant 2 : i32
    %53 = arith.addi %0, %c2_i32_15 : i32
    %54 = arith.index_cast %53 : i32 to index
    %55 = memref.load %arg5[%54] : memref<56xi32, #tpu.memory_space<smem>>
    %56 = vector.broadcast %52 : i32 to vector<1x16x1xi32>
    %57 = arith.cmpi sge, %4, %56 : vector<1x16x1xi32>
    %58 = vector.broadcast %55 : i32 to vector<1x16x1xi32>
    %59 = arith.cmpi slt, %4, %58 : vector<1x16x1xi32>
    %60 = arith.andi %57, %59 : vector<1x16x1xi1>
    %cst_16 = arith.constant -3.40282347E+38 : f32
    %61 = vector.shape_cast %60 : vector<1x16x1xi1> to vector<1x16x1xi1>
    %62 = vector.broadcast %61 : vector<1x16x1xi1> to vector<16x16x8xi1>
    %63 = vector.broadcast %cst_16 : f32 to vector<16x16x8xf32>
    %64 = arith.select %62, %3, %63 : vector<16x16x8xi1>, vector<16x16x8xf32>
    %cst_17 = arith.constant dense<0xFF800000> : vector<16x8xf32>
    %65 = vector.multi_reduction <maximumf>, %64, %cst_17 [1] : vector<16x16x8xf32> to vector<16x8xf32>
    %66 = arith.cmpi sgt, %55, %52 : i32
    %cst_18 = arith.constant 0.000000e+00 : f32
    %67 = vector.broadcast %cst_18 : f32 to vector<16x8xf32>
    %68 = arith.select %66, %65, %67 : vector<16x8xf32>
    %c2 = arith.constant 2 : index
    %c0_19 = arith.constant 0 : index
    %c0_20 = arith.constant 0 : index
    %69 = vector.load %arg8[%c2, %c0_19, %c0_20] : memref<7x16x8xf32, #tpu.memory_space<vmem>>, vector<1x16x8xf32>
    %70 = vector.shape_cast %69 : vector<1x16x8xf32> to vector<16x8xf32>
    %71 = vector.shape_cast %68 : vector<16x8xf32> to vector<1x16x8xf32>
    tpu.vector_store %arg8[%c2, %c0_19, %c0_20], %71 {strides = array<i32>} : memref<7x16x8xf32, #tpu.memory_space<vmem>>, vector<1x16x8xf32>,
    %c3_i32 = arith.constant 3 : i32
    %72 = arith.addi %0, %c3_i32 : i32
    %73 = arith.index_cast %72 : i32 to index
    %74 = memref.load %arg4[%73] : memref<56xi32, #tpu.memory_space<smem>>
    %c3_i32_21 = arith.constant 3 : i32
    %75 = arith.addi %0, %c3_i32_21 : i32
    %76 = arith.index_cast %75 : i32 to index
    %77 = memref.load %arg5[%76] : memref<56xi32, #tpu.memory_space<smem>>
    %78 = vector.broadcast %74 : i32 to vector<1x16x1xi32>
    %79 = arith.cmpi sge, %4, %78 : vector<1x16x1xi32>
    %80 = vector.broadcast %77 : i32 to vector<1x16x1xi32>
    %81 = arith.cmpi slt, %4, %80 : vector<1x16x1xi32>
    %82 = arith.andi %79, %81 : vector<1x16x1xi1>
    %cst_22 = arith.constant -3.40282347E+38 : f32
    %83 = vector.shape_cast %82 : vector<1x16x1xi1> to vector<1x16x1xi1>
    %84 = vector.broadcast %83 : vector<1x16x1xi1> to vector<16x16x8xi1>
    %85 = vector.broadcast %cst_22 : f32 to vector<16x16x8xf32>
    %86 = arith.select %84, %3, %85 : vector<16x16x8xi1>, vector<16x16x8xf32>
    %cst_23 = arith.constant dense<0xFF800000> : vector<16x8xf32>
    %87 = vector.multi_reduction <maximumf>, %86, %cst_23 [1] : vector<16x16x8xf32> to vector<16x8xf32>
    %88 = arith.cmpi sgt, %77, %74 : i32
    %cst_24 = arith.constant 0.000000e+00 : f32
    %89 = vector.broadcast %cst_24 : f32 to vector<16x8xf32>
    %90 = arith.select %88, %87, %89 : vector<16x8xf32>
    %c3 = arith.constant 3 : index
    %c0_25 = arith.constant 0 : index
    %c0_26 = arith.constant 0 : index
    %91 = vector.load %arg8[%c3, %c0_25, %c0_26] : memref<7x16x8xf32, #tpu.memory_space<vmem>>, vector<1x16x8xf32>
    %92 = vector.shape_cast %91 : vector<1x16x8xf32> to vector<16x8xf32>
    %93 = vector.shape_cast %90 : vector<16x8xf32> to vector<1x16x8xf32>
    tpu.vector_store %arg8[%c3, %c0_25, %c0_26], %93 {strides = array<i32>} : memref<7x16x8xf32, #tpu.memory_space<vmem>>, vector<1x16x8xf32>,
    %c4_i32 = arith.constant 4 : i32
    %94 = arith.addi %0, %c4_i32 : i32
    %95 = arith.index_cast %94 : i32 to index
    %96 = memref.load %arg4[%95] : memref<56xi32, #tpu.memory_space<smem>>
    %c4_i32_27 = arith.constant 4 : i32
    %97 = arith.addi %0, %c4_i32_27 : i32
    %98 = arith.index_cast %97 : i32 to index
    %99 = memref.load %arg5[%98] : memref<56xi32, #tpu.memory_space<smem>>
    %100 = vector.broadcast %96 : i32 to vector<1x16x1xi32>
    %101 = arith.cmpi sge, %4, %100 : vector<1x16x1xi32>
    %102 = vector.broadcast %99 : i32 to vector<1x16x1xi32>
    %103 = arith.cmpi slt, %4, %102 : vector<1x16x1xi32>
    %104 = arith.andi %101, %103 : vector<1x16x1xi1>
    %cst_28 = arith.constant -3.40282347E+38 : f32
    %105 = vector.shape_cast %104 : vector<1x16x1xi1> to vector<1x16x1xi1>
    %106 = vector.broadcast %105 : vector<1x16x1xi1> to vector<16x16x8xi1>
    %107 = vector.broadcast %cst_28 : f32 to vector<16x16x8xf32>
    %108 = arith.select %106, %3, %107 : vector<16x16x8xi1>, vector<16x16x8xf32>
    %cst_29 = arith.constant dense<0xFF800000> : vector<16x8xf32>
    %109 = vector.multi_reduction <maximumf>, %108, %cst_29 [1] : vector<16x16x8xf32> to vector<16x8xf32>
    %110 = arith.cmpi sgt, %99, %96 : i32
    %cst_30 = arith.constant 0.000000e+00 : f32
    %111 = vector.broadcast %cst_30 : f32 to vector<16x8xf32>
    %112 = arith.select %110, %109, %111 : vector<16x8xf32>
    %c4 = arith.constant 4 : index
    %c0_31 = arith.constant 0 : index
    %c0_32 = arith.constant 0 : index
    %113 = vector.load %arg8[%c4, %c0_31, %c0_32] : memref<7x16x8xf32, #tpu.memory_space<vmem>>, vector<1x16x8xf32>
    %114 = vector.shape_cast %113 : vector<1x16x8xf32> to vector<16x8xf32>
    %115 = vector.shape_cast %112 : vector<16x8xf32> to vector<1x16x8xf32>
    tpu.vector_store %arg8[%c4, %c0_31, %c0_32], %115 {strides = array<i32>} : memref<7x16x8xf32, #tpu.memory_space<vmem>>, vector<1x16x8xf32>,
    %c5_i32 = arith.constant 5 : i32
    %116 = arith.addi %0, %c5_i32 : i32
    %117 = arith.index_cast %116 : i32 to index
    %118 = memref.load %arg4[%117] : memref<56xi32, #tpu.memory_space<smem>>
    %c5_i32_33 = arith.constant 5 : i32
    %119 = arith.addi %0, %c5_i32_33 : i32
    %120 = arith.index_cast %119 : i32 to index
    %121 = memref.load %arg5[%120] : memref<56xi32, #tpu.memory_space<smem>>
    %122 = vector.broadcast %118 : i32 to vector<1x16x1xi32>
    %123 = arith.cmpi sge, %4, %122 : vector<1x16x1xi32>
    %124 = vector.broadcast %121 : i32 to vector<1x16x1xi32>
    %125 = arith.cmpi slt, %4, %124 : vector<1x16x1xi32>
    %126 = arith.andi %123, %125 : vector<1x16x1xi1>
    %cst_34 = arith.constant -3.40282347E+38 : f32
    %127 = vector.shape_cast %126 : vector<1x16x1xi1> to vector<1x16x1xi1>
    %128 = vector.broadcast %127 : vector<1x16x1xi1> to vector<16x16x8xi1>
    %129 = vector.broadcast %cst_34 : f32 to vector<16x16x8xf32>
    %130 = arith.select %128, %3, %129 : vector<16x16x8xi1>, vector<16x16x8xf32>
    %cst_35 = arith.constant dense<0xFF800000> : vector<16x8xf32>
    %131 = vector.multi_reduction <maximumf>, %130, %cst_35 [1] : vector<16x16x8xf32> to vector<16x8xf32>
    %132 = arith.cmpi sgt, %121, %118 : i32
    %cst_36 = arith.constant 0.000000e+00 : f32
    %133 = vector.broadcast %cst_36 : f32 to vector<16x8xf32>
    %134 = arith.select %132, %131, %133 : vector<16x8xf32>
    %c5 = arith.constant 5 : index
    %c0_37 = arith.constant 0 : index
    %c0_38 = arith.constant 0 : index
    %135 = vector.load %arg8[%c5, %c0_37, %c0_38] : memref<7x16x8xf32, #tpu.memory_space<vmem>>, vector<1x16x8xf32>
    %136 = vector.shape_cast %135 : vector<1x16x8xf32> to vector<16x8xf32>
    %137 = vector.shape_cast %134 : vector<16x8xf32> to vector<1x16x8xf32>
    tpu.vector_store %arg8[%c5, %c0_37, %c0_38], %137 {strides = array<i32>} : memref<7x16x8xf32, #tpu.memory_space<vmem>>, vector<1x16x8xf32>,
    %c6_i32 = arith.constant 6 : i32
    %138 = arith.addi %0, %c6_i32 : i32
    %139 = arith.index_cast %138 : i32 to index
    %140 = memref.load %arg4[%139] : memref<56xi32, #tpu.memory_space<smem>>
    %c6_i32_39 = arith.constant 6 : i32
    %141 = arith.addi %0, %c6_i32_39 : i32
    %142 = arith.index_cast %141 : i32 to index
    %143 = memref.load %arg5[%142] : memref<56xi32, #tpu.memory_space<smem>>
    %144 = vector.broadcast %140 : i32 to vector<1x16x1xi32>
    %145 = arith.cmpi sge, %4, %144 : vector<1x16x1xi32>
    %146 = vector.broadcast %143 : i32 to vector<1x16x1xi32>
    %147 = arith.cmpi slt, %4, %146 : vector<1x16x1xi32>
    %148 = arith.andi %145, %147 : vector<1x16x1xi1>
    %cst_40 = arith.constant -3.40282347E+38 : f32
    %149 = vector.shape_cast %148 : vector<1x16x1xi1> to vector<1x16x1xi1>
    %150 = vector.broadcast %149 : vector<1x16x1xi1> to vector<16x16x8xi1>
    %151 = vector.broadcast %cst_40 : f32 to vector<16x16x8xf32>
    %152 = arith.select %150, %3, %151 : vector<16x16x8xi1>, vector<16x16x8xf32>
    %cst_41 = arith.constant dense<0xFF800000> : vector<16x8xf32>
    %153 = vector.multi_reduction <maximumf>, %152, %cst_41 [1] : vector<16x16x8xf32> to vector<16x8xf32>
    %154 = arith.cmpi sgt, %143, %140 : i32
    %cst_42 = arith.constant 0.000000e+00 : f32
    %155 = vector.broadcast %cst_42 : f32 to vector<16x8xf32>
    %156 = arith.select %154, %153, %155 : vector<16x8xf32>
    %c6 = arith.constant 6 : index
    %c0_43 = arith.constant 0 : index
    %c0_44 = arith.constant 0 : index
    %157 = vector.load %arg8[%c6, %c0_43, %c0_44] : memref<7x16x8xf32, #tpu.memory_space<vmem>>, vector<1x16x8xf32>
    %158 = vector.shape_cast %157 : vector<1x16x8xf32> to vector<16x8xf32>
    %159 = vector.shape_cast %156 : vector<16x8xf32> to vector<1x16x8xf32>
    tpu.vector_store %arg8[%c6, %c0_43, %c0_44], %159 {strides = array<i32>} : memref<7x16x8xf32, #tpu.memory_space<vmem>>, vector<1x16x8xf32>,
    %c0_45 = arith.constant 0 : index
    %c0_46 = arith.constant 0 : index
    %c0_47 = arith.constant 0 : index
    %160 = vector.load %arg8[%c0_45, %c0_46, %c0_47] : memref<7x16x8xf32, #tpu.memory_space<vmem>>, vector<7x16x8xf32>
    %c0_i32_48 = arith.constant 0 : i32
    %161 = arith.addi %0, %c0_i32_48 : i32
    %162 = arith.index_cast %161 : i32 to index
    %163 = memref.load %arg2[%162] : memref<56xi32, #tpu.memory_space<smem>>
    %c0_i32_49 = arith.constant 0 : i32
    %164 = arith.addi %0, %c0_i32_49 : i32
    %165 = arith.index_cast %164 : i32 to index
    %166 = memref.load %arg3[%165] : memref<56xi32, #tpu.memory_space<smem>>
    %167 = vector.broadcast %163 : i32 to vector<1x16x1xi32>
    %168 = arith.cmpi sge, %5, %167 : vector<1x16x1xi32>
    %169 = vector.broadcast %166 : i32 to vector<1x16x1xi32>
    %170 = arith.cmpi slt, %5, %169 : vector<1x16x1xi32>
    %171 = arith.andi %168, %170 : vector<1x16x1xi1>
    %cst_50 = arith.constant -3.40282347E+38 : f32
    %172 = vector.shape_cast %171 : vector<1x16x1xi1> to vector<1x16x1xi1>
    %173 = vector.broadcast %172 : vector<1x16x1xi1> to vector<7x16x8xi1>
    %174 = vector.broadcast %cst_50 : f32 to vector<7x16x8xf32>
    %175 = arith.select %173, %160, %174 : vector<7x16x8xi1>, vector<7x16x8xf32>
    %cst_51 = arith.constant dense<0xFF800000> : vector<7x8xf32>
    %176 = vector.multi_reduction <maximumf>, %175, %cst_51 [1] : vector<7x16x8xf32> to vector<7x8xf32>
    %177 = arith.cmpi sgt, %166, %163 : i32
    %cst_52 = arith.constant 0.000000e+00 : f32
    %178 = vector.broadcast %cst_52 : f32 to vector<7x8xf32>
    %179 = arith.select %177, %176, %178 : vector<7x8xf32>
    %180 = arith.truncf %179 : vector<7x8xf32> to vector<7x8xbf16>
    %c0_53 = arith.constant 0 : index
    %c0_54 = arith.constant 0 : index
    %c0_55 = arith.constant 0 : index
    %c0_56 = arith.constant 0 : index
    %181 = vector.load %arg7[%c0_53, %c0_54, %c0_55, %c0_56] : memref<1x7x7x8xbf16, #tpu.memory_space<vmem>>, vector<1x1x7x8xbf16>
    %182 = vector.shape_cast %181 : vector<1x1x7x8xbf16> to vector<7x8xbf16>
    %183 = vector.shape_cast %180 : vector<7x8xbf16> to vector<1x1x7x8xbf16>
    tpu.vector_store %arg7[%c0_53, %c0_54, %c0_55, %c0_56], %183 {strides = array<i32>} : memref<1x7x7x8xbf16, #tpu.memory_space<vmem>>, vector<1x1x7x8xbf16>,
    %c1_i32_57 = arith.constant 1 : i32
    %184 = arith.addi %0, %c1_i32_57 : i32
    %185 = arith.index_cast %184 : i32 to index
    %186 = memref.load %arg2[%185] : memref<56xi32, #tpu.memory_space<smem>>
    %c1_i32_58 = arith.constant 1 : i32
    %187 = arith.addi %0, %c1_i32_58 : i32
    %188 = arith.index_cast %187 : i32 to index
    %189 = memref.load %arg3[%188] : memref<56xi32, #tpu.memory_space<smem>>
    %190 = vector.broadcast %186 : i32 to vector<1x16x1xi32>
    %191 = arith.cmpi sge, %5, %190 : vector<1x16x1xi32>
    %192 = vector.broadcast %189 : i32 to vector<1x16x1xi32>
    %193 = arith.cmpi slt, %5, %192 : vector<1x16x1xi32>
    %194 = arith.andi %191, %193 : vector<1x16x1xi1>
    %cst_59 = arith.constant -3.40282347E+38 : f32
    %195 = vector.shape_cast %194 : vector<1x16x1xi1> to vector<1x16x1xi1>
    %196 = vector.broadcast %195 : vector<1x16x1xi1> to vector<7x16x8xi1>
    %197 = vector.broadcast %cst_59 : f32 to vector<7x16x8xf32>
    %198 = arith.select %196, %160, %197 : vector<7x16x8xi1>, vector<7x16x8xf32>
    %cst_60 = arith.constant dense<0xFF800000> : vector<7x8xf32>
    %199 = vector.multi_reduction <maximumf>, %198, %cst_60 [1] : vector<7x16x8xf32> to vector<7x8xf32>
    %200 = arith.cmpi sgt, %189, %186 : i32
    %cst_61 = arith.constant 0.000000e+00 : f32
    %201 = vector.broadcast %cst_61 : f32 to vector<7x8xf32>
    %202 = arith.select %200, %199, %201 : vector<7x8xf32>
    %203 = arith.truncf %202 : vector<7x8xf32> to vector<7x8xbf16>
    %c0_62 = arith.constant 0 : index
    %c1_63 = arith.constant 1 : index
    %c0_64 = arith.constant 0 : index
    %c0_65 = arith.constant 0 : index
    %204 = vector.load %arg7[%c0_62, %c1_63, %c0_64, %c0_65] : memref<1x7x7x8xbf16, #tpu.memory_space<vmem>>, vector<1x1x7x8xbf16>
    %205 = vector.shape_cast %204 : vector<1x1x7x8xbf16> to vector<7x8xbf16>
    %206 = vector.shape_cast %203 : vector<7x8xbf16> to vector<1x1x7x8xbf16>
    tpu.vector_store %arg7[%c0_62, %c1_63, %c0_64, %c0_65], %206 {strides = array<i32>} : memref<1x7x7x8xbf16, #tpu.memory_space<vmem>>, vector<1x1x7x8xbf16>,
    %c2_i32_66 = arith.constant 2 : i32
    %207 = arith.addi %0, %c2_i32_66 : i32
    %208 = arith.index_cast %207 : i32 to index
    %209 = memref.load %arg2[%208] : memref<56xi32, #tpu.memory_space<smem>>
    %c2_i32_67 = arith.constant 2 : i32
    %210 = arith.addi %0, %c2_i32_67 : i32
    %211 = arith.index_cast %210 : i32 to index
    %212 = memref.load %arg3[%211] : memref<56xi32, #tpu.memory_space<smem>>
    %213 = vector.broadcast %209 : i32 to vector<1x16x1xi32>
    %214 = arith.cmpi sge, %5, %213 : vector<1x16x1xi32>
    %215 = vector.broadcast %212 : i32 to vector<1x16x1xi32>
    %216 = arith.cmpi slt, %5, %215 : vector<1x16x1xi32>
    %217 = arith.andi %214, %216 : vector<1x16x1xi1>
    %cst_68 = arith.constant -3.40282347E+38 : f32
    %218 = vector.shape_cast %217 : vector<1x16x1xi1> to vector<1x16x1xi1>
    %219 = vector.broadcast %218 : vector<1x16x1xi1> to vector<7x16x8xi1>
    %220 = vector.broadcast %cst_68 : f32 to vector<7x16x8xf32>
    %221 = arith.select %219, %160, %220 : vector<7x16x8xi1>, vector<7x16x8xf32>
    %cst_69 = arith.constant dense<0xFF800000> : vector<7x8xf32>
    %222 = vector.multi_reduction <maximumf>, %221, %cst_69 [1] : vector<7x16x8xf32> to vector<7x8xf32>
    %223 = arith.cmpi sgt, %212, %209 : i32
    %cst_70 = arith.constant 0.000000e+00 : f32
    %224 = vector.broadcast %cst_70 : f32 to vector<7x8xf32>
    %225 = arith.select %223, %222, %224 : vector<7x8xf32>
    %226 = arith.truncf %225 : vector<7x8xf32> to vector<7x8xbf16>
    %c0_71 = arith.constant 0 : index
    %c2_72 = arith.constant 2 : index
    %c0_73 = arith.constant 0 : index
    %c0_74 = arith.constant 0 : index
    %227 = vector.load %arg7[%c0_71, %c2_72, %c0_73, %c0_74] : memref<1x7x7x8xbf16, #tpu.memory_space<vmem>>, vector<1x1x7x8xbf16>
    %228 = vector.shape_cast %227 : vector<1x1x7x8xbf16> to vector<7x8xbf16>
    %229 = vector.shape_cast %226 : vector<7x8xbf16> to vector<1x1x7x8xbf16>
    tpu.vector_store %arg7[%c0_71, %c2_72, %c0_73, %c0_74], %229 {strides = array<i32>} : memref<1x7x7x8xbf16, #tpu.memory_space<vmem>>, vector<1x1x7x8xbf16>,
    %c3_i32_75 = arith.constant 3 : i32
    %230 = arith.addi %0, %c3_i32_75 : i32
    %231 = arith.index_cast %230 : i32 to index
    %232 = memref.load %arg2[%231] : memref<56xi32, #tpu.memory_space<smem>>
    %c3_i32_76 = arith.constant 3 : i32
    %233 = arith.addi %0, %c3_i32_76 : i32
    %234 = arith.index_cast %233 : i32 to index
    %235 = memref.load %arg3[%234] : memref<56xi32, #tpu.memory_space<smem>>
    %236 = vector.broadcast %232 : i32 to vector<1x16x1xi32>
    %237 = arith.cmpi sge, %5, %236 : vector<1x16x1xi32>
    %238 = vector.broadcast %235 : i32 to vector<1x16x1xi32>
    %239 = arith.cmpi slt, %5, %238 : vector<1x16x1xi32>
    %240 = arith.andi %237, %239 : vector<1x16x1xi1>
    %cst_77 = arith.constant -3.40282347E+38 : f32
    %241 = vector.shape_cast %240 : vector<1x16x1xi1> to vector<1x16x1xi1>
    %242 = vector.broadcast %241 : vector<1x16x1xi1> to vector<7x16x8xi1>
    %243 = vector.broadcast %cst_77 : f32 to vector<7x16x8xf32>
    %244 = arith.select %242, %160, %243 : vector<7x16x8xi1>, vector<7x16x8xf32>
    %cst_78 = arith.constant dense<0xFF800000> : vector<7x8xf32>
    %245 = vector.multi_reduction <maximumf>, %244, %cst_78 [1] : vector<7x16x8xf32> to vector<7x8xf32>
    %246 = arith.cmpi sgt, %235, %232 : i32
    %cst_79 = arith.constant 0.000000e+00 : f32
    %247 = vector.broadcast %cst_79 : f32 to vector<7x8xf32>
    %248 = arith.select %246, %245, %247 : vector<7x8xf32>
    %249 = arith.truncf %248 : vector<7x8xf32> to vector<7x8xbf16>
    %c0_80 = arith.constant 0 : index
    %c3_81 = arith.constant 3 : index
    %c0_82 = arith.constant 0 : index
    %c0_83 = arith.constant 0 : index
    %250 = vector.load %arg7[%c0_80, %c3_81, %c0_82, %c0_83] : memref<1x7x7x8xbf16, #tpu.memory_space<vmem>>, vector<1x1x7x8xbf16>
    %251 = vector.shape_cast %250 : vector<1x1x7x8xbf16> to vector<7x8xbf16>
    %252 = vector.shape_cast %249 : vector<7x8xbf16> to vector<1x1x7x8xbf16>
    tpu.vector_store %arg7[%c0_80, %c3_81, %c0_82, %c0_83], %252 {strides = array<i32>} : memref<1x7x7x8xbf16, #tpu.memory_space<vmem>>, vector<1x1x7x8xbf16>,
    %c4_i32_84 = arith.constant 4 : i32
    %253 = arith.addi %0, %c4_i32_84 : i32
    %254 = arith.index_cast %253 : i32 to index
    %255 = memref.load %arg2[%254] : memref<56xi32, #tpu.memory_space<smem>>
    %c4_i32_85 = arith.constant 4 : i32
    %256 = arith.addi %0, %c4_i32_85 : i32
    %257 = arith.index_cast %256 : i32 to index
    %258 = memref.load %arg3[%257] : memref<56xi32, #tpu.memory_space<smem>>
    %259 = vector.broadcast %255 : i32 to vector<1x16x1xi32>
    %260 = arith.cmpi sge, %5, %259 : vector<1x16x1xi32>
    %261 = vector.broadcast %258 : i32 to vector<1x16x1xi32>
    %262 = arith.cmpi slt, %5, %261 : vector<1x16x1xi32>
    %263 = arith.andi %260, %262 : vector<1x16x1xi1>
    %cst_86 = arith.constant -3.40282347E+38 : f32
    %264 = vector.shape_cast %263 : vector<1x16x1xi1> to vector<1x16x1xi1>
    %265 = vector.broadcast %264 : vector<1x16x1xi1> to vector<7x16x8xi1>
    %266 = vector.broadcast %cst_86 : f32 to vector<7x16x8xf32>
    %267 = arith.select %265, %160, %266 : vector<7x16x8xi1>, vector<7x16x8xf32>
    %cst_87 = arith.constant dense<0xFF800000> : vector<7x8xf32>
    %268 = vector.multi_reduction <maximumf>, %267, %cst_87 [1] : vector<7x16x8xf32> to vector<7x8xf32>
    %269 = arith.cmpi sgt, %258, %255 : i32
    %cst_88 = arith.constant 0.000000e+00 : f32
    %270 = vector.broadcast %cst_88 : f32 to vector<7x8xf32>
    %271 = arith.select %269, %268, %270 : vector<7x8xf32>
    %272 = arith.truncf %271 : vector<7x8xf32> to vector<7x8xbf16>
    %c0_89 = arith.constant 0 : index
    %c4_90 = arith.constant 4 : index
    %c0_91 = arith.constant 0 : index
    %c0_92 = arith.constant 0 : index
    %273 = vector.load %arg7[%c0_89, %c4_90, %c0_91, %c0_92] : memref<1x7x7x8xbf16, #tpu.memory_space<vmem>>, vector<1x1x7x8xbf16>
    %274 = vector.shape_cast %273 : vector<1x1x7x8xbf16> to vector<7x8xbf16>
    %275 = vector.shape_cast %272 : vector<7x8xbf16> to vector<1x1x7x8xbf16>
    tpu.vector_store %arg7[%c0_89, %c4_90, %c0_91, %c0_92], %275 {strides = array<i32>} : memref<1x7x7x8xbf16, #tpu.memory_space<vmem>>, vector<1x1x7x8xbf16>,
    %c5_i32_93 = arith.constant 5 : i32
    %276 = arith.addi %0, %c5_i32_93 : i32
    %277 = arith.index_cast %276 : i32 to index
    %278 = memref.load %arg2[%277] : memref<56xi32, #tpu.memory_space<smem>>
    %c5_i32_94 = arith.constant 5 : i32
    %279 = arith.addi %0, %c5_i32_94 : i32
    %280 = arith.index_cast %279 : i32 to index
    %281 = memref.load %arg3[%280] : memref<56xi32, #tpu.memory_space<smem>>
    %282 = vector.broadcast %278 : i32 to vector<1x16x1xi32>
    %283 = arith.cmpi sge, %5, %282 : vector<1x16x1xi32>
    %284 = vector.broadcast %281 : i32 to vector<1x16x1xi32>
    %285 = arith.cmpi slt, %5, %284 : vector<1x16x1xi32>
    %286 = arith.andi %283, %285 : vector<1x16x1xi1>
    %cst_95 = arith.constant -3.40282347E+38 : f32
    %287 = vector.shape_cast %286 : vector<1x16x1xi1> to vector<1x16x1xi1>
    %288 = vector.broadcast %287 : vector<1x16x1xi1> to vector<7x16x8xi1>
    %289 = vector.broadcast %cst_95 : f32 to vector<7x16x8xf32>
    %290 = arith.select %288, %160, %289 : vector<7x16x8xi1>, vector<7x16x8xf32>
    %cst_96 = arith.constant dense<0xFF800000> : vector<7x8xf32>
    %291 = vector.multi_reduction <maximumf>, %290, %cst_96 [1] : vector<7x16x8xf32> to vector<7x8xf32>
    %292 = arith.cmpi sgt, %281, %278 : i32
    %cst_97 = arith.constant 0.000000e+00 : f32
    %293 = vector.broadcast %cst_97 : f32 to vector<7x8xf32>
    %294 = arith.select %292, %291, %293 : vector<7x8xf32>
    %295 = arith.truncf %294 : vector<7x8xf32> to vector<7x8xbf16>
    %c0_98 = arith.constant 0 : index
    %c5_99 = arith.constant 5 : index
    %c0_100 = arith.constant 0 : index
    %c0_101 = arith.constant 0 : index
    %296 = vector.load %arg7[%c0_98, %c5_99, %c0_100, %c0_101] : memref<1x7x7x8xbf16, #tpu.memory_space<vmem>>, vector<1x1x7x8xbf16>
    %297 = vector.shape_cast %296 : vector<1x1x7x8xbf16> to vector<7x8xbf16>
    %298 = vector.shape_cast %295 : vector<7x8xbf16> to vector<1x1x7x8xbf16>
    tpu.vector_store %arg7[%c0_98, %c5_99, %c0_100, %c0_101], %298 {strides = array<i32>} : memref<1x7x7x8xbf16, #tpu.memory_space<vmem>>, vector<1x1x7x8xbf16>,
    %c6_i32_102 = arith.constant 6 : i32
    %299 = arith.addi %0, %c6_i32_102 : i32
    %300 = arith.index_cast %299 : i32 to index
    %301 = memref.load %arg2[%300] : memref<56xi32, #tpu.memory_space<smem>>
    %c6_i32_103 = arith.constant 6 : i32
    %302 = arith.addi %0, %c6_i32_103 : i32
    %303 = arith.index_cast %302 : i32 to index
    %304 = memref.load %arg3[%303] : memref<56xi32, #tpu.memory_space<smem>>
    %305 = vector.broadcast %301 : i32 to vector<1x16x1xi32>
    %306 = arith.cmpi sge, %5, %305 : vector<1x16x1xi32>
    %307 = vector.broadcast %304 : i32 to vector<1x16x1xi32>
    %308 = arith.cmpi slt, %5, %307 : vector<1x16x1xi32>
    %309 = arith.andi %306, %308 : vector<1x16x1xi1>
    %cst_104 = arith.constant -3.40282347E+38 : f32
    %310 = vector.shape_cast %309 : vector<1x16x1xi1> to vector<1x16x1xi1>
    %311 = vector.broadcast %310 : vector<1x16x1xi1> to vector<7x16x8xi1>
    %312 = vector.broadcast %cst_104 : f32 to vector<7x16x8xf32>
    %313 = arith.select %311, %160, %312 : vector<7x16x8xi1>, vector<7x16x8xf32>
    %cst_105 = arith.constant dense<0xFF800000> : vector<7x8xf32>
    %314 = vector.multi_reduction <maximumf>, %313, %cst_105 [1] : vector<7x16x8xf32> to vector<7x8xf32>
    %315 = arith.cmpi sgt, %304, %301 : i32
    %cst_106 = arith.constant 0.000000e+00 : f32
    %316 = vector.broadcast %cst_106 : f32 to vector<7x8xf32>
    %317 = arith.select %315, %314, %316 : vector<7x8xf32>
    %318 = arith.truncf %317 : vector<7x8xf32> to vector<7x8xbf16>
    %c0_107 = arith.constant 0 : index
    %c6_108 = arith.constant 6 : index
    %c0_109 = arith.constant 0 : index
    %c0_110 = arith.constant 0 : index
    %319 = vector.load %arg7[%c0_107, %c6_108, %c0_109, %c0_110] : memref<1x7x7x8xbf16, #tpu.memory_space<vmem>>, vector<1x1x7x8xbf16>
    %320 = vector.shape_cast %319 : vector<1x1x7x8xbf16> to vector<7x8xbf16>
    %321 = vector.shape_cast %318 : vector<7x8xbf16> to vector<1x1x7x8xbf16>
    tpu.vector_store %arg7[%c0_107, %c6_108, %c0_109, %c0_110], %321 {strides = array<i32>} : memref<1x7x7x8xbf16, #tpu.memory_space<vmem>>, vector<1x1x7x8xbf16>,
    return
  }
  func.func @transform_0(%arg0: i32, %arg1: memref<8xi32, #tpu.memory_space<smem>>, %arg2: memref<56xi32, #tpu.memory_space<smem>>, %arg3: memref<56xi32, #tpu.memory_space<smem>>, %arg4: memref<56xi32, #tpu.memory_space<smem>>, %arg5: memref<56xi32, #tpu.memory_space<smem>>) -> (i32, i32, i32, i32) {
    %0 = arith.index_cast %arg0 : i32 to index
    %1 = memref.load %arg1[%0] : memref<8xi32, #tpu.memory_space<smem>>
    %c0_i32 = arith.constant 0 : i32
    %c0_i32_0 = arith.constant 0 : i32
    %c0_i32_1 = arith.constant 0 : i32
    %c0_i32_2 = arith.constant 0 : i32
    return %1, %c0_i32, %c0_i32_0, %c0_i32_1 : i32, i32, i32, i32
  }
  func.func @transform_1(%arg0: i32, %arg1: memref<8xi32, #tpu.memory_space<smem>>, %arg2: memref<56xi32, #tpu.memory_space<smem>>, %arg3: memref<56xi32, #tpu.memory_space<smem>>, %arg4: memref<56xi32, #tpu.memory_space<smem>>, %arg5: memref<56xi32, #tpu.memory_space<smem>>) -> (i32, i32, i32, i32) {
    %c0_i32 = arith.constant 0 : i32
    %c0_i32_0 = arith.constant 0 : i32
    %c0_i32_1 = arith.constant 0 : i32
    %c0_i32_2 = arith.constant 0 : i32
    return %arg0, %c0_i32, %c0_i32_0, %c0_i32_1 : i32, i32, i32, i32
  }
}

</mosaic_0001>

<bundles_post_ra>
// kernel: vgg16_roi_head_forward.3
= control target key start
LH: loop header
LB: loop body
LE: loop exit
PB: predicated region body
PF: predicated region fallthrough
CT: control target
= control target key end

     0   :  { %s1690_s1 = inlined_call_operand.vmem [shape: bf16[512,256], index: 1, kind: input, shape index: {}]   ;;  %s1691_s0 = inlined_call_operand.vmem [shape: bf16[16,512], index: 0, kind: input, shape index: {}]   ;;  %s1692_s3 = inlined_call_operand.vmem [shape: bf16[256,256], index: 3, kind: input, shape index: {}]   ;;  %s1693_s5 = inlined_call_operand.vmem [shape: bf16[256,128], index: 5, kind: input, shape index: {}]   ;;  %s1694_s2 = inlined_call_operand.vmem [shape: f32[1,256], index: 2, kind: input, shape index: {}]   ;;  %s1695_s4 = inlined_call_operand.vmem [shape: f32[1,256], index: 4, kind: input, shape index: {}]   ;;  %s1696_s6 = inlined_call_operand.vmem [shape: f32[1,128], index: 6, kind: input, shape index: {}]   ;;  %s1697_s7 = inlined_call_operand.vmem [shape: f32[16,128], index: 7, kind: output, shape index: {}]  }
   0x1   :  { %v1121_v0 = vld [vmem:[%s1690_s1 + $0x4] ss:$8 sps:$4 sm:$0xff]   ;;  %v1123_v1 = vld [vmem:[%s1690_s1] ss:$8 sps:$4 sm:$0xff]   ;;  %v1124_v2 = vld [vmem:[%s1690_s1 + $0x14] ss:$8 sps:$4 sm:$0xff]  }
   0x2   :  { %447 = vmatprep.subr.bf16.mxu0 %v1121_v0  ;;  %v1126_v3 = vld [vmem:[%s1690_s1 + $0x10] ss:$8 sps:$4 sm:$0xff]   ;;  %v1127_v4 = vld [vmem:[%s1690_s1 + $0x24] ss:$8 sps:$4 sm:$0xff]   ;;  %v1129_v5 = vld [vmem:[%s1690_s1 + $0x20] ss:$8 sps:$4 sm:$0xff]  }
   0x3   :  { %448 = vmatpush1.bf16.msra.mxu0 %v1123_v1  ;;  %v1130_v6 = vld [vmem:[%s1690_s1 + $0x34] ss:$8 sps:$4 sm:$0xff]   ;;  %v1132_v7 = vld [vmem:[%s1690_s1 + $0x30] ss:$8 sps:$4 sm:$0xff]   ;;  %v1133_v8 = vld [vmem:[%s1690_s1 + $0x44] ss:$8 sps:$4 sm:$0xff]  }
   0x4   :  { %449 = vmatprep.subr.bf16.mxu0 %v1124_v2  ;;  %v1135_v9 = vld [vmem:[%s1690_s1 + $0x40] ss:$8 sps:$4 sm:$0xff]   ;;  %v1136_v10 = vld [vmem:[%s1690_s1 + $0x54] ss:$8 sps:$4 sm:$0xff]   ;;  %v1138_v11 = vld [vmem:[%s1690_s1 + $0x50] ss:$8 sps:$4 sm:$0xff]  }
   0x5   :  { %v1139_v12 = vld [vmem:[%s1690_s1 + $0x64] ss:$8 sps:$4 sm:$0xff]   ;;  %v1141_v14 = vld [vmem:[%s1690_s1 + $0x60] ss:$8 sps:$4 sm:$0xff]   ;;  %v1142_v15 = vld [vmem:[%s1690_s1 + $0x74] ss:$8 sps:$4 sm:$0xff]  }
   0x6   :  { %v1171_v13 = vld [vmem:[%s1691_s0 + $0x4] ss:$16 sps:$4 sm:$0xff]   ;;  %v1144_v16 = vld [vmem:[%s1690_s1 + $0x70] ss:$8 sps:$4 sm:$0xff]   ;;  %v1147_v18 = vld [vmem:[%s1690_s1 + $0x80] ss:$8 sps:$4 sm:$0xff]  }
   0x7   :  { %450 = vmatpush1.bf16.msra.mxu0 %v1126_v3  ;;  %479 = vmatprep.mubr.bf16.mxu0 %v1171_v13  ;;  %v1145_v17 = vld [vmem:[%s1690_s1 + $0x84] ss:$8 sps:$4 sm:$0xff]   ;;  %v1148_v19 = vld [vmem:[%s1690_s1 + $0x94] ss:$8 sps:$4 sm:$0xff]   ;;  %v1150_v20 = vld [vmem:[%s1690_s1 + $0x90] ss:$8 sps:$4 sm:$0xff]  }
   0x8   :  { %451 = vmatprep.subr.bf16.mxu0 %v1127_v4  ;;  %v1151_v21 = vld [vmem:[%s1690_s1 + $0xa4] ss:$8 sps:$4 sm:$0xff]   ;;  %v1153_v22 = vld [vmem:[%s1690_s1 + $0xa0] ss:$8 sps:$4 sm:$0xff]   ;;  %v1154_v23 = vld [vmem:[%s1690_s1 + $0xb4] ss:$8 sps:$4 sm:$0xff]  }
   0x9   :  { %v1156_v24 = vld [vmem:[%s1690_s1 + $0xb0] ss:$8 sps:$4 sm:$0xff]   ;;  %v1157_v25 = vld [vmem:[%s1690_s1 + $0xc4] ss:$8 sps:$4 sm:$0xff]   ;;  %v1225_v27 = vld [vmem:[%s1692_s3] ss:$8 sps:$4 sm:$0xff]  }
   0xa   :  { %v1223_v26 = vld [vmem:[%s1692_s3 + $0x4] ss:$8 sps:$4 sm:$0xff]   ;;  %v1159_v28 = vld [vmem:[%s1690_s1 + $0xc0] ss:$8 sps:$4 sm:$0xff]   ;;  %v1226_v29 = vld [vmem:[%s1692_s3 + $0x14] ss:$8 sps:$4 sm:$0xff]  }
   0xb   :  { %452 = vmatpush1.bf16.msra.mxu0 %v1129_v5  ;;  %v1160_v30 = vld [vmem:[%s1690_s1 + $0xd4] ss:$8 sps:$4 sm:$0xff]   ;;  %743 = vmatprep.subr.bf16.mxu1 %v1223_v26  ;;  %v1228_v31 = vld [vmem:[%s1692_s3 + $0x10] ss:$8 sps:$4 sm:$0xff]   ;;  %v1229_v32 = vld [vmem:[%s1692_s3 + $0x24] ss:$8 sps:$4 sm:$0xff]  }
   0xc   :  { %453 = vmatprep.subr.bf16.mxu0 %v1130_v6  ;;  %744 = vmatpush1.bf16.msra.mxu1 %v1225_v27  ;;  %v1162_v33 = vld [vmem:[%s1690_s1 + $0xd0] ss:$8 sps:$4 sm:$0xff]   ;;  %v1163_v34 = vld [vmem:[%s1690_s1 + $0xe4] ss:$8 sps:$4 sm:$0xff]   ;;  %v1231_v35 = vld [vmem:[%s1692_s3 + $0x20] ss:$8 sps:$4 sm:$0xff]  }
   0xd   :  { %745 = vmatprep.subr.bf16.mxu1 %v1226_v29  ;;  %v1232_v36 = vld [vmem:[%s1692_s3 + $0x34] ss:$8 sps:$4 sm:$0xff]   ;;  %v1165_v37 = vld [vmem:[%s1690_s1 + $0xe0] ss:$8 sps:$4 sm:$0xff]   ;;  %v1234_v39 = vld [vmem:[%s1692_s3 + $0x30] ss:$8 sps:$4 sm:$0xff]  }
   0xe   :  { %v1166_v38 = vld [vmem:[%s1690_s1 + $0xf4] ss:$8 sps:$4 sm:$0xff]   ;;  %v1235_v40 = vld [vmem:[%s1692_s3 + $0x44] ss:$8 sps:$4 sm:$0xff]   ;;  %v1168_v41 = vld [vmem:[%s1690_s1 + $0xf0] ss:$8 sps:$4 sm:$0xff]  }
   0xf   :  { %454 = vmatpush1.bf16.msra.mxu0 %v1132_v7  ;;  %v1169_v42 = vld [vmem:[%s1691_s0] ss:$16 sps:$4 sm:$0xff]   ;;  %v1174_v43 = vld [vmem:[%s1690_s1 + $0x104] ss:$8 sps:$4 sm:$0xff]   ;;  %v1238_v46 = vld [vmem:[%s1692_s3 + $0x54] ss:$8 sps:$4 sm:$0xff]  }
  0x10   :  { %455 = vmatprep.subr.bf16.mxu0 %v1133_v8  ;;  %746 = vmatpush1.bf16.msra.mxu1 %v1228_v31  ;;  %v1237_v44 = vld [vmem:[%s1692_s3 + $0x40] ss:$8 sps:$4 sm:$0xff]   ;;  %v1177_v47 = vld [vmem:[%s1690_s1 + $0x114] ss:$8 sps:$4 sm:$0xff]   ;;  %v1240_v49 = vld [vmem:[%s1692_s3 + $0x50] ss:$8 sps:$4 sm:$0xff]  }
  0x11   :  { %747 = vmatprep.subr.bf16.mxu1 %v1229_v32  ;;  %v1172_v45 = vld [vmem:[%s1690_s1 + $0x100] ss:$8 sps:$4 sm:$0xff]   ;;  %v1222_v48 = vld [vmem:[%s1691_s0 + $0xc] ss:$16 sps:$4 sm:$0xff]   ;;  %v1175_v51 = vld [vmem:[%s1690_s1 + $0x110] ss:$8 sps:$4 sm:$0xff]  }
  0x12   :  { %v1241_v50 = vld [vmem:[%s1692_s3 + $0x64] ss:$8 sps:$4 sm:$0xff]   ;;  %v1243_v53 = vld [vmem:[%s1692_s3 + $0x60] ss:$8 sps:$4 sm:$0xff]   ;;  %v1244_v54 = vld [vmem:[%s1692_s3 + $0x74] ss:$8 sps:$4 sm:$0xff]  }
  0x13   :  { %456 = vmatpush1.bf16.msra.mxu0 %v1135_v9  ;;  %v1180_v52 = vld [vmem:[%s1690_s1 + $0x124] ss:$8 sps:$4 sm:$0xff]   ;;  %v1178_v55 = vld [vmem:[%s1690_s1 + $0x120] ss:$8 sps:$4 sm:$0xff]   ;;  %v1183_v56 = vld [vmem:[%s1690_s1 + $0x134] ss:$8 sps:$4 sm:$0xff]  }
  0x14   :  { %457 = vmatprep.subr.bf16.mxu0 %v1136_v10  ;;  %748 = vmatpush1.bf16.msra.mxu1 %v1231_v35  ;;  %v1246_v57 = vld [vmem:[%s1692_s3 + $0x70] ss:$8 sps:$4 sm:$0xff]   ;;  %v1247_v58 = vld [vmem:[%s1692_s3 + $0x84] ss:$8 sps:$4 sm:$0xff]   ;;  %v1249_v61 = vld [vmem:[%s1692_s3 + $0x80] ss:$8 sps:$4 sm:$0xff]  }
  0x15   :  { %749 = vmatprep.subr.bf16.mxu1 %v1232_v36  ;;  %v1181_v59 = vld [vmem:[%s1690_s1 + $0x130] ss:$8 sps:$4 sm:$0xff]   ;;  %v1186_v60 = vld [vmem:[%s1690_s1 + $0x144] ss:$8 sps:$4 sm:$0xff]   ;;  %v1250_v62 = vld [vmem:[%s1692_s3 + $0x94] ss:$8 sps:$4 sm:$0xff]  }
  0x16   :  { %v1184_v63 = vld [vmem:[%s1690_s1 + $0x140] ss:$8 sps:$4 sm:$0xff]   ;;  %v1189_v0 = vld [vmem:[%s1690_s1 + $0x154] ss:$8 sps:$4 sm:$0xff]   ;;  %v1252_v1 = vld [vmem:[%s1692_s3 + $0x90] ss:$8 sps:$4 sm:$0xff]  }
  0x17   :  { %458 = vmatpush1.bf16.msra.mxu0 %v1138_v11  ;;  %v1253_v2 = vld [vmem:[%s1692_s3 + $0xa4] ss:$8 sps:$4 sm:$0xff]   ;;  %v1187_v3 = vld [vmem:[%s1690_s1 + $0x150] ss:$8 sps:$4 sm:$0xff]   ;;  %v1255_v5 = vld [vmem:[%s1692_s3 + $0xa0] ss:$8 sps:$4 sm:$0xff]  }
  0x18   :  { %459 = vmatprep.subr.bf16.mxu0 %v1139_v12  ;;  %750 = vmatpush1.bf16.msra.mxu1 %v1234_v39  ;;  %v1192_v4 = vld [vmem:[%s1690_s1 + $0x164] ss:$8 sps:$4 sm:$0xff]   ;;  %v1256_v6 = vld [vmem:[%s1692_s3 + $0xb4] ss:$8 sps:$4 sm:$0xff]   ;;  %v1190_v7 = vld [vmem:[%s1690_s1 + $0x160] ss:$8 sps:$4 sm:$0xff]  }
  0x19   :  { %751 = vmatprep.subr.bf16.mxu1 %v1235_v40  ;;  %v1195_v8 = vld [vmem:[%s1690_s1 + $0x174] ss:$8 sps:$4 sm:$0xff]   ;;  %v1258_v9 = vld [vmem:[%s1692_s3 + $0xb0] ss:$8 sps:$4 sm:$0xff]   ;;  %v1259_v10 = vld [vmem:[%s1692_s3 + $0xc4] ss:$8 sps:$4 sm:$0xff]  }
  0x1a   :  { %v1193_v11 = vld [vmem:[%s1690_s1 + $0x170] ss:$8 sps:$4 sm:$0xff]   ;;  %v1198_v12 = vld [vmem:[%s1690_s1 + $0x184] ss:$8 sps:$4 sm:$0xff]   ;;  %v1261_v13 = vld [vmem:[%s1692_s3 + $0xc0] ss:$8 sps:$4 sm:$0xff]  }
  0x1b   :  { %460 = vmatpush1.bf16.msra.mxu0 %v1141_v14  ;;  %v1262_v14 = vld [vmem:[%s1692_s3 + $0xd4] ss:$8 sps:$4 sm:$0xff]   ;;  %v1216_v26 = vld [vmem:[%s1690_s1 + $0x1e4] ss:$8 sps:$4 sm:$0xff]   ;;  %v1214_v27 = vld [vmem:[%s1690_s1 + $0x1e0] ss:$8 sps:$4 sm:$0xff]  }
  0x1c   :  { %461 = vmatprep.subr.bf16.mxu0 %v1142_v15  ;;  %752 = vmatpush1.bf16.msra.mxu1 %v1237_v44  ;;  %v1196_v15 = vld [vmem:[%s1690_s1 + $0x180] ss:$8 sps:$4 sm:$0xff]   ;;  %v1217_v29 = vld [vmem:[%s1690_s1 + $0x1f0] ss:$8 sps:$4 sm:$0xff]   ;;  %v1265_v32 = vld [vmem:[%s1692_s3 + $0xe4] ss:$8 sps:$4 sm:$0xff]  }
  0x1d   :  { %753 = vmatprep.subr.bf16.mxu1 %v1238_v46  ;;  %v1264_v31 = vld [vmem:[%s1692_s3 + $0xd0] ss:$8 sps:$4 sm:$0xff]   ;;  %v1271_v36 = vld [vmem:[%s1693_s5 + $0x40] sm:$0xff]  }
  0x1e   :  { %v1270_v35 = vld [vmem:[%s1692_s3 + $0xf0] ss:$8 sps:$4 sm:$0xff]   ;;  %v95_v40 = vld [vmem:[%s1694_s2] sm:$0x3] }
  0x1f   :  { %462 = vmatpush1.bf16.msra.mxu0 %v1144_v16  ;;  %v1201_v16 = vld [vmem:[%s1690_s1 + $0x194] ss:$8 sps:$4 sm:$0xff]  }
  0x20   :  { %463 = vmatprep.subr.bf16.mxu0 %v1145_v17  ;;  %754 = vmatpush1.bf16.msra.mxu1 %v1240_v49  ;;  %v1199_v17 = vld [vmem:[%s1690_s1 + $0x190] ss:$8 sps:$4 sm:$0xff]  }
  0x21   :  { %755 = vmatprep.subr.bf16.mxu1 %v1241_v50 }
  0x23   :  { %464 = vmatpush1.bf16.msra.mxu0 %v1147_v18  ;;  %v1204_v18 = vld [vmem:[%s1690_s1 + $0x1a4] ss:$8 sps:$4 sm:$0xff]  }
  0x24   :  { %465 = vmatprep.subr.bf16.mxu0 %v1148_v19  ;;  %756 = vmatpush1.bf16.msra.mxu1 %v1243_v53  ;;  %v1202_v19 = vld [vmem:[%s1690_s1 + $0x1a0] ss:$8 sps:$4 sm:$0xff]  }
  0x25   :  { %757 = vmatprep.subr.bf16.mxu1 %v1244_v54 }
  0x27   :  { %466 = vmatpush1.bf16.msra.mxu0 %v1150_v20  ;;  %v1207_v20 = vld [vmem:[%s1690_s1 + $0x1b4] ss:$8 sps:$4 sm:$0xff]  }
  0x28   :  { %467 = vmatprep.subr.bf16.mxu0 %v1151_v21  ;;  %758 = vmatpush1.bf16.msra.mxu1 %v1246_v57  ;;  %v1205_v21 = vld [vmem:[%s1690_s1 + $0x1b0] ss:$8 sps:$4 sm:$0xff]  }
  0x29   :  { %759 = vmatprep.subr.bf16.mxu1 %v1247_v58  ;;  %v1272_v58 = vld [vmem:[%s1693_s5] sm:$0xff]  }
  0x2b   :  { %468 = vmatpush1.bf16.msra.mxu0 %v1153_v22  ;;  %v1210_v22 = vld [vmem:[%s1690_s1 + $0x1c4] ss:$8 sps:$4 sm:$0xff]  }
  0x2c   :  { %469 = vmatprep.subr.bf16.mxu0 %v1154_v23  ;;  %760 = vmatpush1.bf16.msra.mxu1 %v1249_v61  ;;  %v1208_v23 = vld [vmem:[%s1690_s1 + $0x1c0] ss:$8 sps:$4 sm:$0xff]   ;;  %v1275_v61 = vld [vmem:[%s1693_s5 + $0x50] sm:$0xff]  }
  0x2d   :  { %761 = vmatprep.subr.bf16.mxu1 %v1250_v62  ;;  %v1276_v62 = vld [vmem:[%s1693_s5 + $0x10] sm:$0xff]  }
  0x2f   :  { %470 = vmatpush1.bf16.msra.mxu0 %v1156_v24  ;;  %v1213_v24 = vld [vmem:[%s1690_s1 + $0x1d4] ss:$8 sps:$4 sm:$0xff]  }
  0x30   :  { %471 = vmatprep.subr.bf16.mxu0 %v1157_v25  ;;  %762 = vmatpush1.bf16.msra.mxu1 %v1252_v1  ;;  %v1211_v25 = vld [vmem:[%s1690_s1 + $0x1d0] ss:$8 sps:$4 sm:$0xff]   ;;  %v1279_v1 = vld [vmem:[%s1693_s5 + $0x60] sm:$0xff]  }
  0x31   :  { %763 = vmatprep.subr.bf16.mxu1 %v1253_v2  ;;  %v1280_v2 = vld [vmem:[%s1693_s5 + $0x20] sm:$0xff]  }
  0x33   :  { %472 = vmatpush1.bf16.msra.mxu0 %v1159_v28  ;;  %v1219_v28 = vld [vmem:[%s1690_s1 + $0x1f4] ss:$8 sps:$4 sm:$0xff]  }
  0x34   :  { %473 = vmatprep.subr.bf16.mxu0 %v1160_v30  ;;  %764 = vmatpush1.bf16.msra.mxu1 %v1255_v5  ;;  %v1220_v30 = vld [vmem:[%s1691_s0 + $0x8] ss:$16 sps:$4 sm:$0xff]   ;;  %v1283_v5 = vld [vmem:[%s1693_s5 + $0x70] sm:$0xff]  }
  0x35   :  { %765 = vmatprep.subr.bf16.mxu1 %v1256_v6  ;;  %v1284_v6 = vld [vmem:[%s1693_s5 + $0x30] sm:$0xff]  }
  0x37   :  { %474 = vmatpush1.bf16.msra.mxu0 %v1162_v33  ;;  %v1267_v33 = vld [vmem:[%s1692_s3 + $0xe0] ss:$8 sps:$4 sm:$0xff]  }
  0x38   :  { %475 = vmatprep.subr.bf16.mxu0 %v1163_v34  ;;  %766 = vmatpush1.bf16.msra.mxu1 %v1258_v9  ;;  %v1268_v34 = vld [vmem:[%s1692_s3 + $0xf4] ss:$8 sps:$4 sm:$0xff]   ;;  %v571_v9 = vld [vmem:[%s1695_s4] sm:$0x3] }
  0x39   :  { %767 = vmatprep.subr.bf16.mxu1 %v1259_v10 }
  0x3b   :  { %476 = vmatpush1.bf16.msra.mxu0 %v1165_v37  ;;  %v97_v37 = vlaneseq }
  0x3c   :  { %477 = vmatprep.subr.bf16.mxu0 %v1166_v38  ;;  %768 = vmatpush1.bf16.msra.mxu1 %v1261_v13 }
  0x3d   :  { %769 = vmatprep.subr.bf16.mxu1 %v1262_v14  ;;  %v98_v38 = vshrl.u32 %v97_v37, 7 }
  0x3f   :  { %478 = vmatpush1.bf16.msra.mxu0 %v1168_v41  ;;  %v99_v39 = vsub.s32 0, %v98_v38  ;;  %v103_v41 = vsub.s32 1, %v98_v38 }
  0x40   :  { %490 = vmatprep.subr.bf16.mxu0 %v1174_v43  ;;  %770 = vmatpush1.bf16.msra.mxu1 %v1264_v31 }
  0x41   :  { %771 = vmatprep.subr.bf16.mxu1 %v1265_v32  ;;  %v104_v43 = vrot.slane %v95_v40, %v103_v41  ;;  %v576_v10 = vrot.slane %v571_v9, %v99_v39 }
  0x42   :  { %480 = vmatmul.mubr.bf16.vlgmr.msra.gmra.mrb[0].mxu0 %v1169_v42  ;;  %v100_v42 = vrot.slane %v95_v40, %v99_v39 }
  0x43   :  { %491 = vmatpush1.bf16.msra.mxu0 %v1172_v45  ;;  %522 = vmatprep.mubr.bf16.mxu0 %v1222_v48 }
  0x44   :  { %492 = vmatprep.subr.bf16.mxu0 %v1177_v47  ;;  %772 = vmatpush1.bf16.msra.mxu1 %v1267_v33 }
  0x45   :  { %773 = vmatprep.subr.bf16.mxu1 %v1268_v34 }
  0x47   :  { %493 = vmatpush1.bf16.msra.mxu0 %v1175_v51 }
  0x48   :  { %494 = vmatprep.subr.bf16.mxu0 %v1180_v52  ;;  %774 = vmatpush1.bf16.msra.mxu1 %v1270_v35 }
  0x49   :  { %1091 = vmatprep.subr.bf16.mxu1 %v1271_v36 }
  0x4b   :  { %495 = vmatpush1.bf16.msra.mxu0 %v1178_v55 }
  0x4c   :  { %496 = vmatprep.subr.bf16.mxu0 %v1183_v56 }
  0x4f   :  { %497 = vmatpush1.bf16.msra.mxu0 %v1181_v59  ;;  %v1273_v59 = vld [vmem:[%s1693_s5 + $0x48] sm:$0xff]  }
  0x50   :  { %498 = vmatprep.subr.bf16.mxu0 %v1186_v60  ;;  %v1274_v60 = vld [vmem:[%s1693_s5 + $0x8] sm:$0xff]  }
  0x53   :  { %499 = vmatpush1.bf16.msra.mxu0 %v1184_v63  ;;  %v1277_v63 = vld [vmem:[%s1693_s5 + $0x58] sm:$0xff]  }
  0x54   :  { %500 = vmatprep.subr.bf16.mxu0 %v1189_v0  ;;  %v1278_v0 = vld [vmem:[%s1693_s5 + $0x18] sm:$0xff]  }
  0x57   :  { %501 = vmatpush1.bf16.msra.mxu0 %v1187_v3  ;;  %v1281_v3 = vld [vmem:[%s1693_s5 + $0x68] sm:$0xff]  }
  0x58   :  { %502 = vmatprep.subr.bf16.mxu0 %v1192_v4  ;;  %v1282_v4 = vld [vmem:[%s1693_s5 + $0x28] sm:$0xff]  }
  0x5b   :  { %503 = vmatpush1.bf16.msra.mxu0 %v1190_v7  ;;  %v1285_v7 = vld [vmem:[%s1693_s5 + $0x78] sm:$0xff]  }
  0x5c   :  { %504 = vmatprep.subr.bf16.mxu0 %v1195_v8  ;;  %v1286_v8 = vld [vmem:[%s1693_s5 + $0x38] sm:$0xff]  }
  0x5f   :  { %505 = vmatpush1.bf16.msra.mxu0 %v1193_v11  ;;  %v580_v11 = vrot.slane %v571_v9, %v103_v41 }
  0x60   :  { %506 = vmatprep.subr.bf16.mxu0 %v1198_v12 }
  0x63   :  { %507 = vmatpush1.bf16.msra.mxu0 %v1196_v15 }
  0x64   :  { %508 = vmatprep.subr.bf16.mxu0 %v1201_v16 }
  0x67   :  { %509 = vmatpush1.bf16.msra.mxu0 %v1199_v17 }
  0x68   :  { %510 = vmatprep.subr.bf16.mxu0 %v1204_v18 }
  0x6b   :  { %511 = vmatpush1.bf16.msra.mxu0 %v1202_v19 }
  0x6c   :  { %512 = vmatprep.subr.bf16.mxu0 %v1207_v20 }
  0x6f   :  { %513 = vmatpush1.bf16.msra.mxu0 %v1205_v21 }
  0x70   :  { %514 = vmatprep.subr.bf16.mxu0 %v1210_v22 }
  0x73   :  { %515 = vmatpush1.bf16.msra.mxu0 %v1208_v23 }
  0x74   :  { %516 = vmatprep.subr.bf16.mxu0 %v1213_v24 }
  0x77   :  { %517 = vmatpush1.bf16.msra.mxu0 %v1211_v25 }
  0x78   :  { %518 = vmatprep.subr.bf16.mxu0 %v1216_v26 }
  0x7b   :  { %519 = vmatpush1.bf16.msra.mxu0 %v1214_v27  ;;  %v1074_v27 = vld [vmem:[%s1696_s6] ss:$0 sm:$0xff] }
  0x7c   :  { %520 = vmatprep.subr.bf16.mxu0 %v1219_v28 }
  0x7f   :  { %521 = vmatpush1.bf16.msra.mxu0 %v1217_v29 }
  0x82   :  { %523 = vmatmul.mubr.bf16.vlgmr.msra.gmra.mrb[0].mxu0 %v1220_v30 }
 0x155   :  { %v524_v44 = vpop.f32.mrb[0].mxu0 }
 0x156   :  { %v1113_v45 = vadd.f32 %v524_v44, %v100_v42  ;;  %v526_v46 = vpop.f32.mrb[1].mxu0 }
 0x157   :  { %v1114_v47 = vadd.f32 %v526_v46, %v104_v43  ;;  %v528_v48 = vpop.f32.mrb[2].mxu0 }
 0x158   :  { %v1115_v49 = vadd.f32 %v528_v48, %v100_v42  ;;  %v530_v50 = vpop.f32.mrb[3].mxu0  ;;  %v533_v52 = vmax.f32 %v1113_v45, 0.0 }
 0x159   :  { %v1116_v51 = vadd.f32 %v530_v50, %v104_v43  ;;  %v534_v54 = vmax.f32 %v1114_v47, 0.0 }
 0x15a   :  { %v535_v53 = vmax.f32 %v1115_v49, 0.0 }
 0x15b   :  { %v536_v55 = vmax.f32 %v1116_v51, 0.0 }
 0x15c   :  { %v537_v56 = vpack.c.bf16 %v535_v53, %v533_v52 }
 0x15d   :  { %v538_v57 = vpack.c.bf16 %v536_v55, %v534_v54 }
 0x15f   :  { %775 = vmatprep.mubr.bf16.mxu1 %v538_v57 }
 0x160   :  { %776 = vmatmul.mubr.bf16.vlgmr.msra.gmra.mrb[0].mxu1 %v537_v56 }
 0x161   :  { %1092 = vmatpush3.bf16.msra.mxu1 %v1272_v58 }
 0x162   :  { %1093 = vmatprep.subr.bf16.mxu1 %v1273_v59 }
 0x165   :  { %1094 = vmatpush3.bf16.msra.mxu1 %v1274_v60 }
 0x166   :  { %1095 = vmatprep.subr.bf16.mxu1 %v1275_v61 }
 0x169   :  { %1096 = vmatpush3.bf16.msra.mxu1 %v1276_v62 }
 0x16a   :  { %1097 = vmatprep.subr.bf16.mxu1 %v1277_v63 }
 0x16d   :  { %1098 = vmatpush3.bf16.msra.mxu1 %v1278_v0 }
 0x16e   :  { %1099 = vmatprep.subr.bf16.mxu1 %v1279_v1 }
 0x171   :  { %1100 = vmatpush3.bf16.msra.mxu1 %v1280_v2 }
 0x172   :  { %1101 = vmatprep.subr.bf16.mxu1 %v1281_v3 }
 0x175   :  { %1102 = vmatpush3.bf16.msra.mxu1 %v1282_v4 }
 0x176   :  { %1103 = vmatprep.subr.bf16.mxu1 %v1283_v5 }
 0x179   :  { %1104 = vmatpush3.bf16.msra.mxu1 %v1284_v6 }
 0x17a   :  { %1105 = vmatprep.subr.bf16.mxu1 %v1285_v7 }
 0x17d   :  { %1106 = vmatpush3.bf16.msra.mxu1 %v1286_v8 }
 0x233   :  { %v777_v12 = vpop.f32.mrb[0].mxu1 }
 0x234   :  { %v778_v13 = vadd.f32 %v777_v12, %v576_v10  ;;  %v779_v14 = vpop.f32.mrb[1].mxu1 }
 0x235   :  { %v780_v15 = vadd.f32 %v779_v14, %v580_v11  ;;  %v781_v16 = vpop.f32.mrb[2].mxu1 }
 0x236   :  { %v782_v17 = vadd.f32 %v781_v16, %v576_v10  ;;  %v783_v18 = vpop.f32.mrb[3].mxu1  ;;  %v786_v20 = vmax.f32 %v778_v13, 0.0 }
 0x237   :  { %v784_v19 = vadd.f32 %v783_v18, %v580_v11  ;;  %v787_v22 = vmax.f32 %v780_v15, 0.0 }
 0x238   :  { %v788_v21 = vmax.f32 %v782_v17, 0.0 }
 0x239   :  { %v789_v23 = vmax.f32 %v784_v19, 0.0 }
 0x23a   :  { %v790_v24 = vpack.c.bf16 %v788_v21, %v786_v20 }
 0x23b   :  { %v791_v25 = vpack.c.bf16 %v789_v23, %v787_v22 }
 0x23d   :  { %959 = vmatprep.mubr.bf16.mxu1 %v791_v25 }
 0x23e   :  { %960 = vmatmul.mubr.bf16.vlgmr.msra.gmra.mrb[4].mxu1 %v790_v24 }
 0x311   :  { %v1107_v26 = vpop.f32.mrb[4].mxu1 }
 0x312   :  { %v1108_v28 = vpop.f32.mrb[5].mxu1 }
 0x313   :  { %v1109_v29 = vadd.f32 %v1108_v28, %v1107_v26  ;;  %v1110_v30 = vpop.f32.mrb[6].mxu1 }
 0x314   :  { %v1111_v31 = vpop.f32.mrb[7].mxu1 }
 0x315   :  { %v962_v32 = vadd.f32 %v1109_v29, %v1074_v27  ;;  %v1112_v33 = vadd.f32 %v1111_v31, %v1110_v30 }
 0x317   :  { %968 = vst [vmem:[%s1697_s7] sm:$0xff] %v962_v32  ;;  %v965_v34 = vadd.f32 %v1112_v33, %v1074_v27 }
 0x319   :  { %969 = vst [vmem:[%s1697_s7 + $0x8] sm:$0xff] %v965_v34 }

// kernel: vgg16_roi_head_forward.2
= control target key start
LH: loop header
LB: loop body
LE: loop exit
PB: predicated region body
PF: predicated region fallthrough
CT: control target
= control target key end

     0   :  { %s6858_s0 = inlined_call_operand.vmem [shape: s32[8], index: 0, kind: input, shape index: {}]   ;;  %s6859_s5 = inlined_call_operand.vmem [shape: bf16[2,16,16,8], index: 5, kind: input, shape index: {}]   ;;  %s6860_s6 = inlined_call_operand.vmem [shape: bf16[8,7,7,8], index: 6, kind: output, shape index: {}]   ;;  %s6861_s1 = inlined_call_operand.vmem [shape: s32[56], index: 1, kind: input, shape index: {}]   ;;  %s6862_s2 = inlined_call_operand.vmem [shape: s32[56], index: 2, kind: input, shape index: {}]   ;;  %s6863_s3 = inlined_call_operand.vmem [shape: s32[56], index: 3, kind: input, shape index: {}]   ;;  %s6864_s4 = inlined_call_operand.vmem [shape: s32[56], index: 4, kind: input, shape index: {}]  }
   0x1   :  { %s11_s23 = sshll.u32 %s6858_s0, 4  ;;  %s15_s26 = sshll.u32 %s6861_s1, 4  ;;  %s12_s23 = int_to_ptr.vmem [resolvable:$true] %s11_s23  ;;  %s16_s26 = int_to_ptr.vmem [resolvable:$true] %s15_s26 }
   0x2   :  { %s3289_s27 = scalar_lea.vmem %s12_s23, 16  ;;  %p3294_p1 = scmp.lt.s32.totalorder %s12_s23, %s12_s23 }
   0x3   :  { %p3290_p0 = scmp.ne.s32.totalorder %s12_s23, %s3289_s27  ;;  %p3295_p2 = scmp.lt.s32.totalorder %s3289_s27, %s3289_s27 }
   0x5   :  { %p3296_p3 = por %p3295_p2, %p3294_p1 }
   0x7   :  { %p3297_p4 = pnand %p3296_p3, %p3290_p0 }
   0x9   :  { %3300 = shalt.err (!%p3297_p4)  }
   0xa   :  { %s3359_s28 = smov [#allocation4]   ;;  %s3301_s29 = scalar_lea.vmem %s16_s26, 16 }
   0xb   :  { %14 = dma.vmem_to_smem %s12_s23, 16, %s3359_s28, [#allocation3] }
   0xc   :  { %p3302_p5 = scmp.ne.s32.totalorder %s16_s26, %s3301_s29  ;;  %p3306_p6 = scmp.lt.s32.totalorder %s16_s26, %s16_s26 }
   0xd   :  { %p3307_p7 = scmp.lt.s32.totalorder %s3301_s29, %s3301_s29 }
   0xf   :  { %p3308_p8 = por %p3307_p7, %p3306_p6 }
  0x11   :  { %p3309_p9 = pnand %p3308_p8, %p3302_p5 }
  0x13   :  { %3312 = shalt.err (!%p3309_p9)  }
  0x14   :  { %s3360_s0 = smov [#allocation5]   ;;  %s19_s7 = sshll.u32 %s6862_s2, 4  ;;  %s20_s7 = int_to_ptr.vmem [resolvable:$true] %s19_s7 }
  0x15   :  { %18 = dma.vmem_to_smem %s16_s26, 16, %s3360_s0, [#allocation3] }
  0x16   :  { %s23_s10 = sshll.u32 %s6863_s3, 4  ;;  %s3313_s11 = scalar_lea.vmem %s20_s7, 16  ;;  %s24_s10 = int_to_ptr.vmem [resolvable:$true] %s23_s10 }
  0x17   :  { %p3314_p10 = scmp.ne.s32.totalorder %s20_s7, %s3313_s11  ;;  %p3318_p11 = scmp.lt.s32.totalorder %s20_s7, %s20_s7 }
  0x18   :  { %p3319_p12 = scmp.lt.s32.totalorder %s3313_s11, %s3313_s11 }
  0x1a   :  { %p3320_p13 = por %p3319_p12, %p3318_p11 }
  0x1c   :  { %p3321_p0 = pnand %p3320_p13, %p3314_p10 }
  0x1e   :  { %3324 = shalt.err (!%p3321_p0)  }
  0x1f   :  { %s3361_s12 = smov [#allocation6]   ;;  %s3325_s13 = scalar_lea.vmem %s24_s10, 16 }
  0x20   :  { %22 = dma.vmem_to_smem %s20_s7, 16, %s3361_s12, [#allocation3] }
  0x21   :  { %p3326_p1 = scmp.ne.s32.totalorder %s24_s10, %s3325_s13  ;;  %p3330_p2 = scmp.lt.s32.totalorder %s24_s10, %s24_s10 }
  0x22   :  { %p3331_p3 = scmp.lt.s32.totalorder %s3325_s13, %s3325_s13 }
  0x24   :  { %p3332_p4 = por %p3331_p3, %p3330_p2 }
  0x26   :  { %p3333_p5 = pnand %p3332_p4, %p3326_p1 }
  0x28   :  { %3336 = shalt.err (!%p3333_p5)  }
  0x29   :  { %s3362_s2 = smov [#allocation7]   ;;  %s27_s15 = sshll.u32 %s6864_s4, 4  ;;  %s28_s15 = int_to_ptr.vmem [resolvable:$true] %s27_s15 }
  0x2a   :  { %26 = dma.vmem_to_smem %s24_s10, 16, %s3362_s2, [#allocation3] }
  0x2b   :  { %s3337_s16 = scalar_lea.vmem %s28_s15, 16  ;;  %p3342_p7 = scmp.lt.s32.totalorder %s28_s15, %s28_s15 }
  0x2c   :  { %p3338_p6 = scmp.ne.s32.totalorder %s28_s15, %s3337_s16  ;;  %p3343_p8 = scmp.lt.s32.totalorder %s3337_s16, %s3337_s16 }
  0x2e   :  { %p3344_p9 = por %p3343_p8, %p3342_p7 }
  0x30   :  { %p3345_p10 = pnand %p3344_p9, %p3338_p6 }
  0x32   :  { %3348 = shalt.err (!%p3345_p10)  }
  0x33   :  { %s3363_s17 = smov [#allocation8]  }
  0x34   :  { %30 = dma.vmem_to_smem %s28_s15, 16, %s3363_s17, [#allocation3] }
  0x35   :  { %3353 = dma.done.wait [#allocation3], 80 }
  0x36   :  { %3354 = vsyncadd [#allocation3], 4294967216 }
  0x37   :  { %32 = sfence }
  0x38   :  { %s3414_s18 = smov 0  }
  0x39 LB: > { %s3420_s4 = sadd.s32 4294967295, %s3357_s18   ;;  %p3065_p11 = scmp.ge.s32.totalorder %s3357_s18, 1  ;;  %s3357_s18 = sphi %s3414_s18, %s38_s18  }
  0x3a   : > { %p118_p12 = scmp.lt.s32.totalorder %s3357_s18, 9 }
  0x3c   : > { %p119_p13 = pnand %p3065_p11, %p118_p12 }
  0x3e   : > { %122 = sbr.rel (%p119_p13) target bundleno = 682 (0x2aa), region = 24 }
  0x45   : > { %s139_s19 = sld [smem:[#allocation4 + %s3420_s4]]  ;;  %s3426_s20 = smul.u32 7, %s3420_s4  ;;  %v216_v0 = vlaneseq  ;;  %vm265_vm6 = vcmask 64512   ;;  %vm446_vm11 = vcmask 1041409   ;;  %vm448_vm13 = vcmask 1042434  }
  0x46   : > { %vm450_vm14 = vcmask 1043459   ;;  %p146_p9 = scmp.lt.s32.totalorder %s3420_s4, 7 }
  0x47   : > { %s3429_s21 = sld [smem:[#allocation7 + %s3426_s20]]  ;;  %v3434_v1 = vshrl.u32 %v216_v0, 7  ;;  %s3498_s27 = sadd.s32 1, %s3426_s20 }
  0x48   : > { %s3432_s22 = sld [smem:[#allocation8 + %s3426_s20]]  ;;  %s3891_s1 = sadd.s32 2, %s3426_s20 }
  0x49   : > { %6932 = vst [vmem:[#allocation10_spill] sm:$0xff] %v3434_v1  ;;  %v3437_v2 = vadd.s32 8, %v3434_v1  ;;  %s3544_s28 = sld [smem:[#allocation7 + %s3498_s27]]  ;;  %s4226_s9 = sadd.s32 3, %s3426_s20 }
  0x4a   : > { %s3547_s29 = sld [smem:[#allocation8 + %s3498_s27]]  ;;  %s4565_s13 = sadd.s32 4, %s3426_s20 }
  0x4b   : > { %p140_p0 = scmp.lt.s32.totalorder %s139_s19, 1  ;;  %6933 = vst [vmem:[#allocation11_spill] sm:$0xff] %v3437_v2  ;;  %s3917_s30 = sld [smem:[#allocation7 + %s3891_s1]] }
  0x4c   : > { %s3927_s7 = sld [smem:[#allocation8 + %s3891_s1]]  ;;  %s4900_s15 = sadd.s32 5, %s3426_s20 }
  0x4d   : > { %s7320_s19 = smov (!%p140_p0, %s139_s19), 1  ;;  %v221_v3 = vstv %s3429_s21  ;;  %s4252_s10 = sld [smem:[#allocation7 + %s4226_s9]] }
  0x4e   : > { %s3132_s23 = sshll.u32 %s7320_s19, 7  ;;  %v224_v4 = vstv %s3432_s22  ;;  %vm3452_vm0 = vcmp.ge.s32.totalorder %v3434_v1, %v221_v3  ;;  %vm3461_vm1 = vcmp.ge.s32.totalorder %v3437_v2, %v221_v3  ;;  %p410_p1 = scmp.gt.s32.totalorder %s3432_s22, %s3429_s21 }
  0x4f   : > { %s3443_s26 = scalar_lea.vmem %s6859_s5, %s3132_s23  ;;  %vm3466_vm2 = vcmp.lt.s32.totalorder %v3434_v1, %v224_v4  ;;  %vm3471_vm3 = vcmp.lt.s32.totalorder %v3437_v2, %v224_v4  ;;  %s4262_s11 = sld [smem:[#allocation8 + %s4226_s9]] }
  0x50   : > { %v3183_v5 = vld [vmem:[%s3443_s26] sm:$0xff]   ;;  %v3246_v6 = vld [vmem:[%s3443_s26 + $0x8] sm:$0xff]   ;;  %v3247_v7 = vld [vmem:[%s3443_s26 + $0x10] sm:$0xff]   ;;  %s3561_s0 = scalar_select %p410_p1, 1, 0 }
  0x51   : > { %v3248_v8 = vld [vmem:[%s3443_s26 + $0x18] sm:$0xff]   ;;  %v3249_v9 = vld [vmem:[%s3443_s26 + $0x20] sm:$0xff]   ;;  %v3456_v11 = vunpack.c.l.bf16 %v3183_v5  ;;  %v3250_v12 = vld [vmem:[%s3443_s26 + $0x28] sm:$0xff]   ;;  %v3475_v17 = vunpack.c.h.bf16 %v3183_v5  ;;  %v3477_v18 = vunpack.c.l.bf16 %v3246_v6  ;;  %v3479_v19 = vunpack.c.h.bf16 %v3246_v6  ;;  %p662_p2 = scmp.gt.s32.totalorder %s3547_s29, %s3544_s28  ;;  %s4591_s2 = sld [smem:[#allocation7 + %s4565_s13]] }
  0x52   : > { %v3251_v13 = vld [vmem:[%s3443_s26 + $0x30] sm:$0xff]   ;;  %v3481_v20 = vunpack.c.l.bf16 %v3247_v7  ;;  %v3252_v21 = vld [vmem:[%s3443_s26 + $0x38] sm:$0xff]   ;;  %v3253_v22 = vld [vmem:[%s3443_s26 + $0x40] sm:$0xff]   ;;  %v3485_v23 = vunpack.c.h.bf16 %v3247_v7  ;;  %v3487_v24 = vunpack.c.l.bf16 %v3248_v8  ;;  %v3489_v25 = vunpack.c.h.bf16 %v3248_v8  ;;  %p908_p3 = scmp.gt.s32.totalorder %s3927_s7, %s3917_s30  ;;  %s4601_s3 = sld [smem:[#allocation8 + %s4565_s13]] }
  0x53   : > { %v3491_v26 = vunpack.c.l.bf16 %v3249_v9  ;;  %v3254_v27 = vld [vmem:[%s3443_s26 + $0x48] sm:$0xff]   ;;  %v3255_v28 = vld [vmem:[%s3443_s26 + $0x50] sm:$0xff]   ;;  %v3500_v29 = vunpack.c.h.bf16 %v3249_v9  ;;  %v3502_v30 = vunpack.c.l.bf16 %v3250_v12  ;;  %v3504_v31 = vunpack.c.h.bf16 %v3250_v12  ;;  %v3256_v33 = vld [vmem:[%s3443_s26 + $0x58] sm:$0xff]   ;;  %s3940_s8 = scalar_select %p662_p2, 1, 0 }
  0x54   : > { %v3506_v32 = vunpack.c.l.bf16 %v3251_v13  ;;  %v3257_v34 = vld [vmem:[%s3443_s26 + $0x60] sm:$0xff]   ;;  %vm3514_vm4 = vmand %vm3452_vm0, %vm3466_vm2  ;;  %v3518_v36 = vunpack.c.h.bf16 %v3251_v13  ;;  %v3520_v37 = vunpack.c.l.bf16 %v3252_v21  ;;  %v3522_v38 = vunpack.c.h.bf16 %v3252_v21  ;;  %v3258_v45 = vld [vmem:[%s3443_s26 + $0x68] sm:$0xff]   ;;  %s4275_s12 = scalar_select %p908_p3, 1, 0 }
  0x55   : > { %v3524_v39 = vunpack.c.l.bf16 %v3253_v22  ;;  %vm3530_vm5 = vmand %vm3461_vm1, %vm3471_vm3  ;;  %v3534_v41 = vunpack.c.h.bf16 %v3253_v22  ;;  %v3536_v42 = vunpack.c.l.bf16 %v3254_v27  ;;  %v3538_v43 = vunpack.c.h.bf16 %v3254_v27  ;;  %v3259_v50 = vld [vmem:[%s3443_s26 + $0x70] sm:$0xff]   ;;  %v3260_v52 = vld [vmem:[%s3443_s26 + $0x78] sm:$0xff]   ;;  %p1154_p4 = scmp.gt.s32.totalorder %s4262_s11, %s4252_s10  ;;  %s4926_s16 = sld [smem:[#allocation7 + %s4900_s15]] }
  0x56   : > { %6942 = vst [vmem:[#allocation12_spill] sm:$0xff] %v3506_v32  ;;  %6945 = vst [vmem:[#allocation13_spill] sm:$0xff] %v3518_v36  ;;  %v3540_v44 = vunpack.c.l.bf16 %v3255_v28  ;;  %v3549_v46 = vunpack.c.h.bf16 %v3255_v28  ;;  %v3551_v47 = vunpack.c.l.bf16 %v3256_v33  ;;  %v3553_v48 = vunpack.c.h.bf16 %v3256_v33  ;;  %s4936_s17 = sld [smem:[#allocation8 + %s4900_s15]]  ;;  %s5239_s21 = sadd.s32 6, %s3426_s20 }
  0x57   : > { %6946 = vst [vmem:[#allocation14_spill] sm:$0xff] %v3520_v37  ;;  %6947 = vst [vmem:[#allocation15_spill] sm:$0xff] %v3522_v38  ;;  %v3555_v49 = vunpack.c.l.bf16 %v3257_v34  ;;  %v3563_v51 = vunpack.c.h.bf16 %v3257_v34  ;;  %v233_v53 = vsel %vm3514_vm4, %v3456_v11, -3.4028235e+38  ;;  %v234_v54 = vsel %vm3530_vm5, %v3475_v17, -3.4028235e+38 }
  0x58   : > { %6950 = vst [vmem:[#allocation16_spill] sm:$0xff] %v3551_v47  ;;  %6951 = vst [vmem:[#allocation17_spill] sm:$0xff] %v3553_v48  ;;  %v235_v55 = vsel %vm3514_vm4, %v3477_v18, -3.4028235e+38  ;;  %v3575_v56 = vunpack.c.l.bf16 %v3258_v45  ;;  %v236_v57 = vsel %vm3530_vm5, %v3479_v19, -3.4028235e+38  ;;  %v3586_v60 = vunpack.c.h.bf16 %v3258_v45  ;;  %p1400_p5 = scmp.gt.s32.totalorder %s4601_s3, %s4591_s2 }
  0x59   : > { %6952 = vst [vmem:[#allocation18_spill] sm:$0xff] %v3555_v49  ;;  %6953 = vst [vmem:[#allocation19_spill] sm:$0xff] %v3563_v51  ;;  %v237_v58 = vsel %vm3514_vm4, %v3481_v20, -3.4028235e+38  ;;  %v238_v59 = vsel %vm3530_vm5, %v3485_v23, -3.4028235e+38  ;;  %v3597_v0 = vunpack.c.l.bf16 %v3259_v50  ;;  %v3608_v6 = vunpack.c.h.bf16 %v3259_v50 }
  0x5a   : > { %6954 = vst [vmem:[#allocation20_spill] sm:$0xff] %v3575_v56  ;;  %6955 = vst [vmem:[#allocation21_spill] sm:$0xff] %v3586_v60  ;;  %v239_v61 = vsel %vm3514_vm4, %v3487_v24, -3.4028235e+38  ;;  %v240_v62 = vsel %vm3530_vm5, %v3489_v25, -3.4028235e+38  ;;  %v3619_v10 = vunpack.c.l.bf16 %v3260_v52  ;;  %v3630_v15 = vunpack.c.h.bf16 %v3260_v52 }
  0x5b   : > { %v241_v63 = vsel %vm3514_vm4, %v3491_v26, -3.4028235e+38  ;;  %6956 = vst [vmem:[#allocation22_spill] sm:$0xff] %v3597_v0  ;;  %v242_v3 = vsel %vm3530_vm5, %v3500_v29, -3.4028235e+38  ;;  %6957 = vst [vmem:[#allocation23_spill] sm:$0xff] %v3608_v6 }
  0x5c   : > { %v243_v4 = vsel %vm3514_vm4, %v3502_v30, -3.4028235e+38  ;;  %v244_v5 = vsel %vm3530_vm5, %v3504_v31, -3.4028235e+38  ;;  %v245_v7 = vsel %vm3514_vm4, %v3506_v32, -3.4028235e+38  ;;  %p1646_p6 = scmp.gt.s32.totalorder %s4936_s17, %s4926_s16 }
  0x5d   : > { %v246_v8 = vsel %vm3530_vm5, %v3518_v36, -3.4028235e+38  ;;  %v247_v9 = vsel %vm3514_vm4, %v3520_v37, -3.4028235e+38  ;;  %6958 = vst [vmem:[#allocation24_spill] sm:$0xff] %v3619_v10  ;;  %v266_v27 = vsel %vm265_vm6, %v233_v53, -inf }
  0x5e   : > { %v248_v12 = vsel %vm3530_vm5, %v3522_v38, -3.4028235e+38  ;;  %v267_v28 = vsel %vm265_vm6, %v234_v54, -inf  ;;  %v275_v33 = vsel %vm265_vm6, %v235_v55, -inf  ;;  %v276_v21 = vsel %vm265_vm6, %v236_v57, -inf  ;;  %s5265_s22 = sld [smem:[#allocation7 + %s5239_s21]] }
  0x5f   : > { %v268_v34 = vmax.f32 %v266_v27, %v267_v28  ;;  %v284_v45 = vsel %vm265_vm6, %v237_v58, -inf  ;;  %v277_v22 = vmax.f32 %v275_v33, %v276_v21  ;;  %v285_v16 = vsel %vm265_vm6, %v238_v59, -inf  ;;  %s4614_s14 = scalar_select %p1154_p4, 1, 0 }
  0x60   : > { %v293_v50 = vsel %vm265_vm6, %v239_v61, -inf  ;;  %v294_v14 = vsel %vm265_vm6, %v240_v62, -inf  ;;  %v286_v52 = vmax.f32 %v284_v45, %v285_v16  ;;  %v302_v53 = vsel %vm265_vm6, %v241_v63, -inf  ;;  %s4949_s19 = scalar_select %p1400_p5, 1, 0 }
  0x61   : > { %v269_v13 = vrot.slane %v268_v34, 4  ;;  %v295_v38 = vmax.f32 %v293_v50, %v294_v14  ;;  %v278_v54 = vrot.slane %v277_v22, 4  ;;  %v303_v27 = vsel %vm265_vm6, %v242_v3, -inf  ;;  %s5275_s23 = sld [smem:[#allocation8 + %s5239_s21]]  ;;  %s7322_s4 = smov (!%p146_p9, %s3420_s4), 7 }
  0x62   : > { %v311_v55 = vsel %vm265_vm6, %v243_v4, -inf  ;;  %v312_v57 = vsel %vm265_vm6, %v244_v5, -inf  ;;  %v287_v21 = vrot.slane %v286_v52, 4  ;;  %v304_v59 = vmax.f32 %v302_v53, %v303_v27  ;;  %s5288_s24 = scalar_select %p1646_p6, 1, 0 }
  0x63   : > { %v270_v58 = vmax.f32 %v268_v34, %v269_v13  ;;  %v296_v28 = vrot.slane %v295_v38, 4  ;;  %v279_v33 = vmax.f32 %v277_v22, %v278_v54  ;;  %v313_v61 = vmax.f32 %v311_v55, %v312_v57  ;;  %s5531_s25 = sld [smem:[#allocation5 + %s3426_s20]] }
  0x64   : > { %v320_v62 = vsel %vm265_vm6, %v245_v7, -inf  ;;  %v321_v16 = vsel %vm265_vm6, %v246_v8, -inf  ;;  %v288_v45 = vmax.f32 %v286_v52, %v287_v21  ;;  %v305_v50 = vrot.slane %v304_v59, 4  ;;  %s5534_s26 = sld [smem:[#allocation6 + %s3426_s20]] }
  0x65   : > { %v271_v14 = vrot.slane %v270_v58, 2  ;;  %v297_v63 = vmax.f32 %v295_v38, %v296_v28  ;;  %v280_v37 = vrot.slane %v279_v33, 2  ;;  %v314_v3 = vrot.slane %v313_v61, 4 }
  0x66   : > { %v322_v36 = vmax.f32 %v320_v62, %v321_v16  ;;  %v329_v4 = vsel %vm265_vm6, %v247_v9, -inf  ;;  %v289_v13 = vrot.slane %v288_v45, 2  ;;  %v306_v32 = vmax.f32 %v304_v59, %v305_v50 }
  0x67   : > { %v272_v5 = vmax.f32 %v270_v58, %v271_v14  ;;  %v298_v34 = vrot.slane %v297_v63, 2  ;;  %v281_v53 = vmax.f32 %v279_v33, %v280_v37  ;;  %v315_v22 = vmax.f32 %v313_v61, %v314_v3  ;;  %p1892_p7 = scmp.gt.s32.totalorder %s5275_s23, %s5265_s22 }
  0x68   : > { %v323_v54 = vrot.slane %v322_v36, 4  ;;  %v330_v7 = vsel %vm265_vm6, %v248_v12, -inf  ;;  %v290_v8 = vmax.f32 %v288_v45, %v289_v13  ;;  %v307_v52 = vrot.slane %v306_v32, 2 }
  0x69   : > { %v273_v27 = vrot.slane %v272_v5, 1  ;;  %v299_v55 = vmax.f32 %v297_v63, %v298_v34  ;;  %v282_v38 = vrot.slane %v281_v53, 1  ;;  %v316_v57 = vrot.slane %v315_v22, 2  ;;  %s5599_s20 = scalar_select %p1892_p7, 1, 0 }
  0x6a   : > { %v324_v21 = vmax.f32 %v322_v36, %v323_v54  ;;  %v331_v28 = vmax.f32 %v329_v4, %v330_v7  ;;  %v291_v9 = vrot.slane %v290_v8, 1  ;;  %v308_v16 = vmax.f32 %v306_v32, %v307_v52  ;;  %p2052_p8 = scmp.gt.s32.totalorder %s5534_s26, %s5531_s25 }
  0x6b   : > { %v3693_v62 = vmax.f32 %v272_v5, %v273_v27  ;;  %v300_v58 = vrot.slane %v299_v55, 1  ;;  %v3695_v14 = vmax.f32 %v281_v53, %v282_v38  ;;  %v317_v37 = vmax.f32 %v315_v22, %v316_v57 }
  0x6c   : > { %v325_v59 = vrot.slane %v324_v21, 2  ;;  %v332_v33 = vrot.slane %v331_v28, 4  ;;  %v3697_v61 = vmax.f32 %v290_v8, %v291_v9  ;;  %v309_v45 = vrot.slane %v308_v16, 1 }
  0x6d   : > { %v3699_v12 = vmax.f32 %v299_v55, %v300_v58  ;;  %v6959_v36 = vsel %vm3514_vm4, %v3524_v39, -3.4028235e+38  ;;  %v318_v50 = vrot.slane %v317_v37, 1  ;;  %v6960_v4 = vsel %vm3530_vm5, %v3534_v41, -3.4028235e+38 }
  0x6e   : > { %v338_v63 = vsel %vm265_vm6, %v6959_v36, -inf  ;;  %v326_v32 = vmax.f32 %v324_v21, %v325_v59  ;;  %v333_v3 = vmax.f32 %v331_v28, %v332_v33  ;;  %v339_v5 = vsel %vm265_vm6, %v6960_v4, -inf }
  0x6f   : > { %v3711_v13 = vmax.f32 %v308_v16, %v309_v45  ;;  %v340_v34 = vmax.f32 %v338_v63, %v339_v5  ;;  %v6961_v53 = vsel %vm3514_vm4, %v3536_v42, -3.4028235e+38  ;;  %v6962_v54 = vsel %vm3530_vm5, %v3538_v43, -3.4028235e+38 }
  0x70   : > { %v347_v22 = vsel %vm265_vm6, %v6961_v53, -inf  ;;  %v348_v7 = vsel %vm265_vm6, %v6962_v54, -inf  ;;  %v3723_v27 = vmax.f32 %v317_v37, %v318_v50  ;;  %v327_v8 = vrot.slane %v326_v32, 1 }
  0x71   : > { %v334_v55 = vrot.slane %v333_v3, 2  ;;  %v349_v52 = vmax.f32 %v347_v22, %v348_v7  ;;  %v6963_v38 = vstv %s3544_s28  ;;  %v6966_v21 = vstv %s3547_s29 }
  0x72   : > { %vm3728_vm7 = vcmp.ge.s32.totalorder %v3434_v1, %v6963_v38  ;;  %vm3735_vm8 = vcmp.lt.s32.totalorder %v3434_v1, %v6966_v21  ;;  %v341_v9 = vrot.slane %v340_v34, 4  ;;  %v6969_v58 = vsel %vm3514_vm4, %v3540_v44, -3.4028235e+38 }
  0x73   : > { %v356_v16 = vsel %vm265_vm6, %v6969_v58, -inf  ;;  %v6970_v37 = vsel %vm3530_vm5, %v3549_v46, -3.4028235e+38  ;;  %v6971_v33 = vsel %vm3514_vm4, %v3551_v47, -3.4028235e+38  ;;  %v3754_v36 = vmax.f32 %v326_v32, %v327_v8  ;;  %vm3816_vm12 = vmand %vm3728_vm7, %vm3735_vm8 }
  0x74   : > { %v357_v59 = vsel %vm265_vm6, %v6970_v37, -inf  ;;  %v365_v45 = vsel %vm265_vm6, %v6971_v33, -inf  ;;  %v335_v63 = vmax.f32 %v333_v3, %v334_v55  ;;  %v350_v50 = vrot.slane %v349_v52, 4 }
  0x75   : > { %v358_v4 = vmax.f32 %v356_v16, %v357_v59  ;;  %v342_v5 = vmax.f32 %v340_v34, %v341_v9  ;;  %v6972_v53 = vsel %vm3530_vm5, %v3553_v48, -3.4028235e+38  ;;  %v6973_v54 = vsel %vm3514_vm4, %v3555_v49, -3.4028235e+38 }
  0x76   : > { %v366_v22 = vsel %vm265_vm6, %v6972_v53, -inf  ;;  %v374_v7 = vsel %vm265_vm6, %v6973_v54, -inf  ;;  %v6974_v32 = vsel %vm3530_vm5, %v3563_v51, -3.4028235e+38  ;;  %v336_v8 = vrot.slane %v335_v63, 1 }
  0x77   : > { %v375_v3 = vsel %vm265_vm6, %v6974_v32, -inf  ;;  %v351_v34 = vmax.f32 %v349_v52, %v350_v50  ;;  %v359_v55 = vrot.slane %v358_v4, 4  ;;  %v367_v38 = vmax.f32 %v365_v45, %v366_v22 }
  0x78   : > { %v343_v21 = vrot.slane %v342_v5, 2  ;;  %v376_v9 = vmax.f32 %v374_v7, %v375_v3  ;;  %v6975_v58 = vsel %vm3514_vm4, %v3575_v56, -3.4028235e+38  ;;  %v6976_v37 = vsel %vm3530_vm5, %v3586_v60, -3.4028235e+38 }
  0x79   : > { %v383_v16 = vsel %vm265_vm6, %v6975_v58, -inf  ;;  %v384_v59 = vsel %vm265_vm6, %v6976_v37, -inf  ;;  %v3781_v33 = vmax.f32 %v335_v63, %v336_v8  ;;  %v352_v52 = vrot.slane %v351_v34, 2 }
  0x7a   : > { %v360_v45 = vmax.f32 %v358_v4, %v359_v55  ;;  %v368_v50 = vrot.slane %v367_v38, 4  ;;  %v344_v53 = vmax.f32 %v342_v5, %v343_v21  ;;  %v377_v22 = vrot.slane %v376_v9, 4 }
  0x7b   : > { %v385_v54 = vmax.f32 %v383_v16, %v384_v59  ;;  %v6977_v7 = vsel %vm3514_vm4, %v3597_v0, -3.4028235e+38  ;;  %v353_v3 = vmax.f32 %v351_v34, %v352_v52  ;;  %v6978_v63 = vsel %vm3530_vm5, %v3608_v6, -3.4028235e+38 }
  0x7c   : > { %v392_v32 = vsel %vm265_vm6, %v6977_v7, -inf  ;;  %v361_v58 = vrot.slane %v360_v45, 2  ;;  %v369_v1 = vmax.f32 %v367_v38, %v368_v50  ;;  %v393_v8 = vsel %vm265_vm6, %v6978_v63, -inf }
  0x7d   : > { %v6979_v4 = vstv %s3544_s28  ;;  %v6982_v55 = vstv %s3547_s29  ;;  %v345_v34 = vrot.slane %v344_v53, 1  ;;  %v378_v38 = vmax.f32 %v376_v9, %v377_v22  ;;  %s5610_s28 = sld [smem:[#allocation5 + %s3498_s27]] }
  0x7e   : > { %vm3796_vm9 = vcmp.ge.s32.totalorder %v3437_v2, %v6979_v4  ;;  %vm3803_vm10 = vcmp.lt.s32.totalorder %v3437_v2, %v6982_v55  ;;  %v386_v16 = vrot.slane %v385_v54, 4  ;;  %v394_v37 = vmax.f32 %v392_v32, %v393_v8  ;;  %s5620_s29 = sld [smem:[#allocation6 + %s3498_s27]] }
  0x7f   : > { %v354_v59 = vrot.slane %v353_v3, 1  ;;  %v362_v52 = vmax.f32 %v360_v45, %v361_v58  ;;  %v370_v50 = vrot.slane %v369_v1, 2  ;;  %v6985_v7 = vsel %vm3514_vm4, %v3619_v10, -3.4028235e+38  ;;  %vm3862_vm4 = vmand %vm3796_vm9, %vm3803_vm10 }
  0x80   : > { %v401_v63 = vsel %vm265_vm6, %v6985_v7, -inf  ;;  %v346_v4 = vmax.f32 %v344_v53, %v345_v34  ;;  %v379_v6 = vrot.slane %v378_v38, 2  ;;  %v387_v0 = vmax.f32 %v385_v54, %v386_v16 }
  0x81   : > { %v395_v55 = vrot.slane %v394_v37, 4  ;;  %v355_v45 = vmax.f32 %v353_v3, %v354_v59  ;;  %v363_v35 = vrot.slane %v362_v52, 1  ;;  %v371_v22 = vmax.f32 %v369_v1, %v370_v50 }
  0x82   : > { %v6988_v53 = vsel %vm3530_vm5, %v3630_v15, -3.4028235e+38  ;;  %v380_v32 = vmax.f32 %v378_v38, %v379_v6  ;;  %v388_v58 = vrot.slane %v387_v0, 2  ;;  %v6989_v16 = vstv %s3561_s0  ;;  %s5633_s0 = scalar_select %p2052_p8, 1, 0 }
  0x83   : > { %v402_v54 = vsel %vm265_vm6, %v6988_v53, -inf  ;;  %v396_v8 = vmax.f32 %v394_v37, %v395_v55  ;;  %v364_v57 = vmax.f32 %v362_v52, %v363_v35  ;;  %v372_v34 = vrot.slane %v371_v22, 1 }
  0x84   : > { %v403_v28 = vmax.f32 %v401_v63, %v402_v54  ;;  %vm3827_vm15 = vcmp.eq.s32.totalorder %v6989_v16, 1  ;;  %vm452_vm0 = vcmask 1044484   ;;  %v486_v1 = vsel %vm3816_vm12, %v3456_v11, -3.4028235e+38  ;;  %p2203_p10 = scmp.gt.s32.totalorder %s5620_s29, %s5610_s28 }
  0x85   : > { %v381_v40 = vrot.slane %v380_v32, 1  ;;  %v389_v3 = vmax.f32 %v387_v0, %v388_v58  ;;  %v397_v59 = vrot.slane %v396_v8, 2  ;;  %vm454_vm1 = vcmask 1045509  }
  0x86   : > { %v404_v6 = vrot.slane %v403_v28, 4  ;;  %v373_v38 = vmax.f32 %v371_v22, %v372_v34  ;;  %v414_v37 = vsel %vm3827_vm15, %v3693_v62, 0.0  ;;  %v415_v52 = vsel %vm3827_vm15, %v3695_v14, 0.0  ;;  %s6102_s27 = scalar_select %p2203_p10, 1, 0 }
  0x87   : > { %v416_v50 = vsel %vm3827_vm15, %v3697_v61, 0.0  ;;  %vm456_vm2 = vcmask 1046534   ;;  %v382_v63 = vmax.f32 %v380_v32, %v381_v40  ;;  %v390_v55 = vrot.slane %v389_v3, 1 }
  0x88   : > { %v398_v0 = vmax.f32 %v396_v8, %v397_v59  ;;  %v405_v35 = vmax.f32 %v403_v28, %v404_v6  ;;  %vm458_vm3 = vcmask 1047559   ;;  %v417_v22 = vsel %vm3827_vm15, %v3699_v12, 0.0 }
  0x89   : > { %v418_v62 = vsel %vm3827_vm15, %v3711_v13, 0.0  ;;  %v419_v14 = vsel %vm3827_vm15, %v3723_v27, 0.0  ;;  %v420_v61 = vsel %vm3827_vm15, %v3754_v36, 0.0  ;;  %v391_v53 = vmax.f32 %v389_v3, %v390_v55 }
  0x8a   : > { %v399_v54 = vrot.slane %v398_v0, 1  ;;  %v406_v32 = vrot.slane %v405_v35, 2  ;;  %v421_v58 = vsel %vm3827_vm15, %v3781_v33, 0.0  ;;  %v422_v13 = vsel %vm3827_vm15, %v346_v4, 0.0 }
  0x8b   : > { %v423_v27 = vsel %vm3827_vm15, %v355_v45, 0.0  ;;  %v424_v36 = vsel %vm3827_vm15, %v364_v57, 0.0  ;;  %v425_v33 = vsel %vm3827_vm15, %v373_v38, 0.0  ;;  %v426_v5 = vsel %vm3827_vm15, %v382_v63, 0.0 }
  0x8c   : > { %v400_v21 = vmax.f32 %v398_v0, %v399_v54  ;;  %v407_v8 = vmax.f32 %v405_v35, %v406_v32  ;;  %v427_v4 = vsel %vm3827_vm15, %v391_v53, 0.0  ;;  %v447_v28 = vsel %vm446_vm11, %v415_v52, %v414_v37 }
  0x8d   : > { %v460_v45 = vsel %vm446_vm11, %v423_v27, %v422_v13  ;;  %v487_v57 = vsel %vm3862_vm4, %v3475_v17, -3.4028235e+38  ;;  %v488_v34 = vsel %vm3816_vm12, %v3477_v18, -3.4028235e+38  ;;  %v449_v3 = vsel %vm448_vm13, %v416_v50, %v447_v28 }
  0x8e   : > { %v408_v16 = vrot.slane %v407_v8, 1  ;;  %v428_v40 = vsel %vm3827_vm15, %v400_v21, 0.0  ;;  %v461_v59 = vsel %vm448_vm13, %v424_v36, %v460_v45  ;;  %v451_v6 = vsel %vm450_vm14, %v417_v22, %v449_v3  ;;  %v6997_v45 = vld [vmem:[#allocation15_spill] sm:$0xff] }
  0x8f   : > { %v462_v38 = vsel %vm450_vm14, %v425_v33, %v461_v59  ;;  %v489_v37 = vsel %vm3862_vm4, %v3479_v19, -3.4028235e+38  ;;  %v490_v52 = vsel %vm3816_vm12, %v3481_v20, -3.4028235e+38  ;;  %v453_v63 = vsel %vm452_vm0, %v418_v62, %v451_v6 }
  0x90   : > { %v409_v50 = vmax.f32 %v407_v8, %v408_v16  ;;  %v463_v55 = vsel %vm452_vm0, %v426_v5, %v462_v38  ;;  %v491_v0 = vsel %vm3862_vm4, %v3485_v23, -3.4028235e+38  ;;  %v455_v35 = vsel %vm454_vm1, %v419_v14, %v453_v63  ;;  %v6995_v8 = vld [vmem:[#allocation13_spill] sm:$0xff]  ;;  %v6999_v63 = vld [vmem:[#allocation23_spill] sm:$0xff] }
  0x91   : > { %v464_v22 = vsel %vm454_vm1, %v427_v4, %v463_v55  ;;  %v492_v53 = vsel %vm3816_vm12, %v3487_v24, -3.4028235e+38  ;;  %v493_v62 = vsel %vm3862_vm4, %v3489_v25, -3.4028235e+38  ;;  %v457_v32 = vsel %vm456_vm2, %v420_v61, %v455_v35  ;;  %v6996_v4 = vld [vmem:[#allocation14_spill] sm:$0xff] }
  0x92   : > { %v429_v54 = vsel %vm3827_vm15, %v409_v50, 0.0  ;;  %v465_v13 = vsel %vm456_vm2, %v428_v40, %v464_v22  ;;  %v494_v14 = vsel %vm3816_vm12, %v3491_v26, -3.4028235e+38  ;;  %v459_v27 = vsel %vm458_vm3, %v421_v58, %v457_v32  ;;  %v6994_v58 = vld [vmem:[#allocation12_spill] sm:$0xff] }
  0x93   : > { %v466_v36 = vsel %vm458_vm3, %v429_v54, %v465_v13  ;;  %v495_v33 = vsel %vm3862_vm4, %v3500_v29, -3.4028235e+38  ;;  %v496_v7 = vsel %vm3816_vm12, %v3502_v30, -3.4028235e+38  ;;  %469 = vst.msk [vmem:[#allocation2] sm:$0xff] %vm265_vm6, %v459_v27  ;;  %v6998_v27 = vld [vmem:[#allocation22_spill] sm:$0xff] }
  0x94   : > { %470 = vst.msk [vmem:[#allocation2 + $0x8] sm:$0xff] %vm265_vm6, %v466_v36  ;;  %v497_v61 = vsel %vm3862_vm4, %v3504_v31, -3.4028235e+38  ;;  %v498_v21 = vsel %vm3816_vm12, %v6994_v58, -3.4028235e+38  ;;  %v518_v36 = vsel %vm265_vm6, %v486_v1, -inf }
  0x95   : > { %v499_v5 = vsel %vm3862_vm4, %v6995_v8, -3.4028235e+38  ;;  %v500_v28 = vsel %vm3816_vm12, %v6996_v4, -3.4028235e+38  ;;  %v519_v55 = vsel %vm265_vm6, %v487_v57, -inf  ;;  %v527_v13 = vsel %vm265_vm6, %v488_v34, -inf }
  0x96   : > { %v528_v35 = vsel %vm265_vm6, %v489_v37, -inf  ;;  %v520_v50 = vmax.f32 %v518_v36, %v519_v55  ;;  %v536_v54 = vsel %vm265_vm6, %v490_v52, -inf  ;;  %v537_v6 = vsel %vm265_vm6, %v491_v0, -inf }
  0x97   : > { %v529_v38 = vmax.f32 %v527_v13, %v528_v35  ;;  %v538_v32 = vmax.f32 %v536_v54, %v537_v6  ;;  %v545_v22 = vsel %vm265_vm6, %v492_v53, -inf  ;;  %v546_v59 = vsel %vm265_vm6, %v493_v62, -inf }
  0x98   : > { %v554_v3 = vsel %vm265_vm6, %v494_v14, -inf  ;;  %v521_v1 = vrot.slane %v520_v50, 4  ;;  %v547_v57 = vmax.f32 %v545_v22, %v546_v59  ;;  %v555_v34 = vsel %vm265_vm6, %v495_v33, -inf }
  0x99   : > { %v530_v40 = vrot.slane %v529_v38, 4  ;;  %v539_v16 = vrot.slane %v538_v32, 4  ;;  %v556_v37 = vmax.f32 %v554_v3, %v555_v34  ;;  %v563_v55 = vsel %vm265_vm6, %v496_v7, -inf }
  0x9a   : > { %v564_v52 = vsel %vm265_vm6, %v497_v61, -inf  ;;  %v522_v35 = vmax.f32 %v520_v50, %v521_v1  ;;  %v548_v6 = vrot.slane %v547_v57, 4  ;;  %v572_v62 = vsel %vm265_vm6, %v498_v21, -inf }
  0x9b   : > { %v531_v0 = vmax.f32 %v529_v38, %v530_v40  ;;  %v565_v54 = vmax.f32 %v563_v55, %v564_v52  ;;  %v540_v53 = vmax.f32 %v538_v32, %v539_v16  ;;  %v557_v13 = vrot.slane %v556_v37, 4 }
  0x9c   : > { %v573_v14 = vsel %vm265_vm6, %v499_v5, -inf  ;;  %v523_v36 = vrot.slane %v522_v35, 2  ;;  %v549_v22 = vmax.f32 %v547_v57, %v548_v6  ;;  %v581_v7 = vsel %vm265_vm6, %v500_v28, -inf }
  0x9d   : > { %v532_v59 = vrot.slane %v531_v0, 2  ;;  %v566_v33 = vrot.slane %v565_v54, 4  ;;  %v541_v4 = vrot.slane %v540_v53, 2  ;;  %v558_v3 = vmax.f32 %v556_v37, %v557_v13 }
  0x9e   : > { %v574_v34 = vmax.f32 %v572_v62, %v573_v14  ;;  %v524_v61 = vmax.f32 %v522_v35, %v523_v36  ;;  %v550_v40 = vrot.slane %v549_v22, 2  ;;  %v7000_v21 = vsel %vm3862_vm4, %v6997_v45, -3.4028235e+38 }
  0x9f   : > { %v533_v50 = vmax.f32 %v531_v0, %v532_v59  ;;  %v567_v38 = vmax.f32 %v565_v54, %v566_v33  ;;  %v542_v1 = vmax.f32 %v540_v53, %v541_v4  ;;  %v559_v16 = vrot.slane %v558_v3, 2 }
  0xa0   : > { %v575_v32 = vrot.slane %v574_v34, 4  ;;  %v582_v5 = vsel %vm265_vm6, %v7000_v21, -inf  ;;  %v525_v57 = vrot.slane %v524_v61, 1  ;;  %v551_v52 = vmax.f32 %v549_v22, %v550_v40 }
  0xa1   : > { %v534_v55 = vrot.slane %v533_v50, 1  ;;  %v568_v37 = vrot.slane %v567_v38, 2  ;;  %v543_v6 = vrot.slane %v542_v1, 1  ;;  %v560_v13 = vmax.f32 %v558_v3, %v559_v16 }
  0xa2   : > { %v576_v28 = vmax.f32 %v574_v34, %v575_v32  ;;  %v583_v35 = vmax.f32 %v581_v7, %v582_v5  ;;  %v4034_v0 = vmax.f32 %v524_v61, %v525_v57  ;;  %v552_v4 = vrot.slane %v551_v52, 1 }
  0xa3   : > { %v4036_v54 = vmax.f32 %v533_v50, %v534_v55  ;;  %v569_v53 = vmax.f32 %v567_v38, %v568_v37  ;;  %v4038_v62 = vmax.f32 %v542_v1, %v543_v6  ;;  %v561_v14 = vrot.slane %v560_v13, 1 }
  0xa4   : > { %v577_v36 = vrot.slane %v576_v28, 2  ;;  %v584_v59 = vrot.slane %v583_v35, 4  ;;  %v4040_v33 = vmax.f32 %v551_v52, %v552_v4  ;;  %v7001_v22 = vsel %vm3816_vm12, %v3524_v39, -3.4028235e+38 }
  0xa5   : > { %v570_v21 = vrot.slane %v569_v53, 1  ;;  %v590_v3 = vsel %vm265_vm6, %v7001_v22, -inf  ;;  %v7002_v34 = vsel %vm3862_vm4, %v3534_v41, -3.4028235e+38  ;;  %v4052_v61 = vmax.f32 %v560_v13, %v561_v14 }
  0xa6   : > { %v591_v7 = vsel %vm265_vm6, %v7002_v34, -inf  ;;  %v578_v50 = vmax.f32 %v576_v28, %v577_v36  ;;  %v585_v40 = vmax.f32 %v583_v35, %v584_v59  ;;  %v7003_v16 = vsel %vm3816_vm12, %v3536_v42, -3.4028235e+38 }
  0xa7   : > { %v592_v38 = vmax.f32 %v590_v3, %v591_v7  ;;  %v4054_v1 = vmax.f32 %v569_v53, %v570_v21  ;;  %v599_v32 = vsel %vm265_vm6, %v7003_v16, -inf  ;;  %v7004_v5 = vsel %vm3862_vm4, %v3538_v43, -3.4028235e+38 }
  0xa8   : > { %v600_v57 = vsel %vm265_vm6, %v7004_v5, -inf  ;;  %v7005_v55 = vsel %vm3816_vm12, %v3540_v44, -3.4028235e+38  ;;  %v579_v37 = vrot.slane %v578_v50, 1  ;;  %v586_v6 = vrot.slane %v585_v40, 2 }
  0xa9   : > { %v608_v52 = vsel %vm265_vm6, %v7005_v55, -inf  ;;  %v593_v13 = vrot.slane %v592_v38, 4  ;;  %v601_v28 = vmax.f32 %v599_v32, %v600_v57  ;;  %v7006_v35 = vsel %vm3862_vm4, %v3549_v46, -3.4028235e+38 }
  0xaa   : > { %v609_v4 = vsel %vm265_vm6, %v7006_v35, -inf  ;;  %v7007_v53 = vsel %vm3816_vm12, %v3551_v47, -3.4028235e+38  ;;  %v7008_v36 = vsel %vm3862_vm4, %v3553_v48, -3.4028235e+38  ;;  %v4091_v3 = vmax.f32 %v578_v50, %v579_v37 }
  0xab   : > { %v617_v14 = vsel %vm265_vm6, %v7007_v53, -inf  ;;  %v618_v59 = vsel %vm265_vm6, %v7008_v36, -inf  ;;  %v7009_v21 = vsel %vm3816_vm12, %v3555_v49, -3.4028235e+38  ;;  %v587_v34 = vmax.f32 %v585_v40, %v586_v6 }
  0xac   : > { %v626_v22 = vsel %vm265_vm6, %v7009_v21, -inf  ;;  %v594_v7 = vmax.f32 %v592_v38, %v593_v13  ;;  %v602_v16 = vrot.slane %v601_v28, 4  ;;  %v610_v32 = vmax.f32 %v608_v52, %v609_v4 }
  0xad   : > { %v619_v5 = vmax.f32 %v617_v14, %v618_v59  ;;  %v7010_v57 = vsel %vm3862_vm4, %v3563_v51, -3.4028235e+38  ;;  %v7011_v35 = vsel %vm3816_vm12, %v3575_v56, -3.4028235e+38  ;;  %v588_v36 = vrot.slane %v587_v34, 1 }
  0xae   : > { %v627_v55 = vsel %vm265_vm6, %v7010_v57, -inf  ;;  %v635_v53 = vsel %vm265_vm6, %v7011_v35, -inf  ;;  %v595_v50 = vrot.slane %v594_v7, 2  ;;  %v603_v40 = vmax.f32 %v601_v28, %v602_v16 }
  0xaf   : > { %v628_v38 = vmax.f32 %v626_v22, %v627_v55  ;;  %v611_v52 = vrot.slane %v610_v32, 4  ;;  %v620_v37 = vrot.slane %v619_v5, 4  ;;  %v7012_v6 = vsel %vm3862_vm4, %v3586_v60, -3.4028235e+38 }
  0xb0   : > { %v636_v13 = vsel %vm265_vm6, %v7012_v6, -inf  ;;  %v7013_v4 = vsel %vm3816_vm12, %v6998_v27, -3.4028235e+38  ;;  %v4113_v59 = vmax.f32 %v587_v34, %v588_v36  ;;  %v596_v21 = vmax.f32 %v594_v7, %v595_v50  ;;  %v7016_v27 = vld [vmem:[#allocation10_spill] sm:$0xff] }
  0xb1   : > { %v644_v14 = vsel %vm265_vm6, %v7013_v4, -inf  ;;  %v604_v57 = vrot.slane %v603_v40, 2  ;;  %v629_v28 = vrot.slane %v628_v38, 4  ;;  %v612_v22 = vmax.f32 %v610_v32, %v611_v52 }
  0xb2   : > { %v621_v16 = vmax.f32 %v619_v5, %v620_v37  ;;  %v637_v55 = vmax.f32 %v635_v53, %v636_v13  ;;  %v7014_v35 = vsel %vm3862_vm4, %v6999_v63, -3.4028235e+38  ;;  %v7015_v60 = vstv %s3917_s30 }
  0xb3   : > { %v645_v6 = vsel %vm265_vm6, %v7014_v35, -inf  ;;  %vm4123_vm5 = vcmp.ge.s32.totalorder %v7016_v27, %v7015_v60  ;;  %v7019_v34 = vstv %s3927_s7  ;;  %v597_v32 = vrot.slane %v596_v21, 1 }
  0xb4   : > { %vm4130_vm7 = vcmp.lt.s32.totalorder %v7016_v27, %v7019_v34  ;;  %v605_v5 = vmax.f32 %v603_v40, %v604_v57  ;;  %v630_v53 = vmax.f32 %v628_v38, %v629_v28  ;;  %v646_v36 = vmax.f32 %v644_v14, %v645_v6 }
  0xb5   : > { %v613_v50 = vrot.slane %v612_v22, 2  ;;  %v622_v52 = vrot.slane %v621_v16, 2  ;;  %v638_v37 = vrot.slane %v637_v55, 4  ;;  %v7022_v60 = vsel %vm3816_vm12, %v3619_v10, -3.4028235e+38  ;;  %vm4192_vm12 = vmand %vm4123_vm5, %vm4130_vm7 }
  0xb6   : > { %v653_v13 = vsel %vm265_vm6, %v7022_v60, -inf  ;;  %v7023_v35 = vstv %s3917_s30  ;;  %v7026_v27 = vstv %s3927_s7  ;;  %v598_v38 = vmax.f32 %v596_v21, %v597_v32  ;;  %s3261_s30 = smul.u32 28, %s7322_s4 }
  0xb7   : > { %vm4142_vm8 = vcmp.ge.s32.totalorder %v3437_v2, %v7023_v35  ;;  %vm4149_vm9 = vcmp.lt.s32.totalorder %v3437_v2, %v7026_v27  ;;  %v606_v14 = vrot.slane %v605_v5, 1  ;;  %v631_v9 = vrot.slane %v630_v53, 2 }
  0xb8   : > { %v647_v57 = vrot.slane %v646_v36, 4  ;;  %v614_v28 = vmax.f32 %v612_v22, %v613_v50  ;;  %v623_v6 = vmax.f32 %v621_v16, %v622_v52  ;;  %v639_v60 = vmax.f32 %v637_v55, %v638_v37  ;;  %vm4210_vm15 = vmand %vm4142_vm8, %vm4149_vm9 }
  0xb9   : > { %v7029_v35 = vsel %vm3862_vm4, %v3630_v15, -3.4028235e+38  ;;  %v607_v63 = vmax.f32 %v605_v5, %v606_v14  ;;  %v632_v56 = vmax.f32 %v630_v53, %v631_v9  ;;  %v7030_v21 = vstv %s3940_s8  ;;  %s6158_s8 = scalar_lea.vmem %s6860_s6, %s3261_s30 }
  0xba   : > { %v654_v10 = vsel %vm265_vm6, %v7029_v35, -inf  ;;  %v648_v27 = vmax.f32 %v646_v36, %v647_v57  ;;  %v615_v51 = vrot.slane %v614_v28, 1  ;;  %v624_v49 = vrot.slane %v623_v6, 1 }
  0xbb   : > { %v655_v2 = vmax.f32 %v653_v13, %v654_v10  ;;  %v640_v48 = vrot.slane %v639_v60, 2  ;;  %vm4160_vm10 = vcmp.eq.s32.totalorder %v7030_v21, 1  ;;  %v633_v22 = vrot.slane %v632_v56, 1 }
  0xbc   : > { %v649_v16 = vrot.slane %v648_v27, 2  ;;  %v666_v12 = vsel %vm4160_vm10, %v4034_v0, 0.0  ;;  %v616_v50 = vmax.f32 %v614_v28, %v615_v51  ;;  %v625_v5 = vmax.f32 %v623_v6, %v624_v49 }
  0xbd   : > { %v656_v55 = vrot.slane %v655_v2, 4  ;;  %v641_v53 = vmax.f32 %v639_v60, %v640_v48  ;;  %v667_v10 = vsel %vm4160_vm10, %v4036_v54, 0.0  ;;  %v634_v36 = vmax.f32 %v632_v56, %v633_v22 }
  0xbe   : > { %v650_v52 = vmax.f32 %v648_v27, %v649_v16  ;;  %v668_v13 = vsel %vm4160_vm10, %v4038_v62, 0.0  ;;  %v669_v9 = vsel %vm4160_vm10, %v4040_v33, 0.0  ;;  %v670_v48 = vsel %vm4160_vm10, %v4052_v61, 0.0 }
  0xbf   : > { %v657_v37 = vmax.f32 %v655_v2, %v656_v55  ;;  %v642_v14 = vrot.slane %v641_v53, 1  ;;  %v671_v49 = vsel %vm4160_vm10, %v4054_v1, 0.0  ;;  %v672_v2 = vsel %vm4160_vm10, %v4091_v3, 0.0 }
  0xc0   : > { %v651_v51 = vrot.slane %v650_v52, 1  ;;  %v673_v0 = vsel %vm4160_vm10, %v4113_v59, 0.0  ;;  %v674_v33 = vsel %vm4160_vm10, %v598_v38, 0.0  ;;  %v675_v61 = vsel %vm4160_vm10, %v607_v63, 0.0 }
  0xc1   : > { %v658_v56 = vrot.slane %v657_v37, 2  ;;  %v643_v62 = vmax.f32 %v641_v53, %v642_v14  ;;  %v676_v1 = vsel %vm4160_vm10, %v616_v50, 0.0  ;;  %v677_v4 = vsel %vm4160_vm10, %v625_v5, 0.0 }
  0xc2   : > { %v652_v3 = vmax.f32 %v650_v52, %v651_v51  ;;  %v678_v7 = vsel %vm4160_vm10, %v634_v36, 0.0  ;;  %v698_v57 = vsel %vm446_vm11, %v667_v10, %v666_v12  ;;  %v705_v28 = vsel %vm446_vm11, %v675_v61, %v674_v33  ;;  %v7037_v61 = vld [vmem:[#allocation14_spill] sm:$0xff] }
  0xc3   : > { %v659_v59 = vmax.f32 %v657_v37, %v658_v56  ;;  %v679_v63 = vsel %vm4160_vm10, %v643_v62, 0.0  ;;  %v732_v6 = vsel %vm4192_vm12, %v3456_v11, -3.4028235e+38  ;;  %v699_v34 = vsel %vm448_vm13, %v668_v13, %v698_v57 }
  0xc4   : > { %v680_v40 = vsel %vm4160_vm10, %v652_v3, 0.0  ;;  %v706_v35 = vsel %vm448_vm13, %v676_v1, %v705_v28  ;;  %v700_v27 = vsel %vm450_vm14, %v669_v9, %v699_v34  ;;  %v733_v22 = vsel %vm4210_vm15, %v3475_v17, -3.4028235e+38  ;;  %v7045_v34 = vld [vmem:[#allocation24_spill] sm:$0xff] }
  0xc5   : > { %v660_v60 = vrot.slane %v659_v59, 1  ;;  %v707_v21 = vsel %vm450_vm14, %v677_v4, %v706_v35  ;;  %v734_v16 = vsel %vm4192_vm12, %v3477_v18, -3.4028235e+38  ;;  %v701_v12 = vsel %vm452_vm0, %v670_v48, %v700_v27  ;;  %v7039_v27 = vld [vmem:[#allocation18_spill] sm:$0xff] }
  0xc6   : > { %v708_v50 = vsel %vm452_vm0, %v678_v7, %v707_v21  ;;  %v735_v5 = vsel %vm4210_vm15, %v3479_v19, -3.4028235e+38  ;;  %v702_v53 = vsel %vm454_vm1, %v671_v49, %v701_v12  ;;  %v736_v36 = vsel %vm4192_vm12, %v3481_v20, -3.4028235e+38 }
  0xc7   : > { %v661_v55 = vmax.f32 %v659_v59, %v660_v60  ;;  %v709_v10 = vsel %vm454_vm1, %v679_v63, %v708_v50  ;;  %v737_v52 = vsel %vm4210_vm15, %v3485_v23, -3.4028235e+38  ;;  %v703_v13 = vsel %vm456_vm2, %v672_v2, %v702_v53  ;;  %v7041_v50 = vld [vmem:[#allocation20_spill] sm:$0xff] }
  0xc8   : > { %v710_v14 = vsel %vm456_vm2, %v680_v40, %v709_v10  ;;  %v738_v9 = vsel %vm4192_vm12, %v3487_v24, -3.4028235e+38  ;;  %v704_v48 = vsel %vm458_vm3, %v673_v0, %v703_v13  ;;  %v739_v51 = vsel %vm4210_vm15, %v3489_v25, -3.4028235e+38  ;;  %v7038_v40 = vld [vmem:[#allocation17_spill] sm:$0xff] }
  0xc9   : > { %v681_v37 = vsel %vm4160_vm10, %v661_v55, 0.0  ;;  %v740_v32 = vsel %vm4192_vm12, %v3491_v26, -3.4028235e+38  ;;  %715 = vst.msk [vmem:[#allocation2 + $0x10] sm:$0xff] %vm265_vm6, %v704_v48  ;;  %v741_v56 = vsel %vm4210_vm15, %v3500_v29, -3.4028235e+38 }
  0xca   : > { %v711_v49 = vsel %vm458_vm3, %v681_v37, %v710_v14  ;;  %v742_v2 = vsel %vm4192_vm12, %v3502_v30, -3.4028235e+38  ;;  %v743_v0 = vsel %vm4210_vm15, %v3504_v31, -3.4028235e+38  ;;  %v744_v62 = vsel %vm4192_vm12, %v6994_v58, -3.4028235e+38 }
  0xcb   : > { %716 = vst.msk [vmem:[#allocation2 + $0x18] sm:$0xff] %vm265_vm6, %v711_v49  ;;  %v745_v33 = vsel %vm4210_vm15, %v6995_v8, -3.4028235e+38  ;;  %v746_v1 = vsel %vm4192_vm12, %v7037_v61, -3.4028235e+38  ;;  %v7040_v55 = vld [vmem:[#allocation19_spill] sm:$0xff] }
  0xcc   : > { %v747_v3 = vsel %vm4210_vm15, %v6997_v45, -3.4028235e+38  ;;  %v7042_v37 = vld [vmem:[#allocation21_spill] sm:$0xff]  ;;  %v7043_v14 = vld [vmem:[#allocation22_spill] sm:$0xff]  ;;  %v7044_v49 = vld [vmem:[#allocation23_spill] sm:$0xff]  ;;  %v764_v60 = vsel %vm265_vm6, %v732_v6, -inf }
  0xcd   : > { %v765_v13 = vsel %vm265_vm6, %v733_v22, -inf  ;;  %v773_v48 = vsel %vm265_vm6, %v734_v16, -inf  ;;  %v774_v57 = vsel %vm265_vm6, %v735_v5, -inf  ;;  %v782_v35 = vsel %vm265_vm6, %v736_v36, -inf }
  0xce   : > { %v766_v28 = vmax.f32 %v764_v60, %v765_v13  ;;  %v775_v21 = vmax.f32 %v773_v48, %v774_v57  ;;  %v783_v10 = vsel %vm265_vm6, %v737_v52, -inf  ;;  %v791_v12 = vsel %vm265_vm6, %v738_v9, -inf }
  0xcf   : > { %v792_v63 = vsel %vm265_vm6, %v739_v51, -inf  ;;  %v784_v53 = vmax.f32 %v782_v35, %v783_v10  ;;  %v800_v6 = vsel %vm265_vm6, %v740_v32, -inf  ;;  %v801_v60 = vsel %vm265_vm6, %v741_v56, -inf }
  0xd0   : > { %v767_v7 = vrot.slane %v766_v28, 4  ;;  %v793_v4 = vmax.f32 %v791_v12, %v792_v63  ;;  %v776_v22 = vrot.slane %v775_v21, 4  ;;  %v809_v16 = vsel %vm265_vm6, %v742_v2, -inf }
  0xd1   : > { %v810_v5 = vsel %vm265_vm6, %v743_v0, -inf  ;;  %v785_v57 = vrot.slane %v784_v53, 4  ;;  %v802_v52 = vmax.f32 %v800_v6, %v801_v60  ;;  %v818_v51 = vsel %vm265_vm6, %v744_v62, -inf }
  0xd2   : > { %v768_v36 = vmax.f32 %v766_v28, %v767_v7  ;;  %v794_v13 = vrot.slane %v793_v4, 4  ;;  %v777_v48 = vmax.f32 %v775_v21, %v776_v22  ;;  %v811_v9 = vmax.f32 %v809_v16, %v810_v5 }
  0xd3   : > { %v819_v35 = vsel %vm265_vm6, %v745_v33, -inf  ;;  %v786_v12 = vmax.f32 %v784_v53, %v785_v57  ;;  %v803_v10 = vrot.slane %v802_v52, 4  ;;  %v827_v2 = vsel %vm265_vm6, %v746_v1, -inf }
  0xd4   : > { %v769_v63 = vrot.slane %v768_v36, 2  ;;  %v795_v32 = vmax.f32 %v793_v4, %v794_v13  ;;  %v778_v59 = vrot.slane %v777_v48, 2  ;;  %v812_v56 = vrot.slane %v811_v9, 4 }
  0xd5   : > { %v820_v45 = vmax.f32 %v818_v51, %v819_v35  ;;  %v787_v7 = vrot.slane %v786_v12, 2  ;;  %v804_v61 = vmax.f32 %v802_v52, %v803_v10  ;;  %v828_v62 = vsel %vm265_vm6, %v747_v3, -inf }
  0xd6   : > { %v770_v0 = vmax.f32 %v768_v36, %v769_v63  ;;  %v796_v28 = vrot.slane %v795_v32, 2  ;;  %v779_v6 = vmax.f32 %v777_v48, %v778_v59  ;;  %v813_v21 = vmax.f32 %v811_v9, %v812_v56 }
  0xd7   : > { %v821_v22 = vrot.slane %v820_v45, 4  ;;  %v788_v33 = vmax.f32 %v786_v12, %v787_v7  ;;  %v805_v53 = vrot.slane %v804_v61, 2  ;;  %v829_v13 = vmax.f32 %v827_v2, %v828_v62 }
  0xd8   : > { %v771_v60 = vrot.slane %v770_v0, 1  ;;  %v797_v16 = vmax.f32 %v795_v32, %v796_v28  ;;  %v780_v4 = vrot.slane %v779_v6, 1  ;;  %v814_v5 = vrot.slane %v813_v21, 2 }
  0xd9   : > { %v822_v57 = vmax.f32 %v820_v45, %v821_v22  ;;  %v789_v1 = vrot.slane %v788_v33, 1  ;;  %v806_v35 = vmax.f32 %v804_v61, %v805_v53  ;;  %v830_v48 = vrot.slane %v829_v13, 4 }
  0xda   : > { %v4367_v51 = vmax.f32 %v770_v0, %v771_v60  ;;  %v798_v36 = vrot.slane %v797_v16, 1  ;;  %v4369_v63 = vmax.f32 %v779_v6, %v780_v4  ;;  %v815_v59 = vmax.f32 %v813_v21, %v814_v5  ;;  %v7051_v5 = vld [vmem:[#allocation10_spill] sm:$0xff] }
  0xdb   : > { %v823_v52 = vrot.slane %v822_v57, 2  ;;  %v4371_v9 = vmax.f32 %v788_v33, %v789_v1  ;;  %v807_v12 = vrot.slane %v806_v35, 1  ;;  %v7046_v45 = vsel %vm4192_vm12, %v3524_v39, -3.4028235e+38 }
  0xdc   : > { %v4373_v3 = vmax.f32 %v797_v16, %v798_v36  ;;  %v836_v32 = vsel %vm265_vm6, %v7046_v45, -inf  ;;  %v816_v10 = vrot.slane %v815_v59, 1  ;;  %v831_v56 = vmax.f32 %v829_v13, %v830_v48 }
  0xdd   : > { %v824_v61 = vmax.f32 %v822_v57, %v823_v52  ;;  %v7047_v2 = vsel %vm4210_vm15, %v3534_v41, -3.4028235e+38  ;;  %v4385_v7 = vmax.f32 %v806_v35, %v807_v12  ;;  %v7048_v6 = vsel %vm4192_vm12, %v3536_v42, -3.4028235e+38 }
  0xde   : > { %v837_v0 = vsel %vm265_vm6, %v7047_v2, -inf  ;;  %v845_v21 = vsel %vm265_vm6, %v7048_v6, -inf  ;;  %v7049_v22 = vsel %vm4210_vm15, %v3538_v43, -3.4028235e+38  ;;  %v4397_v60 = vmax.f32 %v815_v59, %v816_v10 }
  0xdf   : > { %v838_v28 = vmax.f32 %v836_v32, %v837_v0  ;;  %v846_v62 = vsel %vm265_vm6, %v7049_v22, -inf  ;;  %v825_v33 = vrot.slane %v824_v61, 1  ;;  %v832_v16 = vrot.slane %v831_v56, 2 }
  0xe0   : > { %v847_v53 = vmax.f32 %v845_v21, %v846_v62  ;;  %v7050_v4 = vstv %s4252_s10  ;;  %v7054_v13 = vstv %s4262_s11  ;;  %v7057_v35 = vsel %vm4192_vm12, %v3540_v44, -3.4028235e+38 }
  0xe1   : > { %vm4402_vm4 = vcmp.ge.s32.totalorder %v7051_v5, %v7050_v4  ;;  %vm4409_vm5 = vcmp.lt.s32.totalorder %v7051_v5, %v7054_v13  ;;  %v839_v36 = vrot.slane %v838_v28, 4  ;;  %v854_v59 = vsel %vm265_vm6, %v7057_v35, -inf }
  0xe2   : > { %v7058_v52 = vsel %vm4210_vm15, %v3549_v46, -3.4028235e+38  ;;  %v7059_v12 = vsel %vm4192_vm12, %v3551_v47, -3.4028235e+38  ;;  %v4428_v32 = vmax.f32 %v824_v61, %v825_v33  ;;  %v833_v10 = vmax.f32 %v831_v56, %v832_v16  ;;  %vm4490_vm9 = vmand %vm4402_vm4, %vm4409_vm5 }
  0xe3   : > { %v855_v48 = vsel %vm265_vm6, %v7058_v52, -inf  ;;  %v863_v45 = vsel %vm265_vm6, %v7059_v12, -inf  ;;  %v848_v2 = vrot.slane %v847_v53, 4  ;;  %v840_v6 = vmax.f32 %v838_v28, %v839_v36 }
  0xe4   : > { %v856_v0 = vmax.f32 %v854_v59, %v855_v48  ;;  %v7060_v21 = vsel %vm4210_vm15, %v7038_v40, -3.4028235e+38  ;;  %v7061_v62 = vsel %vm4192_vm12, %v7039_v27, -3.4028235e+38  ;;  %v7062_v61 = vsel %vm4210_vm15, %v7040_v55, -3.4028235e+38 }
  0xe5   : > { %v864_v22 = vsel %vm265_vm6, %v7060_v21, -inf  ;;  %v872_v4 = vsel %vm265_vm6, %v7061_v62, -inf  ;;  %v873_v56 = vsel %vm265_vm6, %v7062_v61, -inf  ;;  %v834_v33 = vrot.slane %v833_v10, 1 }
  0xe6   : > { %v849_v28 = vmax.f32 %v847_v53, %v848_v2  ;;  %v857_v16 = vrot.slane %v856_v0, 4  ;;  %v865_v13 = vmax.f32 %v863_v45, %v864_v22  ;;  %v841_v36 = vrot.slane %v840_v6, 2 }
  0xe7   : > { %v874_v35 = vmax.f32 %v872_v4, %v873_v56  ;;  %v7063_v59 = vsel %vm4192_vm12, %v7041_v50, -3.4028235e+38  ;;  %v7064_v48 = vsel %vm4210_vm15, %v7042_v37, -3.4028235e+38  ;;  %v4455_v21 = vmax.f32 %v833_v10, %v834_v33 }
  0xe8   : > { %v881_v52 = vsel %vm265_vm6, %v7063_v59, -inf  ;;  %v882_v12 = vsel %vm265_vm6, %v7064_v48, -inf  ;;  %v850_v53 = vrot.slane %v849_v28, 2  ;;  %v858_v45 = vmax.f32 %v856_v0, %v857_v16  ;;  %v7068_v16 = vld [vmem:[#allocation11_spill] sm:$0xff] }
  0xe9   : > { %v866_v2 = vrot.slane %v865_v13, 4  ;;  %v842_v22 = vmax.f32 %v840_v6, %v841_v36  ;;  %v875_v62 = vrot.slane %v874_v35, 4  ;;  %v883_v4 = vmax.f32 %v881_v52, %v882_v12 }
  0xea   : > { %v7065_v61 = vsel %vm4192_vm12, %v7043_v14, -3.4028235e+38  ;;  %v851_v59 = vmax.f32 %v849_v28, %v850_v53  ;;  %v859_v5 = vrot.slane %v858_v45, 2  ;;  %v7066_v10 = vsel %vm4210_vm15, %v7044_v49, -3.4028235e+38 }
  0xeb   : > { %v890_v56 = vsel %vm265_vm6, %v7065_v61, -inf  ;;  %v867_v50 = vmax.f32 %v865_v13, %v866_v2  ;;  %v891_v33 = vsel %vm265_vm6, %v7066_v10, -inf  ;;  %v7067_v0 = vstv %s4252_s10  ;;  %s6183_s10 = sld [smem:[#allocation5 + %s3891_s1]] }
  0xec   : > { %vm4470_vm7 = vcmp.ge.s32.totalorder %v7068_v16, %v7067_v0  ;;  %v7071_v36 = vstv %s4262_s11  ;;  %v843_v28 = vrot.slane %v842_v22, 1  ;;  %v876_v13 = vmax.f32 %v874_v35, %v875_v62  ;;  %s6186_s11 = sld [smem:[#allocation6 + %s3891_s1]] }
  0xed   : > { %vm4477_vm8 = vcmp.lt.s32.totalorder %v7068_v16, %v7071_v36  ;;  %v884_v48 = vrot.slane %v883_v4, 4  ;;  %v892_v12 = vmax.f32 %v890_v56, %v891_v33  ;;  %v852_v53 = vrot.slane %v851_v59, 1  ;;  %s6206_s1 = sld [smem:[#allocation5 + %s4226_s9]] }
  0xee   : > { %v860_v2 = vmax.f32 %v858_v45, %v859_v5  ;;  %v868_v61 = vrot.slane %v867_v50, 2  ;;  %v7074_v10 = vsel %vm4192_vm12, %v7045_v34, -3.4028235e+38  ;;  %v844_v49 = vmax.f32 %v842_v22, %v843_v28  ;;  %vm4536_vm12 = vmand %vm4470_vm7, %vm4477_vm8 }
  0xef   : > { %v899_v0 = vsel %vm265_vm6, %v7074_v10, -inf  ;;  %v877_v14 = vrot.slane %v876_v13, 2  ;;  %v885_v36 = vmax.f32 %v883_v4, %v884_v48  ;;  %v893_v16 = vrot.slane %v892_v12, 4 }
  0xf0   : > { %v853_v5 = vmax.f32 %v851_v59, %v852_v53  ;;  %v861_v45 = vrot.slane %v860_v2, 1  ;;  %v869_v54 = vmax.f32 %v867_v50, %v868_v61  ;;  %v7077_v62 = vsel %vm4210_vm15, %v3630_v15, -3.4028235e+38 }
  0xf1   : > { %v900_v22 = vsel %vm265_vm6, %v7077_v62, -inf  ;;  %v878_v56 = vmax.f32 %v876_v13, %v877_v14  ;;  %v886_v4 = vrot.slane %v885_v36, 2  ;;  %v894_v33 = vmax.f32 %v892_v12, %v893_v16 }
  0xf2   : > { %v901_v28 = vmax.f32 %v899_v0, %v900_v22  ;;  %v862_v1 = vmax.f32 %v860_v2, %v861_v45  ;;  %v870_v48 = vrot.slane %v869_v54, 1  ;;  %v7078_v57 = vstv %s4275_s12  ;;  %p2352_p11 = scmp.gt.s32.totalorder %s6186_s11, %s6183_s10 }
  0xf3   : > { %vm4501_vm10 = vcmp.eq.s32.totalorder %v7078_v57, 1  ;;  %v978_v50 = vsel %vm4490_vm9, %v3456_v11, -3.4028235e+38  ;;  %v879_v38 = vrot.slane %v878_v56, 1  ;;  %v887_v59 = vmax.f32 %v885_v36, %v886_v4 }
  0xf4   : > { %v895_v53 = vrot.slane %v894_v33, 2  ;;  %v902_v61 = vrot.slane %v901_v28, 4  ;;  %v871_v62 = vmax.f32 %v869_v54, %v870_v48  ;;  %v912_v14 = vsel %vm4501_vm10, %v4367_v51, 0.0  ;;  %s6211_s12 = scalar_select %p2352_p11, 1, 0 }
  0xf5   : > { %v913_v16 = vsel %vm4501_vm10, %v4369_v63, 0.0  ;;  %v914_v13 = vsel %vm4501_vm10, %v4371_v9, 0.0  ;;  %v880_v12 = vmax.f32 %v878_v56, %v879_v38  ;;  %v888_v2 = vrot.slane %v887_v59, 1 }
  0xf6   : > { %v896_v0 = vmax.f32 %v894_v33, %v895_v53  ;;  %v903_v45 = vmax.f32 %v901_v28, %v902_v61  ;;  %v915_v36 = vsel %vm4501_vm10, %v4373_v3, 0.0  ;;  %v916_v51 = vsel %vm4501_vm10, %v4385_v7, 0.0 }
  0xf7   : > { %v917_v63 = vsel %vm4501_vm10, %v4397_v60, 0.0  ;;  %v918_v9 = vsel %vm4501_vm10, %v4428_v32, 0.0  ;;  %v889_v54 = vmax.f32 %v887_v59, %v888_v2  ;;  %v919_v4 = vsel %vm4501_vm10, %v4455_v21, 0.0 }
  0xf8   : > { %v897_v22 = vrot.slane %v896_v0, 1  ;;  %v904_v56 = vrot.slane %v903_v45, 2  ;;  %v920_v7 = vsel %vm4501_vm10, %v844_v49, 0.0  ;;  %v921_v60 = vsel %vm4501_vm10, %v853_v5, 0.0 }
  0xf9   : > { %v922_v32 = vsel %vm4501_vm10, %v862_v1, 0.0  ;;  %v923_v21 = vsel %vm4501_vm10, %v871_v62, 0.0  ;;  %v924_v6 = vsel %vm4501_vm10, %v880_v12, 0.0  ;;  %v925_v49 = vsel %vm4501_vm10, %v889_v54, 0.0 }
  0xfa   : > { %v898_v52 = vmax.f32 %v896_v0, %v897_v22  ;;  %v905_v33 = vmax.f32 %v903_v45, %v904_v56  ;;  %v944_v28 = vsel %vm446_vm11, %v913_v16, %v912_v14  ;;  %v951_v5 = vsel %vm446_vm11, %v921_v60, %v920_v7 }
  0xfb   : > { %v979_v1 = vsel %vm4536_vm12, %v3475_v17, -3.4028235e+38  ;;  %v980_v48 = vsel %vm4490_vm9, %v3477_v18, -3.4028235e+38  ;;  %v945_v59 = vsel %vm448_vm13, %v914_v13, %v944_v28  ;;  %v952_v53 = vsel %vm448_vm13, %v922_v32, %v951_v5 }
  0xfc   : > { %v906_v57 = vrot.slane %v905_v33, 1  ;;  %v926_v38 = vsel %vm4501_vm10, %v898_v52, 0.0  ;;  %v946_v61 = vsel %vm450_vm14, %v915_v36, %v945_v59  ;;  %v953_v62 = vsel %vm450_vm14, %v923_v21, %v952_v53 }
  0xfd   : > { %v981_v14 = vsel %vm4536_vm12, %v3479_v19, -3.4028235e+38  ;;  %v982_v16 = vsel %vm4490_vm9, %v3481_v20, -3.4028235e+38  ;;  %v947_v12 = vsel %vm452_vm0, %v916_v51, %v946_v61  ;;  %v954_v2 = vsel %vm452_vm0, %v924_v6, %v953_v62 }
  0xfe   : > { %v907_v13 = vmax.f32 %v905_v33, %v906_v57  ;;  %v983_v0 = vsel %vm4536_vm12, %v3485_v23, -3.4028235e+38  ;;  %v948_v45 = vsel %vm454_vm1, %v917_v63, %v947_v12  ;;  %v955_v36 = vsel %vm454_vm1, %v925_v49, %v954_v2  ;;  %v7083_v33 = vld [vmem:[#allocation14_spill] sm:$0xff]  ;;  %v7084_v49 = vld [vmem:[#allocation15_spill] sm:$0xff] }
  0xff   : > { %v984_v54 = vsel %vm4490_vm9, %v3487_v24, -3.4028235e+38  ;;  %v985_v51 = vsel %vm4536_vm12, %v3489_v25, -3.4028235e+38  ;;  %v949_v56 = vsel %vm456_vm2, %v918_v9, %v948_v45  ;;  %v956_v7 = vsel %vm456_vm2, %v926_v38, %v955_v36  ;;  %v7085_v36 = vld [vmem:[#allocation20_spill] sm:$0xff] }
 0x100   : > { %v927_v22 = vsel %vm4501_vm10, %v907_v13, 0.0  ;;  %v986_v63 = vsel %vm4490_vm9, %v3491_v26, -3.4028235e+38  ;;  %v950_v60 = vsel %vm458_vm3, %v919_v4, %v949_v56  ;;  %v987_v21 = vsel %vm4536_vm12, %v3500_v29, -3.4028235e+38  ;;  %v7087_v13 = vld [vmem:[#allocation23_spill] sm:$0xff] }
 0x101   : > { %v957_v32 = vsel %vm458_vm3, %v927_v22, %v956_v7  ;;  %v988_v10 = vsel %vm4490_vm9, %v3502_v30, -3.4028235e+38  ;;  %961 = vst.msk [vmem:[#allocation2 + $0x20] sm:$0xff] %vm265_vm6, %v950_v60  ;;  %v989_v9 = vsel %vm4536_vm12, %v3504_v31, -3.4028235e+38  ;;  %v7086_v7 = vld [vmem:[#allocation22_spill] sm:$0xff] }
 0x102   : > { %962 = vst.msk [vmem:[#allocation2 + $0x28] sm:$0xff] %vm265_vm6, %v957_v32  ;;  %v990_v4 = vsel %vm4490_vm9, %v6994_v58, -3.4028235e+38  ;;  %v991_v52 = vsel %vm4536_vm12, %v6995_v8, -3.4028235e+38  ;;  %v1010_v60 = vsel %vm265_vm6, %v978_v50, -inf }
 0x103   : > { %v992_v6 = vsel %vm4490_vm9, %v7083_v33, -3.4028235e+38  ;;  %v1011_v32 = vsel %vm265_vm6, %v979_v1, -inf  ;;  %v1019_v56 = vsel %vm265_vm6, %v980_v48, -inf  ;;  %v1020_v12 = vsel %vm265_vm6, %v981_v14, -inf }
 0x104   : > { %v1012_v62 = vmax.f32 %v1010_v60, %v1011_v32  ;;  %v1021_v61 = vmax.f32 %v1019_v56, %v1020_v12  ;;  %v1028_v45 = vsel %vm265_vm6, %v982_v16, -inf  ;;  %v1029_v53 = vsel %vm265_vm6, %v983_v0, -inf }
 0x105   : > { %v1030_v22 = vmax.f32 %v1028_v45, %v1029_v53  ;;  %v1037_v2 = vsel %vm265_vm6, %v984_v54, -inf  ;;  %v1038_v59 = vsel %vm265_vm6, %v985_v51, -inf  ;;  %v1046_v38 = vsel %vm265_vm6, %v986_v63, -inf }
 0x106   : > { %v1013_v50 = vrot.slane %v1012_v62, 4  ;;  %v1022_v57 = vrot.slane %v1021_v61, 4  ;;  %v1039_v1 = vmax.f32 %v1037_v2, %v1038_v59  ;;  %v1047_v48 = vsel %vm265_vm6, %v987_v21, -inf }
 0x107   : > { %v1031_v5 = vrot.slane %v1030_v22, 4  ;;  %v1048_v14 = vmax.f32 %v1046_v38, %v1047_v48  ;;  %v1055_v12 = vsel %vm265_vm6, %v988_v10, -inf  ;;  %v1056_v16 = vsel %vm265_vm6, %v989_v9, -inf }
 0x108   : > { %v1014_v56 = vmax.f32 %v1012_v62, %v1013_v50  ;;  %v1023_v0 = vmax.f32 %v1021_v61, %v1022_v57  ;;  %v1040_v53 = vrot.slane %v1039_v1, 4  ;;  %v1057_v45 = vmax.f32 %v1055_v12, %v1056_v16 }
 0x109   : > { %v1032_v54 = vmax.f32 %v1030_v22, %v1031_v5  ;;  %v1049_v60 = vrot.slane %v1048_v14, 4  ;;  %v1064_v51 = vsel %vm265_vm6, %v990_v4, -inf  ;;  %v1065_v63 = vsel %vm265_vm6, %v991_v52, -inf }
 0x10a   : > { %v1015_v32 = vrot.slane %v1014_v56, 2  ;;  %v1024_v59 = vrot.slane %v1023_v0, 2  ;;  %v1041_v2 = vmax.f32 %v1039_v1, %v1040_v53  ;;  %v1058_v21 = vrot.slane %v1057_v45, 4 }
 0x10b   : > { %v1033_v28 = vrot.slane %v1032_v54, 2  ;;  %v1050_v38 = vmax.f32 %v1048_v14, %v1049_v60  ;;  %v1066_v48 = vmax.f32 %v1064_v51, %v1065_v63  ;;  %v1073_v10 = vsel %vm265_vm6, %v992_v6, -inf }
 0x10c   : > { %v1016_v9 = vmax.f32 %v1014_v56, %v1015_v32  ;;  %v1025_v62 = vmax.f32 %v1023_v0, %v1024_v59  ;;  %v1042_v57 = vrot.slane %v1041_v2, 2  ;;  %v1059_v61 = vmax.f32 %v1057_v45, %v1058_v21 }
 0x10d   : > { %v1034_v50 = vmax.f32 %v1032_v54, %v1033_v28  ;;  %v1051_v5 = vrot.slane %v1050_v38, 2  ;;  %v1067_v22 = vrot.slane %v1066_v48, 4  ;;  %v7088_v4 = vsel %vm4536_vm12, %v7084_v49, -3.4028235e+38 }
 0x10e   : > { %v1074_v52 = vsel %vm265_vm6, %v7088_v4, -inf  ;;  %v1017_v1 = vrot.slane %v1016_v9, 1  ;;  %v1026_v12 = vrot.slane %v1025_v62, 1  ;;  %v1043_v16 = vmax.f32 %v1041_v2, %v1042_v57 }
 0x10f   : > { %v1060_v14 = vrot.slane %v1059_v61, 2  ;;  %v1035_v53 = vrot.slane %v1034_v50, 1  ;;  %v1052_v60 = vmax.f32 %v1050_v38, %v1051_v5  ;;  %v1068_v6 = vmax.f32 %v1066_v48, %v1067_v22 }
 0x110   : > { %v1075_v56 = vmax.f32 %v1073_v10, %v1074_v52  ;;  %v4708_v0 = vmax.f32 %v1016_v9, %v1017_v1  ;;  %v4710_v45 = vmax.f32 %v1025_v62, %v1026_v12  ;;  %v1044_v28 = vrot.slane %v1043_v16, 1 }
 0x111   : > { %v1061_v54 = vmax.f32 %v1059_v61, %v1060_v14  ;;  %v4712_v51 = vmax.f32 %v1034_v50, %v1035_v53  ;;  %v1053_v63 = vrot.slane %v1052_v60, 1  ;;  %v1069_v32 = vrot.slane %v1068_v6, 2 }
 0x112   : > { %v1076_v59 = vrot.slane %v1075_v56, 4  ;;  %v4714_v21 = vmax.f32 %v1043_v16, %v1044_v28  ;;  %v7089_v2 = vsel %vm4490_vm9, %v3524_v39, -3.4028235e+38  ;;  %v7090_v48 = vsel %vm4536_vm12, %v3534_v41, -3.4028235e+38 }
 0x113   : > { %v1062_v4 = vrot.slane %v1061_v54, 1  ;;  %v1082_v38 = vsel %vm265_vm6, %v7089_v2, -inf  ;;  %v1083_v10 = vsel %vm265_vm6, %v7090_v48, -inf  ;;  %v4726_v9 = vmax.f32 %v1052_v60, %v1053_v63 }
 0x114   : > { %v1070_v62 = vmax.f32 %v1068_v6, %v1069_v32  ;;  %v1077_v57 = vmax.f32 %v1075_v56, %v1076_v59  ;;  %v1084_v61 = vmax.f32 %v1082_v38, %v1083_v10  ;;  %v7091_v5 = vsel %vm4490_vm9, %v3536_v42, -3.4028235e+38 }
 0x115   : > { %v4728_v50 = vmax.f32 %v1061_v54, %v1062_v4  ;;  %v1091_v22 = vsel %vm265_vm6, %v7091_v5, -inf  ;;  %v7092_v52 = vsel %vm4536_vm12, %v3538_v43, -3.4028235e+38  ;;  %v7093_v12 = vsel %vm4490_vm9, %v3540_v44, -3.4028235e+38 }
 0x116   : > { %v1092_v1 = vsel %vm265_vm6, %v7092_v52, -inf  ;;  %v1100_v16 = vsel %vm265_vm6, %v7093_v12, -inf  ;;  %v1071_v14 = vrot.slane %v1070_v62, 1  ;;  %v1078_v53 = vrot.slane %v1077_v57, 2 }
 0x117   : > { %v1085_v60 = vrot.slane %v1084_v61, 4  ;;  %v1093_v6 = vmax.f32 %v1091_v22, %v1092_v1  ;;  %v7094_v56 = vsel %vm4536_vm12, %v3549_v46, -3.4028235e+38  ;;  %v7095_v54 = vsel %vm4490_vm9, %v3551_v47, -3.4028235e+38 }
 0x118   : > { %v1101_v28 = vsel %vm265_vm6, %v7094_v56, -inf  ;;  %v1109_v63 = vsel %vm265_vm6, %v7095_v54, -inf  ;;  %v7096_v32 = vsel %vm4536_vm12, %v7038_v40, -3.4028235e+38  ;;  %v7097_v4 = vsel %vm4490_vm9, %v7039_v27, -3.4028235e+38 }
 0x119   : > { %v1110_v59 = vsel %vm265_vm6, %v7096_v32, -inf  ;;  %v1118_v2 = vsel %vm265_vm6, %v7097_v4, -inf  ;;  %v4765_v38 = vmax.f32 %v1070_v62, %v1071_v14  ;;  %v1079_v48 = vmax.f32 %v1077_v57, %v1078_v53 }
 0x11a   : > { %v1086_v10 = vmax.f32 %v1084_v61, %v1085_v60  ;;  %v1094_v5 = vrot.slane %v1093_v6, 4  ;;  %v1102_v22 = vmax.f32 %v1100_v16, %v1101_v28  ;;  %v1111_v52 = vmax.f32 %v1109_v63, %v1110_v59 }
 0x11b   : > { %v7098_v1 = vsel %vm4536_vm12, %v7040_v55, -3.4028235e+38  ;;  %v7099_v56 = vsel %vm4490_vm9, %v7085_v36, -3.4028235e+38  ;;  %v1080_v32 = vrot.slane %v1079_v48, 1 }
 0x11c   : > { %v1119_v12 = vsel %vm265_vm6, %v7098_v1, -inf  ;;  %v1127_v54 = vsel %vm265_vm6, %v7099_v56, -inf  ;;  %v1087_v62 = vrot.slane %v1086_v10, 2  ;;  %v1095_v57 = vmax.f32 %v1093_v6, %v1094_v5 }
 0x11d   : > { %v1120_v61 = vmax.f32 %v1118_v2, %v1119_v12  ;;  %v1103_v16 = vrot.slane %v1102_v22, 4  ;;  %v1112_v14 = vrot.slane %v1111_v52, 4  ;;  %v7100_v53 = vsel %vm4536_vm12, %v7042_v37, -3.4028235e+38 }
 0x11e   : > { %v1128_v60 = vsel %vm265_vm6, %v7100_v53, -inf  ;;  %v7101_v28 = vsel %vm4490_vm9, %v7086_v7, -3.4028235e+38  ;;  %v4787_v59 = vmax.f32 %v1079_v48, %v1080_v32  ;;  %v1088_v4 = vmax.f32 %v1086_v10, %v1087_v62  ;;  %v7104_v7 = vld [vmem:[#allocation10_spill] sm:$0xff] }
 0x11f   : > { %v1136_v63 = vsel %vm265_vm6, %v7101_v28, -inf  ;;  %v1096_v1 = vrot.slane %v1095_v57, 2  ;;  %v1121_v6 = vrot.slane %v1120_v61, 4  ;;  %v1104_v2 = vmax.f32 %v1102_v22, %v1103_v16 }
 0x120   : > { %v1113_v5 = vmax.f32 %v1111_v52, %v1112_v14  ;;  %v1129_v12 = vmax.f32 %v1127_v54, %v1128_v60  ;;  %v7102_v56 = vsel %vm4536_vm12, %v7087_v13, -3.4028235e+38  ;;  %v7103_v37 = vstv %s4591_s2  ;;  %v7112_v13 = vld [vmem:[#allocation11_spill] sm:$0xff] }
 0x121   : > { %v1137_v53 = vsel %vm265_vm6, %v7102_v56, -inf  ;;  %vm4797_vm15 = vcmp.ge.s32.totalorder %v7104_v7, %v7103_v37  ;;  %v7107_v48 = vstv %s4601_s3  ;;  %v1089_v22 = vrot.slane %v1088_v4, 1 }
 0x122   : > { %vm4804_vm4 = vcmp.lt.s32.totalorder %v7104_v7, %v7107_v48  ;;  %v1097_v52 = vmax.f32 %v1095_v57, %v1096_v1  ;;  %v1122_v54 = vmax.f32 %v1120_v61, %v1121_v6  ;;  %v1138_v32 = vmax.f32 %v1136_v63, %v1137_v53 }
 0x123   : > { %v1105_v62 = vrot.slane %v1104_v2, 2  ;;  %v1114_v16 = vrot.slane %v1113_v5, 2  ;;  %v1130_v14 = vrot.slane %v1129_v12, 4  ;;  %v7110_v37 = vsel %vm4490_vm9, %v7045_v34, -3.4028235e+38  ;;  %vm4866_vm9 = vmand %vm4797_vm15, %vm4804_vm4 }
 0x124   : > { %v1145_v60 = vsel %vm265_vm6, %v7110_v37, -inf  ;;  %v7111_v56 = vstv %s4591_s2  ;;  %v7115_v7 = vstv %s4601_s3  ;;  %v1090_v61 = vmax.f32 %v1088_v4, %v1089_v22  ;;  %s6294_s2 = sld [smem:[#allocation6 + %s4226_s9]] }
 0x125   : > { %vm4816_vm5 = vcmp.ge.s32.totalorder %v7112_v13, %v7111_v56  ;;  %vm4823_vm7 = vcmp.lt.s32.totalorder %v7112_v13, %v7115_v7  ;;  %v1098_v63 = vrot.slane %v1097_v52, 1  ;;  %v1123_v35 = vrot.slane %v1122_v54, 2  ;;  %s6411_s9 = sld [smem:[#allocation5 + %s4565_s13]] }
 0x126   : > { %v1139_v1 = vrot.slane %v1138_v32, 4  ;;  %v1106_v6 = vmax.f32 %v1104_v2, %v1105_v62  ;;  %v1115_v53 = vmax.f32 %v1113_v5, %v1114_v16  ;;  %v1131_v37 = vmax.f32 %v1129_v12, %v1130_v14  ;;  %vm4884_vm10 = vmand %vm4816_vm5, %vm4823_vm7 }
 0x127   : > { %v7118_v56 = vsel %vm4536_vm12, %v3630_v15, -3.4028235e+38  ;;  %v1099_v36 = vmax.f32 %v1097_v52, %v1098_v63  ;;  %v1124_v55 = vmax.f32 %v1122_v54, %v1123_v35  ;;  %v7119_v4 = vstv %s4614_s14  ;;  %s6429_s14 = sld [smem:[#allocation6 + %s4565_s13]] }
 0x128   : > { %v1146_v34 = vsel %vm265_vm6, %v7118_v56, -inf  ;;  %v1140_v7 = vmax.f32 %v1138_v32, %v1139_v1  ;;  %v1107_v27 = vrot.slane %v1106_v6, 1  ;;  %v1116_v40 = vrot.slane %v1115_v53, 1  ;;  %s6450_s13 = sld [smem:[#allocation5 + %s4900_s15]] }
 0x129   : > { %v1147_v13 = vmax.f32 %v1145_v60, %v1146_v34  ;;  %v1132_v47 = vrot.slane %v1131_v37, 2  ;;  %vm4834_vm8 = vcmp.eq.s32.totalorder %v7119_v4, 1  ;;  %v1125_v2 = vrot.slane %v1124_v55, 1 }
 0x12a   : > { %v1141_v5 = vrot.slane %v1140_v7, 2  ;;  %v1158_v3 = vsel %vm4834_vm8, %v4708_v0, 0.0  ;;  %v1108_v62 = vmax.f32 %v1106_v6, %v1107_v27  ;;  %v1117_v52 = vmax.f32 %v1115_v53, %v1116_v40  ;;  %p2501_p12 = scmp.gt.s32.totalorder %s6294_s2, %s6206_s1 }
 0x12b   : > { %v1148_v12 = vrot.slane %v1147_v13, 4  ;;  %v1133_v54 = vmax.f32 %v1131_v37, %v1132_v47  ;;  %v1159_v34 = vsel %vm4834_vm8, %v4710_v45, 0.0  ;;  %v1126_v32 = vmax.f32 %v1124_v55, %v1125_v2 }
 0x12c   : > { %v1142_v16 = vmax.f32 %v1140_v7, %v1141_v5  ;;  %v1160_v60 = vsel %vm4834_vm8, %v4712_v51, 0.0  ;;  %v1161_v35 = vsel %vm4834_vm8, %v4714_v21, 0.0  ;;  %v1162_v47 = vsel %vm4834_vm8, %v4726_v9, 0.0  ;;  %s2502_s3 = scalar_select %p2501_p12, 1, 0 }
 0x12d   : > { %v1149_v14 = vmax.f32 %v1147_v13, %v1148_v12  ;;  %v1134_v63 = vrot.slane %v1133_v54, 1  ;;  %v1163_v40 = vsel %vm4834_vm8, %v4728_v50, 0.0  ;;  %v1164_v13 = vsel %vm4834_vm8, %v4765_v38, 0.0  ;;  %p2650_p13 = scmp.gt.s32.totalorder %s6429_s14, %s6411_s9 }
 0x12e   : > { %v1143_v27 = vrot.slane %v1142_v16, 1  ;;  %v1165_v0 = vsel %vm4834_vm8, %v4787_v59, 0.0  ;;  %v1166_v21 = vsel %vm4834_vm8, %v1090_v61, 0.0  ;;  %v1167_v9 = vsel %vm4834_vm8, %v1099_v36, 0.0 }
 0x12f   : > { %v1150_v55 = vrot.slane %v1149_v14, 2  ;;  %v1135_v51 = vmax.f32 %v1133_v54, %v1134_v63  ;;  %v1168_v50 = vsel %vm4834_vm8, %v1108_v62, 0.0  ;;  %v1169_v28 = vsel %vm4834_vm8, %v1117_v52, 0.0 }
 0x130   : > { %v1144_v38 = vmax.f32 %v1142_v16, %v1143_v27  ;;  %v1170_v10 = vsel %vm4834_vm8, %v1126_v32, 0.0  ;;  %v1190_v1 = vsel %vm446_vm11, %v1159_v34, %v1158_v3  ;;  %v1197_v6 = vsel %vm446_vm11, %v1167_v9, %v1166_v21 }
 0x131   : > { %v1151_v59 = vmax.f32 %v1149_v14, %v1150_v55  ;;  %v1171_v36 = vsel %vm4834_vm8, %v1135_v51, 0.0  ;;  %v1224_v53 = vsel %vm4866_vm9, %v3456_v11, -3.4028235e+38  ;;  %v1191_v48 = vsel %vm448_vm13, %v1160_v60, %v1190_v1 }
 0x132   : > { %v1172_v57 = vsel %vm4834_vm8, %v1144_v38, 0.0  ;;  %v1198_v56 = vsel %vm448_vm13, %v1168_v50, %v1197_v6  ;;  %v1192_v7 = vsel %vm450_vm14, %v1161_v35, %v1191_v48  ;;  %v1225_v2 = vsel %vm4884_vm10, %v3475_v17, -3.4028235e+38  ;;  %v7126_v6 = vld [vmem:[#allocation16_spill] sm:$0xff] }
 0x133   : > { %v1152_v37 = vrot.slane %v1151_v59, 1  ;;  %v1199_v4 = vsel %vm450_vm14, %v1169_v28, %v1198_v56  ;;  %v1226_v5 = vsel %vm4866_vm9, %v3477_v18, -3.4028235e+38  ;;  %v1193_v3 = vsel %vm452_vm0, %v1162_v47, %v1192_v7  ;;  %v7128_v7 = vld [vmem:[#allocation18_spill] sm:$0xff]  ;;  %v7134_v48 = vld [vmem:[#allocation24_spill] sm:$0xff] }
 0x134   : > { %v1200_v62 = vsel %vm452_vm0, %v1170_v10, %v1199_v4  ;;  %v1227_v52 = vsel %vm4884_vm10, %v3479_v19, -3.4028235e+38  ;;  %v1194_v54 = vsel %vm454_vm1, %v1163_v40, %v1193_v3  ;;  %v1228_v32 = vsel %vm4866_vm9, %v3481_v20, -3.4028235e+38 }
 0x135   : > { %v1153_v12 = vmax.f32 %v1151_v59, %v1152_v37  ;;  %v1201_v34 = vsel %vm454_vm1, %v1171_v36, %v1200_v62  ;;  %v1229_v16 = vsel %vm4884_vm10, %v3485_v23, -3.4028235e+38  ;;  %v1195_v60 = vsel %vm456_vm2, %v1164_v13, %v1194_v54  ;;  %v7130_v62 = vld [vmem:[#allocation20_spill] sm:$0xff] }
 0x136   : > { %v1202_v63 = vsel %vm456_vm2, %v1172_v57, %v1201_v34  ;;  %v1230_v35 = vsel %vm4866_vm9, %v3487_v24, -3.4028235e+38  ;;  %v1196_v47 = vsel %vm458_vm3, %v1165_v0, %v1195_v60  ;;  %v1231_v27 = vsel %vm4884_vm10, %v3489_v25, -3.4028235e+38  ;;  %v7127_v57 = vld [vmem:[#allocation17_spill] sm:$0xff] }
 0x137   : > { %v1173_v14 = vsel %vm4834_vm8, %v1153_v12, 0.0  ;;  %v1232_v22 = vsel %vm4866_vm9, %v3491_v26, -3.4028235e+38  ;;  %1207 = vst.msk [vmem:[#allocation2 + $0x30] sm:$0xff] %vm265_vm6, %v1196_v47  ;;  %v1233_v55 = vsel %vm4884_vm10, %v3500_v29, -3.4028235e+38 }
 0x138   : > { %v1203_v40 = vsel %vm458_vm3, %v1173_v14, %v1202_v63  ;;  %v1234_v13 = vsel %vm4866_vm9, %v3502_v30, -3.4028235e+38  ;;  %v1235_v0 = vsel %vm4884_vm10, %v3504_v31, -3.4028235e+38  ;;  %v1236_v51 = vsel %vm4866_vm9, %v6994_v58, -3.4028235e+38 }
 0x139   : > { %1208 = vst.msk [vmem:[#allocation2 + $0x38] sm:$0xff] %vm265_vm6, %v1203_v40  ;;  %v1237_v21 = vsel %vm4884_vm10, %v6995_v8, -3.4028235e+38  ;;  %v1238_v9 = vsel %vm4866_vm9, %v7083_v33, -3.4028235e+38  ;;  %v7129_v12 = vld [vmem:[#allocation19_spill] sm:$0xff] }
 0x13a   : > { %v1239_v50 = vsel %vm4884_vm10, %v7084_v49, -3.4028235e+38  ;;  %v7131_v14 = vld [vmem:[#allocation21_spill] sm:$0xff]  ;;  %v7132_v63 = vld [vmem:[#allocation22_spill] sm:$0xff]  ;;  %v7133_v40 = vld [vmem:[#allocation23_spill] sm:$0xff]  ;;  %v1256_v37 = vsel %vm265_vm6, %v1224_v53, -inf }
 0x13b   : > { %v1257_v60 = vsel %vm265_vm6, %v1225_v2, -inf  ;;  %v1265_v47 = vsel %vm265_vm6, %v1226_v5, -inf  ;;  %v1266_v36 = vsel %vm265_vm6, %v1227_v52, -inf  ;;  %v1274_v56 = vsel %vm265_vm6, %v1228_v32, -inf }
 0x13c   : > { %v1258_v1 = vmax.f32 %v1256_v37, %v1257_v60  ;;  %v1267_v4 = vmax.f32 %v1265_v47, %v1266_v36  ;;  %v1275_v34 = vsel %vm265_vm6, %v1229_v16, -inf  ;;  %v1283_v3 = vsel %vm265_vm6, %v1230_v35, -inf }
 0x13d   : > { %v1284_v10 = vsel %vm265_vm6, %v1231_v27, -inf  ;;  %v1276_v54 = vmax.f32 %v1274_v56, %v1275_v34  ;;  %v1292_v53 = vsel %vm265_vm6, %v1232_v22, -inf  ;;  %v1293_v37 = vsel %vm265_vm6, %v1233_v55, -inf }
 0x13e   : > { %v1259_v28 = vrot.slane %v1258_v1, 4  ;;  %v1285_v59 = vmax.f32 %v1283_v3, %v1284_v10  ;;  %v1268_v2 = vrot.slane %v1267_v4, 4  ;;  %v1301_v5 = vsel %vm265_vm6, %v1234_v13, -inf }
 0x13f   : > { %v1302_v52 = vsel %vm265_vm6, %v1235_v0, -inf  ;;  %v1277_v36 = vrot.slane %v1276_v54, 4  ;;  %v1294_v16 = vmax.f32 %v1292_v53, %v1293_v37  ;;  %v1310_v27 = vsel %vm265_vm6, %v1236_v51, -inf }
 0x140   : > { %v1260_v32 = vmax.f32 %v1258_v1, %v1259_v28  ;;  %v1286_v60 = vrot.slane %v1285_v59, 4  ;;  %v1269_v47 = vmax.f32 %v1267_v4, %v1268_v2  ;;  %v1303_v35 = vmax.f32 %v1301_v5, %v1302_v52 }
 0x141   : > { %v1311_v56 = vsel %vm265_vm6, %v1237_v21, -inf  ;;  %v1278_v3 = vmax.f32 %v1276_v54, %v1277_v36  ;;  %v1295_v34 = vrot.slane %v1294_v16, 4  ;;  %v1319_v13 = vsel %vm265_vm6, %v1238_v9, -inf }
 0x142   : > { %v1261_v10 = vrot.slane %v1260_v32, 2  ;;  %v1287_v22 = vmax.f32 %v1285_v59, %v1286_v60  ;;  %v1270_v38 = vrot.slane %v1269_v47, 2  ;;  %v1304_v55 = vrot.slane %v1303_v35, 4 }
 0x143   : > { %v1312_v49 = vmax.f32 %v1310_v27, %v1311_v56  ;;  %v1279_v28 = vrot.slane %v1278_v3, 2  ;;  %v1296_v33 = vmax.f32 %v1294_v16, %v1295_v34  ;;  %v1320_v51 = vsel %vm265_vm6, %v1239_v50, -inf }
 0x144   : > { %v1262_v0 = vmax.f32 %v1260_v32, %v1261_v10  ;;  %v1288_v1 = vrot.slane %v1287_v22, 2  ;;  %v1271_v53 = vmax.f32 %v1269_v47, %v1270_v38  ;;  %v1305_v4 = vmax.f32 %v1303_v35, %v1304_v55 }
 0x145   : > { %v1313_v2 = vrot.slane %v1312_v49, 4  ;;  %v1280_v21 = vmax.f32 %v1278_v3, %v1279_v28  ;;  %v1297_v54 = vrot.slane %v1296_v33, 2  ;;  %v1321_v60 = vmax.f32 %v1319_v13, %v1320_v51 }
 0x146   : > { %v1263_v37 = vrot.slane %v1262_v0, 1  ;;  %v1289_v5 = vmax.f32 %v1287_v22, %v1288_v1  ;;  %v1272_v59 = vrot.slane %v1271_v53, 1  ;;  %v1306_v52 = vrot.slane %v1305_v4, 2 }
 0x147   : > { %v1314_v36 = vmax.f32 %v1312_v49, %v1313_v2  ;;  %v1281_v9 = vrot.slane %v1280_v21, 1  ;;  %v1298_v56 = vmax.f32 %v1296_v33, %v1297_v54  ;;  %v1322_v47 = vrot.slane %v1321_v60, 4 }
 0x148   : > { %v5041_v27 = vmax.f32 %v1262_v0, %v1263_v37  ;;  %v1290_v32 = vrot.slane %v1289_v5, 1  ;;  %v5043_v10 = vmax.f32 %v1271_v53, %v1272_v59  ;;  %v1307_v38 = vmax.f32 %v1305_v4, %v1306_v52  ;;  %v7140_v52 = vld [vmem:[#allocation10_spill] sm:$0xff] }
 0x149   : > { %v1315_v16 = vrot.slane %v1314_v36, 2  ;;  %v5045_v35 = vmax.f32 %v1280_v21, %v1281_v9  ;;  %v1299_v3 = vrot.slane %v1298_v56, 1  ;;  %v7135_v49 = vsel %vm4866_vm9, %v3524_v39, -3.4028235e+38 }
 0x14a   : > { %v5047_v50 = vmax.f32 %v1289_v5, %v1290_v32  ;;  %v1328_v22 = vsel %vm265_vm6, %v7135_v49, -inf  ;;  %v1308_v34 = vrot.slane %v1307_v38, 1  ;;  %v1323_v55 = vmax.f32 %v1321_v60, %v1322_v47 }
 0x14b   : > { %v1316_v33 = vmax.f32 %v1314_v36, %v1315_v16  ;;  %v7136_v13 = vsel %vm4884_vm10, %v3534_v41, -3.4028235e+38  ;;  %v5059_v28 = vmax.f32 %v1298_v56, %v1299_v3  ;;  %v7137_v53 = vsel %vm4866_vm9, %v3536_v42, -3.4028235e+38 }
 0x14c   : > { %v1329_v0 = vsel %vm265_vm6, %v7136_v13, -inf  ;;  %v1337_v4 = vsel %vm265_vm6, %v7137_v53, -inf  ;;  %v7138_v2 = vsel %vm4884_vm10, %v3538_v43, -3.4028235e+38  ;;  %v5071_v37 = vmax.f32 %v1307_v38, %v1308_v34 }
 0x14d   : > { %v1330_v1 = vmax.f32 %v1328_v22, %v1329_v0  ;;  %v1338_v51 = vsel %vm265_vm6, %v7138_v2, -inf  ;;  %v1317_v21 = vrot.slane %v1316_v33, 1  ;;  %v1324_v5 = vrot.slane %v1323_v55, 2 }
 0x14e   : > { %v1339_v54 = vmax.f32 %v1337_v4, %v1338_v51  ;;  %v7139_v59 = vstv %s4926_s16  ;;  %v7143_v60 = vstv %s4936_s17  ;;  %v7146_v56 = vsel %vm4866_vm9, %v3540_v44, -3.4028235e+38 }
 0x14f   : > { %vm5076_vm12 = vcmp.ge.s32.totalorder %v7140_v52, %v7139_v59  ;;  %vm5083_vm15 = vcmp.lt.s32.totalorder %v7140_v52, %v7143_v60  ;;  %v1331_v32 = vrot.slane %v1330_v1, 4  ;;  %v1346_v38 = vsel %vm265_vm6, %v7146_v56, -inf }
 0x150   : > { %v7147_v16 = vsel %vm4884_vm10, %v3549_v46, -3.4028235e+38  ;;  %v7148_v3 = vsel %vm4866_vm9, %v7126_v6, -3.4028235e+38  ;;  %v5102_v22 = vmax.f32 %v1316_v33, %v1317_v21  ;;  %v1325_v34 = vmax.f32 %v1323_v55, %v1324_v5  ;;  %vm5164_vm7 = vmand %vm5076_vm12, %vm5083_vm15 }
 0x151   : > { %v1347_v47 = vsel %vm265_vm6, %v7147_v16, -inf  ;;  %v1355_v49 = vsel %vm265_vm6, %v7148_v3, -inf  ;;  %v1340_v13 = vrot.slane %v1339_v54, 4  ;;  %v1332_v53 = vmax.f32 %v1330_v1, %v1331_v32 }
 0x152   : > { %v1348_v0 = vmax.f32 %v1346_v38, %v1347_v47  ;;  %v7149_v4 = vsel %vm4884_vm10, %v7127_v57, -3.4028235e+38  ;;  %v7150_v51 = vsel %vm4866_vm9, %v7128_v7, -3.4028235e+38  ;;  %v7151_v33 = vsel %vm4884_vm10, %v7129_v12, -3.4028235e+38 }
 0x153   : > { %v1356_v2 = vsel %vm265_vm6, %v7149_v4, -inf  ;;  %v1364_v59 = vsel %vm265_vm6, %v7150_v51, -inf  ;;  %v1365_v55 = vsel %vm265_vm6, %v7151_v33, -inf  ;;  %v1326_v21 = vrot.slane %v1325_v34, 1 }
 0x154   : > { %v1341_v1 = vmax.f32 %v1339_v54, %v1340_v13  ;;  %v1349_v5 = vrot.slane %v1348_v0, 4  ;;  %v1357_v60 = vmax.f32 %v1355_v49, %v1356_v2  ;;  %v1333_v32 = vrot.slane %v1332_v53, 2 }
 0x155   : > { %v1366_v56 = vmax.f32 %v1364_v59, %v1365_v55  ;;  %v7152_v38 = vsel %vm4866_vm9, %v7130_v62, -3.4028235e+38  ;;  %v7153_v47 = vsel %vm4884_vm10, %v7131_v14, -3.4028235e+38  ;;  %v5129_v4 = vmax.f32 %v1325_v34, %v1326_v21 }
 0x156   : > { %v1373_v16 = vsel %vm265_vm6, %v7152_v38, -inf  ;;  %v1374_v3 = vsel %vm265_vm6, %v7153_v47, -inf  ;;  %v1342_v54 = vrot.slane %v1341_v1, 2  ;;  %v1350_v49 = vmax.f32 %v1348_v0, %v1349_v5  ;;  %v7157_v5 = vld [vmem:[#allocation11_spill] sm:$0xff] }
 0x157   : > { %v1358_v13 = vrot.slane %v1357_v60, 4  ;;  %v1334_v2 = vmax.f32 %v1332_v53, %v1333_v32  ;;  %v1367_v51 = vrot.slane %v1366_v56, 4  ;;  %v1375_v59 = vmax.f32 %v1373_v16, %v1374_v3 }
 0x158   : > { %v7154_v33 = vsel %vm4866_vm9, %v7132_v63, -3.4028235e+38  ;;  %v1343_v38 = vmax.f32 %v1341_v1, %v1342_v54  ;;  %v1351_v52 = vrot.slane %v1350_v49, 2  ;;  %v7155_v34 = vsel %vm4884_vm10, %v7133_v40, -3.4028235e+38 }
 0x159   : > { %v1382_v55 = vsel %vm265_vm6, %v7154_v33, -inf  ;;  %v1359_v62 = vmax.f32 %v1357_v60, %v1358_v13  ;;  %v1383_v21 = vsel %vm265_vm6, %v7155_v34, -inf  ;;  %v7156_v0 = vstv %s4926_s16  ;;  %s6460_s16 = scalar_select %p2650_p13, 1, 0 }
 0x15a   : > { %vm5144_vm4 = vcmp.ge.s32.totalorder %v7157_v5, %v7156_v0  ;;  %v7160_v32 = vstv %s4936_s17  ;;  %v1335_v1 = vrot.slane %v1334_v2, 1  ;;  %v1368_v60 = vmax.f32 %v1366_v56, %v1367_v51  ;;  %s6568_s17 = sld [smem:[#allocation6 + %s4900_s15]] }
 0x15b   : > { %vm5151_vm5 = vcmp.lt.s32.totalorder %v7157_v5, %v7160_v32  ;;  %v1376_v47 = vrot.slane %v1375_v59, 4  ;;  %v1384_v3 = vmax.f32 %v1382_v55, %v1383_v21  ;;  %v1344_v54 = vrot.slane %v1343_v38, 1 }
 0x15c   : > { %v1352_v13 = vmax.f32 %v1350_v49, %v1351_v52  ;;  %v1360_v33 = vrot.slane %v1359_v62, 2  ;;  %v7163_v34 = vsel %vm4866_vm9, %v7134_v48, -3.4028235e+38  ;;  %v1336_v40 = vmax.f32 %v1334_v2, %v1335_v1  ;;  %vm5210_vm9 = vmand %vm5144_vm4, %vm5151_vm5 }
 0x15d   : > { %v1391_v0 = vsel %vm265_vm6, %v7163_v34, -inf  ;;  %v1369_v63 = vrot.slane %v1368_v60, 2  ;;  %v1377_v32 = vmax.f32 %v1375_v59, %v1376_v47  ;;  %v1385_v5 = vrot.slane %v1384_v3, 4 }
 0x15e   : > { %v1345_v52 = vmax.f32 %v1343_v38, %v1344_v54  ;;  %v1353_v49 = vrot.slane %v1352_v13, 1  ;;  %v1361_v45 = vmax.f32 %v1359_v62, %v1360_v33  ;;  %v7166_v51 = vsel %vm4884_vm10, %v3630_v15, -3.4028235e+38 }
 0x15f   : > { %v1392_v2 = vsel %vm265_vm6, %v7166_v51, -inf  ;;  %v1370_v55 = vmax.f32 %v1368_v60, %v1369_v63  ;;  %v1378_v59 = vrot.slane %v1377_v32, 2  ;;  %v1386_v21 = vmax.f32 %v1384_v3, %v1385_v5 }
 0x160   : > { %v1393_v1 = vmax.f32 %v1391_v0, %v1392_v2  ;;  %v1354_v9 = vmax.f32 %v1352_v13, %v1353_v49  ;;  %v1362_v47 = vrot.slane %v1361_v45, 1  ;;  %v7167_v36 = vstv %s4949_s19  ;;  %p2799_p0 = scmp.gt.s32.totalorder %s6568_s17, %s6450_s13  ;;  %s6697_s19 = sld [smem:[#allocation5 + %s5239_s21]] }
 0x161   : > { %vm5175_vm8 = vcmp.eq.s32.totalorder %v7167_v36, 1  ;;  %v1470_v62 = vsel %vm5164_vm7, %v3456_v11, -3.4028235e+38  ;;  %v1371_v61 = vrot.slane %v1370_v55, 1  ;;  %v1379_v38 = vmax.f32 %v1377_v32, %v1378_v59 }
 0x162   : > { %v1387_v54 = vrot.slane %v1386_v21, 2  ;;  %v1394_v33 = vrot.slane %v1393_v1, 4  ;;  %v1363_v51 = vmax.f32 %v1361_v45, %v1362_v47  ;;  %v1404_v63 = vsel %vm5175_vm8, %v5041_v27, 0.0  ;;  %s6633_s15 = scalar_select %p2799_p0, 1, 0 }
 0x163   : > { %v1405_v5 = vsel %vm5175_vm8, %v5043_v10, 0.0  ;;  %v1406_v60 = vsel %vm5175_vm8, %v5045_v35, 0.0  ;;  %v1372_v3 = vmax.f32 %v1370_v55, %v1371_v61  ;;  %v1380_v13 = vrot.slane %v1379_v38, 1 }
 0x164   : > { %v1388_v0 = vmax.f32 %v1386_v21, %v1387_v54  ;;  %v1395_v49 = vmax.f32 %v1393_v1, %v1394_v33  ;;  %v1407_v32 = vsel %vm5175_vm8, %v5047_v50, 0.0  ;;  %v1408_v27 = vsel %vm5175_vm8, %v5059_v28, 0.0 }
 0x165   : > { %v1409_v10 = vsel %vm5175_vm8, %v5071_v37, 0.0  ;;  %v1410_v35 = vsel %vm5175_vm8, %v5102_v22, 0.0  ;;  %v1381_v45 = vmax.f32 %v1379_v38, %v1380_v13  ;;  %v1411_v59 = vsel %vm5175_vm8, %v5129_v4, 0.0 }
 0x166   : > { %v1389_v2 = vrot.slane %v1388_v0, 1  ;;  %v1396_v55 = vrot.slane %v1395_v49, 2  ;;  %v1412_v28 = vsel %vm5175_vm8, %v1336_v40, 0.0  ;;  %v1413_v37 = vsel %vm5175_vm8, %v1345_v52, 0.0 }
 0x167   : > { %v1414_v22 = vsel %vm5175_vm8, %v1354_v9, 0.0  ;;  %v1415_v4 = vsel %vm5175_vm8, %v1363_v51, 0.0  ;;  %v1416_v53 = vsel %vm5175_vm8, %v1372_v3, 0.0  ;;  %v1417_v40 = vsel %vm5175_vm8, %v1381_v45, 0.0 }
 0x168   : > { %v1390_v16 = vmax.f32 %v1388_v0, %v1389_v2  ;;  %v1397_v21 = vmax.f32 %v1395_v49, %v1396_v55  ;;  %v1436_v1 = vsel %vm446_vm11, %v1405_v5, %v1404_v63  ;;  %v1443_v52 = vsel %vm446_vm11, %v1413_v37, %v1412_v28 }
 0x169   : > { %v1471_v9 = vsel %vm5210_vm9, %v3475_v17, -3.4028235e+38  ;;  %v1472_v47 = vsel %vm5164_vm7, %v3477_v18, -3.4028235e+38  ;;  %v1437_v38 = vsel %vm448_vm13, %v1406_v60, %v1436_v1  ;;  %v1444_v54 = vsel %vm448_vm13, %v1414_v22, %v1443_v52 }
 0x16a   : > { %v1398_v36 = vrot.slane %v1397_v21, 1  ;;  %v1418_v61 = vsel %vm5175_vm8, %v1390_v16, 0.0  ;;  %v1438_v33 = vsel %vm450_vm14, %v1407_v32, %v1437_v38  ;;  %v1445_v51 = vsel %vm450_vm14, %v1415_v4, %v1444_v54 }
 0x16b   : > { %v1473_v63 = vsel %vm5210_vm9, %v3479_v19, -3.4028235e+38  ;;  %v1474_v5 = vsel %vm5164_vm7, %v3481_v20, -3.4028235e+38  ;;  %v1439_v3 = vsel %vm452_vm0, %v1408_v27, %v1438_v33  ;;  %v1446_v13 = vsel %vm452_vm0, %v1416_v53, %v1445_v51 }
 0x16c   : > { %v1399_v60 = vmax.f32 %v1397_v21, %v1398_v36  ;;  %v1475_v0 = vsel %vm5210_vm9, %v3485_v23, -3.4028235e+38  ;;  %v1440_v49 = vsel %vm454_vm1, %v1409_v10, %v1439_v3  ;;  %v1447_v32 = vsel %vm454_vm1, %v1417_v40, %v1446_v13  ;;  %v7172_v21 = vld [vmem:[#allocation14_spill] sm:$0xff]  ;;  %v7173_v40 = vld [vmem:[#allocation15_spill] sm:$0xff] }
 0x16d   : > { %v1476_v45 = vsel %vm5164_vm7, %v3487_v24, -3.4028235e+38  ;;  %v1477_v27 = vsel %vm5210_vm9, %v3489_v25, -3.4028235e+38  ;;  %v1441_v55 = vsel %vm456_vm2, %v1410_v35, %v1440_v49  ;;  %v1448_v28 = vsel %vm456_vm2, %v1418_v61, %v1447_v32  ;;  %v7174_v32 = vld [vmem:[#allocation20_spill] sm:$0xff] }
 0x16e   : > { %v1419_v2 = vsel %vm5175_vm8, %v1399_v60, 0.0  ;;  %v1478_v10 = vsel %vm5164_vm7, %v3491_v26, -3.4028235e+38  ;;  %v1442_v37 = vsel %vm458_vm3, %v1411_v59, %v1441_v55  ;;  %v1479_v4 = vsel %vm5210_vm9, %v3500_v29, -3.4028235e+38  ;;  %v7176_v60 = vld [vmem:[#allocation23_spill] sm:$0xff] }
 0x16f   : > { %v1449_v22 = vsel %vm458_vm3, %v1419_v2, %v1448_v28  ;;  %v1480_v34 = vsel %vm5164_vm7, %v3502_v30, -3.4028235e+38  ;;  %1453 = vst.msk [vmem:[#allocation2 + $0x40] sm:$0xff] %vm265_vm6, %v1442_v37  ;;  %v1481_v35 = vsel %vm5210_vm9, %v3504_v31, -3.4028235e+38  ;;  %v7175_v28 = vld [vmem:[#allocation22_spill] sm:$0xff] }
 0x170   : > { %1454 = vst.msk [vmem:[#allocation2 + $0x48] sm:$0xff] %vm265_vm6, %v1449_v22  ;;  %v1482_v59 = vsel %vm5164_vm7, %v6994_v58, -3.4028235e+38  ;;  %v1483_v16 = vsel %vm5210_vm9, %v6995_v8, -3.4028235e+38  ;;  %v1502_v37 = vsel %vm265_vm6, %v1470_v62, -inf }
 0x171   : > { %v1484_v53 = vsel %vm5164_vm7, %v7172_v21, -3.4028235e+38  ;;  %v1503_v22 = vsel %vm265_vm6, %v1471_v9, -inf  ;;  %v1511_v55 = vsel %vm265_vm6, %v1472_v47, -inf  ;;  %v1512_v3 = vsel %vm265_vm6, %v1473_v63, -inf }
 0x172   : > { %v1504_v51 = vmax.f32 %v1502_v37, %v1503_v22  ;;  %v1513_v33 = vmax.f32 %v1511_v55, %v1512_v3  ;;  %v1520_v49 = vsel %vm265_vm6, %v1474_v5, -inf  ;;  %v1521_v54 = vsel %vm265_vm6, %v1475_v0, -inf }
 0x173   : > { %v1522_v2 = vmax.f32 %v1520_v49, %v1521_v54  ;;  %v1529_v13 = vsel %vm265_vm6, %v1476_v45, -inf  ;;  %v1530_v38 = vsel %vm265_vm6, %v1477_v27, -inf  ;;  %v1538_v61 = vsel %vm265_vm6, %v1478_v10, -inf }
 0x174   : > { %v1505_v62 = vrot.slane %v1504_v51, 4  ;;  %v1514_v36 = vrot.slane %v1513_v33, 4  ;;  %v1531_v9 = vmax.f32 %v1529_v13, %v1530_v38  ;;  %v1539_v47 = vsel %vm265_vm6, %v1479_v4, -inf }
 0x175   : > { %v1523_v52 = vrot.slane %v1522_v2, 4  ;;  %v1540_v63 = vmax.f32 %v1538_v61, %v1539_v47  ;;  %v1547_v3 = vsel %vm265_vm6, %v1480_v34, -inf  ;;  %v1548_v5 = vsel %vm265_vm6, %v1481_v35, -inf }
 0x176   : > { %v1506_v55 = vmax.f32 %v1504_v51, %v1505_v62  ;;  %v1515_v0 = vmax.f32 %v1513_v33, %v1514_v36  ;;  %v1532_v54 = vrot.slane %v1531_v9, 4  ;;  %v1549_v49 = vmax.f32 %v1547_v3, %v1548_v5 }
 0x177   : > { %v1524_v45 = vmax.f32 %v1522_v2, %v1523_v52  ;;  %v1541_v37 = vrot.slane %v1540_v63, 4  ;;  %v1556_v27 = vsel %vm265_vm6, %v1482_v59, -inf  ;;  %v1557_v10 = vsel %vm265_vm6, %v1483_v16, -inf }
 0x178   : > { %v1507_v22 = vrot.slane %v1506_v55, 2  ;;  %v1516_v38 = vrot.slane %v1515_v0, 2  ;;  %v1533_v13 = vmax.f32 %v1531_v9, %v1532_v54  ;;  %v1550_v4 = vrot.slane %v1549_v49, 4 }
 0x179   : > { %v1525_v1 = vrot.slane %v1524_v45, 2  ;;  %v1542_v61 = vmax.f32 %v1540_v63, %v1541_v37  ;;  %v1558_v47 = vmax.f32 %v1556_v27, %v1557_v10  ;;  %v1565_v34 = vsel %vm265_vm6, %v1484_v53, -inf }
 0x17a   : > { %v1508_v35 = vmax.f32 %v1506_v55, %v1507_v22  ;;  %v1517_v51 = vmax.f32 %v1515_v0, %v1516_v38  ;;  %v1534_v36 = vrot.slane %v1533_v13, 2  ;;  %v1551_v33 = vmax.f32 %v1549_v49, %v1550_v4 }
 0x17b   : > { %v1526_v62 = vmax.f32 %v1524_v45, %v1525_v1  ;;  %v1543_v52 = vrot.slane %v1542_v61, 2  ;;  %v1559_v2 = vrot.slane %v1558_v47, 4  ;;  %v7177_v59 = vsel %vm5210_vm9, %v7173_v40, -3.4028235e+38 }
 0x17c   : > { %v1566_v16 = vsel %vm265_vm6, %v7177_v59, -inf  ;;  %v1509_v9 = vrot.slane %v1508_v35, 1  ;;  %v1518_v3 = vrot.slane %v1517_v51, 1  ;;  %v1535_v5 = vmax.f32 %v1533_v13, %v1534_v36 }
 0x17d   : > { %v1552_v63 = vrot.slane %v1551_v33, 2  ;;  %v1527_v54 = vrot.slane %v1526_v62, 1  ;;  %v1544_v37 = vmax.f32 %v1542_v61, %v1543_v52  ;;  %v1560_v53 = vmax.f32 %v1558_v47, %v1559_v2 }
 0x17e   : > { %v1567_v55 = vmax.f32 %v1565_v34, %v1566_v16  ;;  %v5382_v0 = vmax.f32 %v1508_v35, %v1509_v9  ;;  %v5384_v49 = vmax.f32 %v1517_v51, %v1518_v3  ;;  %v1536_v1 = vrot.slane %v1535_v5, 1 }
 0x17f   : > { %v1553_v45 = vmax.f32 %v1551_v33, %v1552_v63  ;;  %v5386_v27 = vmax.f32 %v1526_v62, %v1527_v54  ;;  %v1545_v10 = vrot.slane %v1544_v37, 1  ;;  %v1561_v22 = vrot.slane %v1560_v53, 2 }
 0x180   : > { %v1568_v38 = vrot.slane %v1567_v55, 4  ;;  %v5388_v4 = vmax.f32 %v1535_v5, %v1536_v1  ;;  %v7178_v13 = vsel %vm5164_vm7, %v3524_v39, -3.4028235e+38  ;;  %v7179_v47 = vsel %vm5210_vm9, %v3534_v41, -3.4028235e+38 }
 0x181   : > { %v1554_v59 = vrot.slane %v1553_v45, 1  ;;  %v1574_v61 = vsel %vm265_vm6, %v7178_v13, -inf  ;;  %v1575_v34 = vsel %vm265_vm6, %v7179_v47, -inf  ;;  %v5400_v35 = vmax.f32 %v1544_v37, %v1545_v10 }
 0x182   : > { %v1562_v51 = vmax.f32 %v1560_v53, %v1561_v22  ;;  %v1569_v36 = vmax.f32 %v1567_v55, %v1568_v38  ;;  %v1576_v33 = vmax.f32 %v1574_v61, %v1575_v34  ;;  %v7180_v52 = vsel %vm5164_vm7, %v3536_v42, -3.4028235e+38 }
 0x183   : > { %v5402_v62 = vmax.f32 %v1553_v45, %v1554_v59  ;;  %v1583_v2 = vsel %vm265_vm6, %v7180_v52, -inf  ;;  %v7181_v16 = vsel %vm5210_vm9, %v3538_v43, -3.4028235e+38  ;;  %v7182_v3 = vsel %vm5164_vm7, %v3540_v44, -3.4028235e+38 }
 0x184   : > { %v1584_v9 = vsel %vm265_vm6, %v7181_v16, -inf  ;;  %v1592_v5 = vsel %vm265_vm6, %v7182_v3, -inf  ;;  %v1563_v63 = vrot.slane %v1562_v51, 1  ;;  %v1570_v54 = vrot.slane %v1569_v36, 2 }
 0x185   : > { %v1577_v37 = vrot.slane %v1576_v33, 4  ;;  %v1585_v53 = vmax.f32 %v1583_v2, %v1584_v9  ;;  %v7183_v55 = vsel %vm5210_vm9, %v3549_v46, -3.4028235e+38  ;;  %v7184_v45 = vsel %vm5164_vm7, %v7126_v6, -3.4028235e+38 }
 0x186   : > { %v1593_v1 = vsel %vm265_vm6, %v7183_v55, -inf  ;;  %v1601_v10 = vsel %vm265_vm6, %v7184_v45, -inf  ;;  %v7185_v22 = vsel %vm5210_vm9, %v7127_v57, -3.4028235e+38  ;;  %v7186_v59 = vsel %vm5164_vm7, %v7128_v7, -3.4028235e+38 }
 0x187   : > { %v1602_v38 = vsel %vm265_vm6, %v7185_v22, -inf  ;;  %v1610_v13 = vsel %vm265_vm6, %v7186_v59, -inf  ;;  %v5439_v61 = vmax.f32 %v1562_v51, %v1563_v63  ;;  %v1571_v47 = vmax.f32 %v1569_v36, %v1570_v54 }
 0x188   : > { %v1578_v34 = vmax.f32 %v1576_v33, %v1577_v37  ;;  %v1586_v52 = vrot.slane %v1585_v53, 4  ;;  %v1594_v2 = vmax.f32 %v1592_v5, %v1593_v1  ;;  %v1603_v16 = vmax.f32 %v1601_v10, %v1602_v38 }
 0x189   : > { %v7187_v9 = vsel %vm5210_vm9, %v7129_v12, -3.4028235e+38  ;;  %v7188_v55 = vsel %vm5164_vm7, %v7174_v32, -3.4028235e+38  ;;  %v1572_v22 = vrot.slane %v1571_v47, 1 }
 0x18a   : > { %v1611_v3 = vsel %vm265_vm6, %v7187_v9, -inf  ;;  %v1619_v45 = vsel %vm265_vm6, %v7188_v55, -inf  ;;  %v1579_v51 = vrot.slane %v1578_v34, 2  ;;  %v1587_v36 = vmax.f32 %v1585_v53, %v1586_v52 }
 0x18b   : > { %v1612_v33 = vmax.f32 %v1610_v13, %v1611_v3  ;;  %v1595_v5 = vrot.slane %v1594_v2, 4  ;;  %v1604_v63 = vrot.slane %v1603_v16, 4  ;;  %v7189_v54 = vsel %vm5210_vm9, %v7131_v14, -3.4028235e+38 }
 0x18c   : > { %v1620_v37 = vsel %vm265_vm6, %v7189_v54, -inf  ;;  %v7190_v1 = vsel %vm5164_vm7, %v7175_v28, -3.4028235e+38  ;;  %v5461_v38 = vmax.f32 %v1571_v47, %v1572_v22  ;;  %v1580_v59 = vmax.f32 %v1578_v34, %v1579_v51  ;;  %v7193_v28 = vld [vmem:[#allocation10_spill] sm:$0xff] }
 0x18d   : > { %v1628_v10 = vsel %vm265_vm6, %v7190_v1, -inf  ;;  %v1588_v9 = vrot.slane %v1587_v36, 2  ;;  %v1613_v53 = vrot.slane %v1612_v33, 4  ;;  %v1596_v13 = vmax.f32 %v1594_v2, %v1595_v5 }
 0x18e   : > { %v1605_v52 = vmax.f32 %v1603_v16, %v1604_v63  ;;  %v1621_v3 = vmax.f32 %v1619_v45, %v1620_v37  ;;  %v7191_v55 = vsel %vm5210_vm9, %v7176_v60, -3.4028235e+38  ;;  %v7192_v14 = vstv %s5265_s22  ;;  %v7201_v60 = vld [vmem:[#allocation11_spill] sm:$0xff] }
 0x18f   : > { %v1629_v54 = vsel %vm265_vm6, %v7191_v55, -inf  ;;  %vm5471_vm10 = vcmp.ge.s32.totalorder %v7193_v28, %v7192_v14  ;;  %v7196_v47 = vstv %s5275_s23  ;;  %v1581_v2 = vrot.slane %v1580_v59, 1 }
 0x190   : > { %vm5478_vm12 = vcmp.lt.s32.totalorder %v7193_v28, %v7196_v47  ;;  %v1589_v16 = vmax.f32 %v1587_v36, %v1588_v9  ;;  %v1614_v45 = vmax.f32 %v1612_v33, %v1613_v53  ;;  %v1630_v22 = vmax.f32 %v1628_v10, %v1629_v54 }
 0x191   : > { %v1597_v51 = vrot.slane %v1596_v13, 2  ;;  %v1606_v5 = vrot.slane %v1605_v52, 2  ;;  %v1622_v63 = vrot.slane %v1621_v3, 4  ;;  %v7199_v14 = vsel %vm5164_vm7, %v7134_v48, -3.4028235e+38  ;;  %vm5546_vm7 = vmand %vm5471_vm10, %vm5478_vm12 }
 0x192   : > { %v1637_v37 = vsel %vm265_vm6, %v7199_v14, -inf  ;;  %v7200_v55 = vstv %s5265_s22  ;;  %v7204_v28 = vstv %s5275_s23  ;;  %v1582_v33 = vmax.f32 %v1580_v59, %v1581_v2  ;;  %s6712_s22 = sld [smem:[#allocation6 + %s5239_s21]] }
 0x193   : > { %vm5490_vm15 = vcmp.ge.s32.totalorder %v7201_v60, %v7200_v55  ;;  %vm5497_vm4 = vcmp.lt.s32.totalorder %v7201_v60, %v7204_v28  ;;  %v1590_v10 = vrot.slane %v1589_v16, 1  ;;  %v1615_v56 = vrot.slane %v1614_v45, 2 }
 0x194   : > { %v1631_v9 = vrot.slane %v1630_v22, 4  ;;  %v1598_v53 = vmax.f32 %v1596_v13, %v1597_v51  ;;  %v1607_v54 = vmax.f32 %v1605_v52, %v1606_v5  ;;  %v1623_v14 = vmax.f32 %v1621_v3, %v1622_v63  ;;  %vm5564_vm8 = vmand %vm5490_vm15, %vm5497_vm4 }
 0x195   : > { %v7207_v55 = vsel %vm5210_vm9, %v3630_v15, -3.4028235e+38  ;;  %v1591_v32 = vmax.f32 %v1589_v16, %v1590_v10  ;;  %v1616_v12 = vmax.f32 %v1614_v45, %v1615_v56  ;;  %v7208_v59 = vstv %s5288_s24 }
 0x196   : > { %v1638_v48 = vsel %vm265_vm6, %v7207_v55, -inf  ;;  %v1632_v28 = vmax.f32 %v1630_v22, %v1631_v9  ;;  %v1599_v7 = vrot.slane %v1598_v53, 1  ;;  %v1608_v57 = vrot.slane %v1607_v54, 1 }
 0x197   : > { %v1639_v60 = vmax.f32 %v1637_v37, %v1638_v48  ;;  %v1624_v6 = vrot.slane %v1623_v14, 2  ;;  %vm5508_vm5 = vcmp.eq.s32.totalorder %v7208_v59, 1  ;;  %v1617_v13 = vrot.slane %v1616_v12, 1 }
 0x198   : > { %v1633_v52 = vrot.slane %v1632_v28, 2  ;;  %v1650_v3 = vsel %vm5508_vm5, %v5382_v0, 0.0  ;;  %v1600_v16 = vmax.f32 %v1598_v53, %v1599_v7  ;;  %v1609_v45 = vmax.f32 %v1607_v54, %v1608_v57  ;;  %p2948_p1 = scmp.gt.s32.totalorder %s6712_s22, %s6697_s19 }
 0x199   : > { %v1640_v50 = vrot.slane %v1639_v60, 4  ;;  %v1625_v48 = vmax.f32 %v1623_v14, %v1624_v6  ;;  %v1651_v22 = vsel %vm5508_vm5, %v5384_v49, 0.0  ;;  %v1618_v51 = vmax.f32 %v1616_v12, %v1617_v13 }
 0x19a   : > { %v1634_v5 = vmax.f32 %v1632_v28, %v1633_v52  ;;  %v1652_v37 = vsel %vm5508_vm5, %v5386_v27, 0.0  ;;  %v1653_v56 = vsel %vm5508_vm5, %v5388_v4, 0.0  ;;  %v1654_v6 = vsel %vm5508_vm5, %v5400_v35, 0.0  ;;  %s6822_s21 = scalar_select %p2948_p1, 1, 0 }
 0x19b   : > { %v1641_v63 = vmax.f32 %v1639_v60, %v1640_v50  ;;  %v1626_v10 = vrot.slane %v1625_v48, 1  ;;  %v1655_v57 = vsel %vm5508_vm5, %v5402_v62, 0.0  ;;  %v1656_v60 = vsel %vm5508_vm5, %v5439_v61, 0.0 }
 0x19c   : > { %v1635_v7 = vrot.slane %v1634_v5, 1  ;;  %v1657_v0 = vsel %vm5508_vm5, %v5461_v38, 0.0  ;;  %v1658_v4 = vsel %vm5508_vm5, %v1582_v33, 0.0  ;;  %v1659_v35 = vsel %vm5508_vm5, %v1591_v32, 0.0 }
 0x19d   : > { %v1642_v12 = vrot.slane %v1641_v63, 2  ;;  %v1627_v27 = vmax.f32 %v1625_v48, %v1626_v10  ;;  %v1660_v62 = vsel %vm5508_vm5, %v1600_v16, 0.0  ;;  %v1661_v34 = vsel %vm5508_vm5, %v1609_v45, 0.0 }
 0x19e   : > { %v1636_v61 = vmax.f32 %v1634_v5, %v1635_v7  ;;  %v1662_v1 = vsel %vm5508_vm5, %v1618_v51, 0.0  ;;  %v1682_v9 = vsel %vm446_vm11, %v1651_v22, %v1650_v3  ;;  %v1689_v53 = vsel %vm446_vm11, %v1659_v35, %v1658_v4 }
 0x19f   : > { %v1643_v38 = vmax.f32 %v1641_v63, %v1642_v12  ;;  %v1663_v32 = vsel %vm5508_vm5, %v1627_v27, 0.0  ;;  %v1716_v36 = vsel %vm5546_vm7, %v3456_v11, -3.4028235e+38  ;;  %v1683_v14 = vsel %vm448_vm13, %v1652_v37, %v1682_v9  ;;  %v7216_v27 = vld [vmem:[#allocation17_spill] sm:$0xff] }
 0x1a0   : > { %v1664_v47 = vsel %vm5508_vm5, %v1636_v61, 0.0  ;;  %v1690_v55 = vsel %vm448_vm13, %v1660_v62, %v1689_v53  ;;  %v1684_v28 = vsel %vm450_vm14, %v1653_v56, %v1683_v14  ;;  %v1717_v13 = vsel %vm5564_vm8, %v3475_v17, -3.4028235e+38  ;;  %v7217_v62 = vld [vmem:[#allocation18_spill] sm:$0xff]  ;;  %v7220_v53 = vld [vmem:[#allocation21_spill] sm:$0xff] }
 0x1a1   : > { %v1644_v54 = vrot.slane %v1643_v38, 1  ;;  %v1691_v59 = vsel %vm450_vm14, %v1661_v34, %v1690_v55  ;;  %v1718_v11 = vsel %vm5546_vm7, %v3477_v18, -3.4028235e+38  ;;  %v1685_v50 = vsel %vm452_vm0, %v1654_v6, %v1684_v28  ;;  %v7222_v55 = vld [vmem:[#allocation23_spill] sm:$0xff] }
 0x1a2   : > { %v1692_v3 = vsel %vm452_vm0, %v1662_v1, %v1691_v59  ;;  %v1719_v16 = vsel %vm5564_vm8, %v3479_v19, -3.4028235e+38  ;;  %v1686_v17 = vsel %vm454_vm1, %v1655_v57, %v1685_v50  ;;  %v1720_v45 = vsel %vm5546_vm7, %v3481_v20, -3.4028235e+38  ;;  %v7219_v1 = vld [vmem:[#allocation20_spill] sm:$0xff] }
 0x1a3   : > { %v1645_v52 = vmax.f32 %v1643_v38, %v1644_v54  ;;  %v1693_v18 = vsel %vm454_vm1, %v1663_v32, %v1692_v3  ;;  %v1721_v48 = vsel %vm5564_vm8, %v3485_v23, -3.4028235e+38  ;;  %v1687_v22 = vsel %vm456_vm2, %v1656_v60, %v1686_v17  ;;  %v7215_v60 = vld [vmem:[#allocation16_spill] sm:$0xff]  ;;  %v7218_v38 = vld [vmem:[#allocation19_spill] sm:$0xff] }
 0x1a4   : > { %v1694_v51 = vsel %vm456_vm2, %v1664_v47, %v1693_v18  ;;  %v1722_v5 = vsel %vm5546_vm7, %v3487_v24, -3.4028235e+38  ;;  %v1688_v20 = vsel %vm458_vm3, %v1657_v0, %v1687_v22  ;;  %v1723_v2 = vsel %vm5564_vm8, %v3489_v25, -3.4028235e+38  ;;  %v7221_v47 = vld [vmem:[#allocation22_spill] sm:$0xff] }
 0x1a5   : > { %v1665_v19 = vsel %vm5508_vm5, %v1645_v52, 0.0  ;;  %v1724_v63 = vsel %vm5546_vm7, %v3491_v26, -3.4028235e+38  ;;  %1699 = vst.msk [vmem:[#allocation2 + $0x50] sm:$0xff] %vm265_vm6, %v1688_v20  ;;  %v1725_v24 = vsel %vm5564_vm8, %v3500_v29, -3.4028235e+38  ;;  %v1963_v6 = vstv %s5531_s25 }
 0x1a6   : > { %v1695_v23 = vsel %vm458_vm3, %v1665_v19, %v1694_v51  ;;  %v1726_v25 = vsel %vm5546_vm7, %v3502_v30, -3.4028235e+38  ;;  %v1727_v26 = vsel %vm5564_vm8, %v3504_v31, -3.4028235e+38  ;;  %v1728_v37 = vsel %vm5546_vm7, %v6994_v58, -3.4028235e+38 }
 0x1a7   : > { %1700 = vst.msk [vmem:[#allocation2 + $0x58] sm:$0xff] %vm265_vm6, %v1695_v23  ;;  %v1729_v10 = vsel %vm5564_vm8, %v6995_v8, -3.4028235e+38  ;;  %v1730_v29 = vsel %vm5546_vm7, %v7172_v21, -3.4028235e+38  ;;  %v1966_v7 = vstv %s5534_s26  ;;  %v7223_v52 = vld [vmem:[#allocation24_spill] sm:$0xff] }
 0x1a8   : > { %v1731_v30 = vsel %vm5564_vm8, %v7173_v40, -3.4028235e+38  ;;  %v1732_v31 = vsel %vm5546_vm7, %v3524_v39, -3.4028235e+38  ;;  %v1733_v58 = vsel %vm5564_vm8, %v3534_v41, -3.4028235e+38 }
 0x1a9   : > { %v1734_v8 = vsel %vm5546_vm7, %v3536_v42, -3.4028235e+38  ;;  %v1735_v21 = vsel %vm5564_vm8, %v3538_v43, -3.4028235e+38  ;;  %v1736_v57 = vsel %vm5546_vm7, %v3540_v44, -3.4028235e+38 }
 0x1aa   : > { %v1737_v12 = vsel %vm5564_vm8, %v3549_v46, -3.4028235e+38  ;;  %v1738_v0 = vsel %vm5546_vm7, %v7215_v60, -3.4028235e+38  ;;  %v1739_v4 = vsel %vm5564_vm8, %v7216_v27, -3.4028235e+38 }
 0x1ab   : > { %v1740_v61 = vsel %vm5546_vm7, %v7217_v62, -3.4028235e+38  ;;  %v1741_v34 = vsel %vm5564_vm8, %v7218_v38, -3.4028235e+38  ;;  %v1742_v32 = vsel %vm5546_vm7, %v7219_v1, -3.4028235e+38 }
 0x1ac   : > { %v1748_v17 = vsel %vm265_vm6, %v1716_v36, -inf  ;;  %v1749_v18 = vsel %vm265_vm6, %v1717_v13, -inf  ;;  %v1757_v22 = vsel %vm265_vm6, %v1718_v11, -inf  ;;  %v1758_v51 = vsel %vm265_vm6, %v1719_v16, -inf }
 0x1ad   : > { %v1750_v19 = vmax.f32 %v1748_v17, %v1749_v18  ;;  %v1766_v20 = vsel %vm265_vm6, %v1720_v45, -inf  ;;  %v1759_v23 = vmax.f32 %v1757_v22, %v1758_v51  ;;  %v1767_v35 = vsel %vm265_vm6, %v1721_v48, -inf }
 0x1ae   : > { %v1775_v59 = vsel %vm265_vm6, %v1722_v5, -inf  ;;  %v1776_v9 = vsel %vm265_vm6, %v1723_v2, -inf  ;;  %v1768_v3 = vmax.f32 %v1766_v20, %v1767_v35  ;;  %v1784_v36 = vsel %vm265_vm6, %v1724_v63, -inf }
 0x1af   : > { %v1751_v56 = vrot.slane %v1750_v19, 4  ;;  %v1777_v50 = vmax.f32 %v1775_v59, %v1776_v9  ;;  %v1760_v13 = vrot.slane %v1759_v23, 4  ;;  %v1785_v17 = vsel %vm265_vm6, %v1725_v24, -inf }
 0x1b0   : > { %v1793_v11 = vsel %vm265_vm6, %v1726_v25, -inf  ;;  %v1794_v16 = vsel %vm265_vm6, %v1727_v26, -inf  ;;  %v1769_v18 = vrot.slane %v1768_v3, 4  ;;  %v1786_v48 = vmax.f32 %v1784_v36, %v1785_v17 }
 0x1b1   : > { %v1752_v45 = vmax.f32 %v1750_v19, %v1751_v56  ;;  %v1778_v22 = vrot.slane %v1777_v50, 4  ;;  %v1761_v51 = vmax.f32 %v1759_v23, %v1760_v13  ;;  %v1795_v5 = vmax.f32 %v1793_v11, %v1794_v16 }
 0x1b2   : > { %v1802_v2 = vsel %vm265_vm6, %v1728_v37, -inf  ;;  %v1803_v35 = vsel %vm265_vm6, %v1729_v10, -inf  ;;  %v1770_v59 = vmax.f32 %v1768_v3, %v1769_v18  ;;  %v1787_v20 = vrot.slane %v1786_v48, 4 }
 0x1b3   : > { %v1753_v9 = vrot.slane %v1752_v45, 2  ;;  %v1779_v63 = vmax.f32 %v1777_v50, %v1778_v22  ;;  %v1762_v28 = vrot.slane %v1761_v51, 2  ;;  %v1796_v24 = vrot.slane %v1795_v5, 4 }
 0x1b4   : > { %v1804_v14 = vmax.f32 %v1802_v2, %v1803_v35  ;;  %v1811_v25 = vsel %vm265_vm6, %v1730_v29, -inf  ;;  %v1771_v56 = vrot.slane %v1770_v59, 2  ;;  %v1788_v54 = vmax.f32 %v1786_v48, %v1787_v20 }
 0x1b5   : > { %v1754_v26 = vmax.f32 %v1752_v45, %v1753_v9  ;;  %v1780_v19 = vrot.slane %v1779_v63, 2  ;;  %v1763_v36 = vmax.f32 %v1761_v51, %v1762_v28  ;;  %v1797_v23 = vmax.f32 %v1795_v5, %v1796_v24 }
 0x1b6   : > { %v1805_v13 = vrot.slane %v1804_v14, 4  ;;  %v1812_v37 = vsel %vm265_vm6, %v1731_v30, -inf  ;;  %v1772_v50 = vmax.f32 %v1770_v59, %v1771_v56  ;;  %v1789_v17 = vrot.slane %v1788_v54, 2 }
 0x1b7   : > { %v1755_v10 = vrot.slane %v1754_v26, 1  ;;  %v1781_v3 = vmax.f32 %v1779_v63, %v1780_v19  ;;  %v1764_v11 = vrot.slane %v1763_v36, 1  ;;  %v1798_v16 = vrot.slane %v1797_v23, 2  ;;  %v7224_v19 = vld [vmem:[#allocation10_spill] sm:$0xff] }
 0x1b8   : > { %v1806_v29 = vmax.f32 %v1804_v14, %v1805_v13  ;;  %v1813_v45 = vmax.f32 %v1811_v25, %v1812_v37  ;;  %v1773_v22 = vrot.slane %v1772_v50, 1  ;;  %v1790_v48 = vmax.f32 %v1788_v54, %v1789_v17 }
 0x1b9   : > { %v5732_v18 = vmax.f32 %v1754_v26, %v1755_v10  ;;  %v1782_v28 = vrot.slane %v1781_v3, 1  ;;  %v5734_v51 = vmax.f32 %v1763_v36, %v1764_v11  ;;  %v1799_v5 = vmax.f32 %v1797_v23, %v1798_v16 }
 0x1ba   : > { %v1807_v2 = vrot.slane %v1806_v29, 2  ;;  %v1814_v40 = vrot.slane %v1813_v45, 4  ;;  %v5736_v35 = vmax.f32 %v1772_v50, %v1773_v22  ;;  %v1791_v9 = vrot.slane %v1790_v48, 1 }
 0x1bb   : > { %v5738_v30 = vmax.f32 %v1781_v3, %v1782_v28  ;;  %v1820_v14 = vsel %vm265_vm6, %v1732_v31, -inf  ;;  %v1800_v59 = vrot.slane %v1799_v5, 1  ;;  %v1821_v20 = vsel %vm265_vm6, %v1733_v58, -inf }
 0x1bc   : > { %v1808_v54 = vmax.f32 %v1806_v29, %v1807_v2  ;;  %v1815_v63 = vmax.f32 %v1813_v45, %v1814_v40  ;;  %v5750_v24 = vmax.f32 %v1790_v48, %v1791_v9  ;;  %v1822_v25 = vmax.f32 %v1820_v14, %v1821_v20  ;;  %v7232_v9 = vld [vmem:[#allocation11_spill] sm:$0xff] }
 0x1bd   : > { %v1829_v39 = vsel %vm265_vm6, %v1734_v8, -inf  ;;  %v1830_v31 = vsel %vm265_vm6, %v1735_v21, -inf  ;;  %v5762_v26 = vmax.f32 %v1799_v5, %v1800_v59  ;;  %vm5767_vm9 = vcmp.ge.s32.totalorder %v7224_v19, %v1963_v6  ;;  %v5923_v14 = vld [vmem:[#allocation2 + $0x18] sm:$0xff] }
 0x1be   : > { %v1809_v41 = vrot.slane %v1808_v54, 1  ;;  %v1816_v56 = vrot.slane %v1815_v63, 2  ;;  %v1831_v58 = vmax.f32 %v1829_v39, %v1830_v31  ;;  %vm5774_vm10 = vcmp.lt.s32.totalorder %v7224_v19, %v1966_v7 }
 0x1bf   : > { %v1823_v43 = vrot.slane %v1822_v25, 4  ;;  %v1838_v8 = vsel %vm265_vm6, %v1736_v57, -inf  ;;  %v1839_v21 = vsel %vm265_vm6, %v1737_v12, -inf  ;;  %v1847_v23 = vsel %vm265_vm6, %v1738_v0, -inf  ;;  %vm5857_vm4 = vmand %vm5767_vm9, %vm5774_vm10 }
 0x1c0   : > { %v5793_v13 = vmax.f32 %v1808_v54, %v1809_v41  ;;  %v1817_v37 = vmax.f32 %v1815_v63, %v1816_v56  ;;  %v1832_v10 = vrot.slane %v1831_v58, 4  ;;  %v1840_v50 = vmax.f32 %v1838_v8, %v1839_v21 }
 0x1c1   : > { %v1824_v44 = vmax.f32 %v1822_v25, %v1823_v43  ;;  %v1848_v46 = vsel %vm265_vm6, %v1739_v4, -inf  ;;  %v1856_v57 = vsel %vm265_vm6, %v1740_v61, -inf  ;;  %v1857_v12 = vsel %vm265_vm6, %v1741_v34, -inf  ;;  %v5851_v43 = vld [vmem:[#allocation2] sm:$0xff] }
 0x1c2   : > { %v1818_v60 = vrot.slane %v1817_v37, 1  ;;  %v1833_v0 = vmax.f32 %v1831_v58, %v1832_v10  ;;  %v1841_v3 = vrot.slane %v1840_v50, 4  ;;  %v1849_v17 = vmax.f32 %v1847_v23, %v1848_v46 }
 0x1c3   : > { %v1825_v11 = vrot.slane %v1824_v44, 2  ;;  %v1858_v27 = vmax.f32 %v1856_v57, %v1857_v12  ;;  %v1865_v4 = vsel %vm265_vm6, %v1742_v32, -inf  ;;  %v7229_v62 = vsel %vm5564_vm8, %v7220_v53, -3.4028235e+38 }
 0x1c4   : > { %v1866_v61 = vsel %vm265_vm6, %v7229_v62, -inf  ;;  %v5820_v38 = vmax.f32 %v1817_v37, %v1818_v60  ;;  %v1834_v34 = vrot.slane %v1833_v0, 2  ;;  %v1842_v16 = vmax.f32 %v1840_v50, %v1841_v3 }
 0x1c5   : > { %v1850_v29 = vrot.slane %v1849_v17, 4  ;;  %v1826_v45 = vmax.f32 %v1824_v44, %v1825_v11  ;;  %v1859_v22 = vrot.slane %v1858_v27, 4  ;;  %v1867_v28 = vmax.f32 %v1865_v4, %v1866_v61 }
 0x1c6   : > { %v7230_v1 = vsel %vm5546_vm7, %v7221_v47, -3.4028235e+38  ;;  %v1835_v48 = vmax.f32 %v1833_v0, %v1834_v34  ;;  %v1843_v5 = vrot.slane %v1842_v16, 2  ;;  %v7231_v53 = vsel %vm5564_vm8, %v7222_v55, -3.4028235e+38  ;;  %v5925_v47 = vld [vmem:[#allocation2 + $0x20] sm:$0xff] }
 0x1c7   : > { %v1874_v32 = vsel %vm265_vm6, %v7230_v1, -inf  ;;  %v1851_v2 = vmax.f32 %v1849_v17, %v1850_v29  ;;  %v1875_v40 = vsel %vm265_vm6, %v7231_v53, -inf  ;;  %vm5835_vm12 = vcmp.ge.s32.totalorder %v7232_v9, %v1963_v6 }
 0x1c8   : > { %vm5842_vm15 = vcmp.lt.s32.totalorder %v7232_v9, %v1966_v7  ;;  %v1827_v59 = vrot.slane %v1826_v45, 1  ;;  %v1860_v54 = vmax.f32 %v1858_v27, %v1859_v22  ;;  %v1868_v63 = vrot.slane %v1867_v28, 4 }
 0x1c9   : > { %v1876_v20 = vmax.f32 %v1874_v32, %v1875_v40  ;;  %v1836_v25 = vrot.slane %v1835_v48, 1  ;;  %v1844_v55 = vmax.f32 %v1842_v16, %v1843_v5  ;;  %v1852_v39 = vrot.slane %v1851_v2, 2  ;;  %v5901_v32 = vld [vmem:[#allocation2 + $0x10] sm:$0xff] }
 0x1ca   : > { %v7237_v6 = vsel %vm5546_vm7, %v7223_v52, -3.4028235e+38  ;;  %v1828_v41 = vmax.f32 %v1826_v45, %v1827_v59  ;;  %v1861_v56 = vrot.slane %v1860_v54, 2  ;;  %v1869_v7 = vmax.f32 %v1867_v28, %v1868_v63  ;;  %vm5907_vm7 = vmand %vm5835_vm12, %vm5842_vm15  ;;  %v5929_v63 = vld [vmem:[#allocation2 + $0x28] sm:$0xff] }
 0x1cb   : > { %v1883_v31 = vsel %vm265_vm6, %v7237_v6, -inf  ;;  %v1877_v58 = vrot.slane %v1876_v20, 4  ;;  %v1837_v49 = vmax.f32 %v1835_v48, %v1836_v25  ;;  %v1845_v21 = vrot.slane %v1844_v55, 1 }
 0x1cc   : > { %v1853_v52 = vmax.f32 %v1851_v2, %v1852_v39  ;;  %v7240_v23 = vsel %vm5564_vm8, %v3630_v15, -3.4028235e+38  ;;  %v1862_v10 = vmax.f32 %v1860_v54, %v1861_v56  ;;  %v1870_v50 = vrot.slane %v1869_v7, 2  ;;  %v5943_v56 = vld [vmem:[#allocation2 + $0x38] sm:$0xff] }
 0x1cd   : > { %v1884_v37 = vsel %vm265_vm6, %v7240_v23, -inf  ;;  %v1878_v44 = vmax.f32 %v1876_v20, %v1877_v58  ;;  %v1846_v42 = vmax.f32 %v1844_v55, %v1845_v21  ;;  %v7241_v36 = vstv %s5599_s20 }
 0x1ce   : > { %v1885_v46 = vmax.f32 %v1883_v31, %v1884_v37  ;;  %v1854_v57 = vrot.slane %v1853_v52, 1  ;;  %vm5868_vm5 = vcmp.eq.s32.totalorder %v7241_v36, 1  ;;  %v1975_v60 = vsel %vm5857_vm4, %v5851_v43, -3.4028235e+38  ;;  %v5966_v36 = vld [vmem:[#allocation2 + $0x58] sm:$0xff] }
 0x1cf   : > { %v1863_v33 = vrot.slane %v1862_v10, 1  ;;  %v1871_v0 = vmax.f32 %v1869_v7, %v1870_v50  ;;  %v1879_v15 = vrot.slane %v1878_v44, 2  ;;  %v1896_v11 = vsel %vm5868_vm5, %v5732_v18, 0.0  ;;  %v5957_v50 = vld [vmem:[#allocation2 + $0x48] sm:$0xff] }
 0x1d0   : > { %v1886_v3 = vrot.slane %v1885_v46, 4  ;;  %v1855_v17 = vmax.f32 %v1853_v52, %v1854_v57  ;;  %v1897_v27 = vsel %vm5868_vm5, %v5734_v51, 0.0  ;;  %v1898_v4 = vsel %vm5868_vm5, %v5736_v35, 0.0 }
 0x1d1   : > { %v1864_v62 = vmax.f32 %v1862_v10, %v1863_v33  ;;  %v1872_v61 = vrot.slane %v1871_v0, 1  ;;  %v1880_v34 = vmax.f32 %v1878_v44, %v1879_v15  ;;  %v1899_v29 = vsel %vm5868_vm5, %v5738_v30, 0.0  ;;  %v5899_v30 = vld [vmem:[#allocation2 + $0x8] sm:$0xff]  ;;  %v5959_v44 = vld [vmem:[#allocation2 + $0x50] sm:$0xff] }
 0x1d2   : > { %v1887_v16 = vmax.f32 %v1885_v46, %v1886_v3  ;;  %v1900_v18 = vsel %vm5868_vm5, %v5750_v24, 0.0  ;;  %v1901_v51 = vsel %vm5868_vm5, %v5762_v26, 0.0  ;;  %v1902_v35 = vsel %vm5868_vm5, %v5793_v13, 0.0 }
 0x1d3   : > { %v1873_v45 = vmax.f32 %v1871_v0, %v1872_v61  ;;  %v1881_v22 = vrot.slane %v1880_v34, 1  ;;  %v1903_v1 = vsel %vm5868_vm5, %v5820_v38, 0.0  ;;  %v1904_v26 = vsel %vm5868_vm5, %v1828_v41, 0.0  ;;  %v5941_v41 = vld [vmem:[#allocation2 + $0x30] sm:$0xff] }
 0x1d4   : > { %v1888_v28 = vrot.slane %v1887_v16, 2  ;;  %v1905_v13 = vsel %vm5868_vm5, %v1837_v49, 0.0  ;;  %v1906_v38 = vsel %vm5868_vm5, %v1846_v42, 0.0  ;;  %v1907_v48 = vsel %vm5868_vm5, %v1855_v17, 0.0  ;;  %v5947_v49 = vld [vmem:[#allocation2 + $0x40] sm:$0xff] }
 0x1d5   : > { %v1882_v5 = vmax.f32 %v1880_v34, %v1881_v22  ;;  %v1908_v53 = vsel %vm5868_vm5, %v1864_v62, 0.0  ;;  %v1909_v40 = vsel %vm5868_vm5, %v1873_v45, 0.0  ;;  %v1928_v59 = vsel %vm446_vm11, %v1897_v27, %v1896_v11 }
 0x1d6   : > { %v1889_v2 = vmax.f32 %v1887_v16, %v1888_v28  ;;  %v1935_v54 = vsel %vm446_vm11, %v1905_v13, %v1904_v26  ;;  %v1976_v20 = vsel %vm5907_vm7, %v5899_v30, -3.4028235e+38  ;;  %v1977_v25 = vsel %vm5857_vm4, %v5901_v32, -3.4028235e+38 }
 0x1d7   : > { %v1910_v39 = vsel %vm5868_vm5, %v1882_v5, 0.0  ;;  %v1929_v6 = vsel %vm448_vm13, %v1898_v4, %v1928_v59  ;;  %v1936_v31 = vsel %vm448_vm13, %v1906_v38, %v1935_v54  ;;  %v1978_v21 = vsel %vm5907_vm7, %v5923_v14, -3.4028235e+38 }
 0x1d8   : > { %v1890_v55 = vrot.slane %v1889_v2, 1  ;;  %v1930_v7 = vsel %vm450_vm14, %v1899_v29, %v1929_v6  ;;  %v1937_v58 = vsel %vm450_vm14, %v1907_v48, %v1936_v31  ;;  %v1979_v52 = vsel %vm5857_vm4, %v5925_v47, -3.4028235e+38 }
 0x1d9   : > { %v1931_v37 = vsel %vm452_vm0, %v1900_v18, %v1930_v7  ;;  %v1938_v10 = vsel %vm452_vm0, %v1908_v53, %v1937_v58  ;;  %v1980_v46 = vsel %vm5907_vm7, %v5929_v63, -3.4028235e+38  ;;  %v1981_v33 = vsel %vm5857_vm4, %v5941_v41, -3.4028235e+38 }
 0x1da   : > { %v1891_v23 = vmax.f32 %v1889_v2, %v1890_v55  ;;  %v1932_v42 = vsel %vm454_vm1, %v1901_v51, %v1931_v37  ;;  %v1939_v57 = vsel %vm454_vm1, %v1909_v40, %v1938_v10  ;;  %v1982_v0 = vsel %vm5907_vm7, %v5943_v56, -3.4028235e+38 }
 0x1db   : > { %v1933_v3 = vsel %vm456_vm2, %v1902_v35, %v1932_v42  ;;  %v1940_v17 = vsel %vm456_vm2, %v1910_v39, %v1939_v57  ;;  %v1983_v11 = vsel %vm5857_vm4, %v5947_v49, -3.4028235e+38  ;;  %v7246_v27 = vstv %s5610_s28 }
 0x1dc   : > { %v1911_v15 = vsel %vm5868_vm5, %v1891_v23, 0.0  ;;  %vm5984_vm8 = vcmp.ge.s32.totalorder %v7224_v19, %v7246_v27  ;;  %v1934_v62 = vsel %vm458_vm3, %v1903_v1, %v1933_v3  ;;  %v1984_v61 = vsel %vm5907_vm7, %v5957_v50, -3.4028235e+38 }
 0x1dd   : > { %v1941_v12 = vsel %vm458_vm3, %v1911_v15, %v1940_v17  ;;  %v1985_v34 = vsel %vm5857_vm4, %v5959_v44, -3.4028235e+38  ;;  %1945 = vst.msk [vmem:[#allocation2 + $0x60] sm:$0xff] %vm265_vm6, %v1934_v62  ;;  %v1986_v16 = vsel %vm5907_vm7, %v5966_v36, -3.4028235e+38  ;;  %v1989_v29 = vsel %vm265_vm6, %v1975_v60, -inf }
 0x1de   : > { %1946 = vst.msk [vmem:[#allocation2 + $0x68] sm:$0xff] %vm265_vm6, %v1941_v12  ;;  %v1990_v18 = vsel %vm265_vm6, %v1976_v20, -inf  ;;  %v1998_v51 = vsel %vm265_vm6, %v1977_v25, -inf  ;;  %v7249_v35 = vmov %v7246_v27  ;;  %v1999_v28 = vsel %vm265_vm6, %v1978_v21, -inf }
 0x1df   : > { %vm6011_vm3 = vcmp.ge.s32.totalorder %v7232_v9, %v7249_v35  ;;  %v1991_v22 = vmax.f32 %v1989_v29, %v1990_v18  ;;  %v2007_v1 = vsel %vm265_vm6, %v1979_v52, -inf  ;;  %v2008_v26 = vsel %vm265_vm6, %v1980_v46, -inf }
 0x1e0   : > { %v2000_v13 = vmax.f32 %v1998_v51, %v1999_v28  ;;  %v2009_v60 = vmax.f32 %v2007_v1, %v2008_v26  ;;  %v2016_v38 = vsel %vm265_vm6, %v1981_v33, -inf  ;;  %v2017_v48 = vsel %vm265_vm6, %v1982_v0, -inf }
 0x1e1   : > { %v1992_v5 = vrot.slane %v1991_v22, 4  ;;  %v2018_v2 = vmax.f32 %v2016_v38, %v2017_v48  ;;  %v2025_v53 = vsel %vm265_vm6, %v1983_v11, -inf  ;;  %v2026_v40 = vsel %vm265_vm6, %v1984_v61, -inf }
 0x1e2   : > { %v2001_v59 = vrot.slane %v2000_v13, 4  ;;  %v2010_v54 = vrot.slane %v2009_v60, 4  ;;  %v2027_v20 = vmax.f32 %v2025_v53, %v2026_v40  ;;  %v2034_v25 = vsel %vm265_vm6, %v1985_v34, -inf }
 0x1e3   : > { %v1993_v55 = vmax.f32 %v1991_v22, %v1992_v5  ;;  %v2019_v39 = vrot.slane %v2018_v2, 4  ;;  %v2035_v6 = vsel %vm265_vm6, %v1986_v16, -inf  ;;  %v7252_v31 = vstv %s5620_s29 }
 0x1e4   : > { %vm6027_vm9 = vcmp.lt.s32.totalorder %v7224_v19, %v7252_v31  ;;  %v2002_v58 = vmax.f32 %v2000_v13, %v2001_v59  ;;  %v2011_v21 = vmax.f32 %v2009_v60, %v2010_v54  ;;  %v2028_v52 = vrot.slane %v2027_v20, 4  ;;  %v6031_v37 = vld [vmem:[#allocation2 + $0x60] sm:$0xff] }
 0x1e5   : > { %v2036_v23 = vmax.f32 %v2034_v25, %v2035_v6  ;;  %v6033_v10 = vld [vmem:[#allocation2 + $0x68] sm:$0xff]  ;;  %v1994_v46 = vrot.slane %v1993_v55, 2  ;;  %v2020_v42 = vmax.f32 %v2018_v2, %v2019_v39  ;;  %v7255_v57 = vstv %s5633_s0  ;;  %vm6058_vm15 = vmand %vm5984_vm8, %vm6027_vm9 }
 0x1e6   : > { %vm6037_vm10 = vcmp.eq.s32.totalorder %v7255_v57, 1  ;;  %v7258_v0 = vmov %v7252_v31  ;;  %v1987_v3 = vsel %vm5857_vm4, %v6031_v37, -3.4028235e+38  ;;  %v1988_v17 = vsel %vm5907_vm7, %v6033_v10, -3.4028235e+38 }
 0x1e7   : > { %vm6044_vm12 = vcmp.lt.s32.totalorder %v7232_v9, %v7258_v0  ;;  %v2003_v11 = vrot.slane %v2002_v58, 2  ;;  %v2012_v27 = vrot.slane %v2011_v21, 2  ;;  %v1995_v62 = vmax.f32 %v1993_v55, %v1994_v46 }
 0x1e8   : > { %v2021_v12 = vrot.slane %v2020_v42, 2  ;;  %v2029_v61 = vmax.f32 %v2027_v20, %v2028_v52  ;;  %v2037_v34 = vrot.slane %v2036_v23, 4  ;;  %v2043_v18 = vsel %vm265_vm6, %v1987_v3, -inf  ;;  %vm6068_vm4 = vmand %vm6011_vm3, %vm6044_vm12 }
 0x1e9   : > { %v2004_v8 = vmax.f32 %v2002_v58, %v2003_v11  ;;  %v2013_v29 = vmax.f32 %v2011_v21, %v2012_v27  ;;  %v2044_v24 = vsel %vm265_vm6, %v1988_v17, -inf  ;;  %v1996_v51 = vrot.slane %v1995_v62, 1 }
 0x1ea   : > { %v2022_v35 = vmax.f32 %v2020_v42, %v2021_v12  ;;  %v2030_v22 = vrot.slane %v2029_v61, 2  ;;  %v2038_v28 = vmax.f32 %v2036_v23, %v2037_v34  ;;  %v2045_v13 = vmax.f32 %v2043_v18, %v2044_v24 }
 0x1eb   : > { %v2005_v1 = vrot.slane %v2004_v8, 1  ;;  %v2014_v26 = vrot.slane %v2013_v29, 1  ;;  %v2126_v60 = vsel %vm6058_vm15, %v5851_v43, -3.4028235e+38  ;;  %v1997_v38 = vmax.f32 %v1995_v62, %v1996_v51 }
 0x1ec   : > { %v2023_v48 = vrot.slane %v2022_v35, 1  ;;  %v2031_v5 = vmax.f32 %v2029_v61, %v2030_v22  ;;  %v2039_v2 = vrot.slane %v2038_v28, 2  ;;  %v2046_v45 = vrot.slane %v2045_v13, 4 }
 0x1ed   : > { %v2006_v53 = vmax.f32 %v2004_v8, %v2005_v1  ;;  %v2015_v40 = vmax.f32 %v2013_v29, %v2014_v26  ;;  %v2127_v59 = vsel %vm6068_vm4, %v5899_v30, -3.4028235e+38  ;;  %v2056_v55 = vsel %vm6037_vm10, %v1997_v38, 0.0 }
 0x1ee   : > { %v2024_v54 = vmax.f32 %v2022_v35, %v2023_v48  ;;  %v2032_v20 = vrot.slane %v2031_v5, 1  ;;  %v2040_v25 = vmax.f32 %v2038_v28, %v2039_v2  ;;  %v2047_v39 = vmax.f32 %v2045_v13, %v2046_v45 }
 0x1ef   : > { %v2057_v6 = vsel %vm6037_vm10, %v2006_v53, 0.0  ;;  %v2058_v31 = vsel %vm6037_vm10, %v2015_v40, 0.0  ;;  %v3133_v7 = vpack.c.bf16 %v2056_v55, %v2056_v55  ;;  %v2128_v11 = vsel %vm6058_vm15, %v5901_v32, -3.4028235e+38 }
 0x1f0   : > { %v2033_v58 = vmax.f32 %v2031_v5, %v2032_v20  ;;  %v2041_v21 = vrot.slane %v2040_v25, 1  ;;  %v2059_v52 = vsel %vm6037_vm10, %v2024_v54, 0.0  ;;  %v3134_v23 = vpack.c.bf16 %v2057_v6, %v2057_v6 }
 0x1f1   : > { %v2048_v46 = vrot.slane %v2047_v39, 2  ;;  %v3135_v42 = vpack.c.bf16 %v2058_v31, %v2058_v31  ;;  %v3136_v57 = vpack.c.bf16 %v2059_v52, %v2059_v52  ;;  %v2091_v0 = vunpack.c.l.b16 %v3133_v7 }
 0x1f2   : > { %v2042_v15 = vmax.f32 %v2040_v25, %v2041_v21  ;;  %v2060_v3 = vsel %vm6037_vm10, %v2033_v58, 0.0  ;;  %v2092_v17 = vunpack.c.l.b16 %v3134_v23  ;;  %vm2106_vm5 = vcmask 60416  }
 0x1f3   : > { %v2049_v27 = vmax.f32 %v2047_v39, %v2048_v46  ;;  %v3137_v62 = vpack.c.bf16 %v2060_v3, %v2060_v3  ;;  %v2093_v12 = vunpack.c.l.b16 %v3135_v42  ;;  %v2094_v61 = vunpack.c.l.b16 %v3136_v57 }
 0x1f4   : > { %vm2107_vm7 = vsmask.f32 3328  ;;  %v2061_v34 = vsel %vm6037_vm10, %v2042_v15, 0.0  ;;  %v2098_v8 = vsel %vm446_vm11, %v2092_v17, %v2091_v0  ;;  %v2129_v29 = vsel %vm6068_vm4, %v5923_v14, -3.4028235e+38 }
 0x1f5   : > { %v2130_v18 = vsel %vm6058_vm15, %v5925_v47, -3.4028235e+38  ;;  %v2050_v24 = vrot.slane %v2049_v27, 1  ;;  %v3138_v51 = vpack.c.bf16 %v2061_v34, %v2061_v34  ;;  %v2095_v35 = vunpack.c.l.b16 %v3137_v62  ;;  %vm6170_vm8 = vmand %vm2106_vm5, %vm2107_vm7  ;;  %v2109_v17 = vld [vmem:[%s6158_s8] sm:$0xf] }
 0x1f6   : > { %v2099_v22 = vsel %vm448_vm13, %v2093_v12, %v2098_v8  ;;  %v2131_v1 = vsel %vm6068_vm4, %v5929_v63, -3.4028235e+38  ;;  %v2132_v26 = vsel %vm6058_vm15, %v5941_v41, -3.4028235e+38  ;;  %v2133_v13 = vsel %vm6068_vm4, %v5943_v56, -3.4028235e+38 }
 0x1f7   : > { %v2100_v28 = vsel %vm450_vm14, %v2094_v61, %v2099_v22  ;;  %v2051_v38 = vmax.f32 %v2049_v27, %v2050_v24  ;;  %v2096_v48 = vunpack.c.l.b16 %v3138_v51  ;;  %v2134_v2 = vsel %vm6058_vm15, %v5947_v49, -3.4028235e+38 }
 0x1f8   : > { %v2101_v5 = vsel %vm452_vm0, %v2095_v35, %v2100_v28  ;;  %v2135_v53 = vsel %vm6068_vm4, %v5957_v50, -3.4028235e+38  ;;  %v2136_v40 = vsel %vm6058_vm15, %v5959_v44, -3.4028235e+38  ;;  %v2137_v45 = vsel %vm6068_vm4, %v5966_v36, -3.4028235e+38 }
 0x1f9   : > { %v2205_v54 = vstv %s6102_s27  ;;  %v2062_v20 = vsel %vm6037_vm10, %v2051_v38, 0.0  ;;  %v2102_v25 = vsel %vm454_vm1, %v2096_v48, %v2101_v5  ;;  %v2138_v55 = vsel %vm6058_vm15, %v6031_v37, -3.4028235e+38 }
 0x1fa   : > { %v2139_v39 = vsel %vm6068_vm4, %v6033_v10, -3.4028235e+38  ;;  %v3139_v6 = vpack.c.bf16 %v2062_v20, %v2062_v20  ;;  %v2140_v31 = vsel %vm265_vm6, %v2126_v60, -inf  ;;  %v2141_v33 = vsel %vm265_vm6, %v2127_v59, -inf }
 0x1fb   : > { %v2149_v7 = vsel %vm265_vm6, %v2128_v11, -inf  ;;  %v2142_v58 = vmax.f32 %v2140_v31, %v2141_v33  ;;  %v2150_v4 = vsel %vm265_vm6, %v2129_v29, -inf  ;;  %v2158_v21 = vsel %vm265_vm6, %v2130_v18, -inf }
 0x1fc   : > { %v2159_v16 = vsel %vm265_vm6, %v2131_v1, -inf  ;;  %v2097_v52 = vunpack.c.l.b16 %v3139_v6  ;;  %v2151_v23 = vmax.f32 %v2149_v7, %v2150_v4  ;;  %v2167_v59 = vsel %vm265_vm6, %v2132_v26, -inf }
 0x1fd   : > { %v2160_v60 = vmax.f32 %v2158_v21, %v2159_v16  ;;  %v2143_v46 = vrot.slane %v2142_v58, 4  ;;  %v2168_v42 = vsel %vm265_vm6, %v2133_v13, -inf  ;;  %v2176_v57 = vsel %vm265_vm6, %v2134_v2, -inf }
 0x1fe   : > { %v2177_v0 = vsel %vm265_vm6, %v2135_v53, -inf  ;;  %v2103_v15 = vsel %vm456_vm2, %v2097_v52, %v2102_v25  ;;  %v2152_v11 = vrot.slane %v2151_v23, 4  ;;  %v2169_v62 = vmax.f32 %v2167_v59, %v2168_v42 }
 0x1ff   : > { %v2161_v27 = vrot.slane %v2160_v60, 4  ;;  %v2104_v12 = vpack.c.b16 %v2103_v15, %v2103_v15  ;;  %v2144_v61 = vmax.f32 %v2142_v58, %v2143_v46  ;;  %v2178_v34 = vmax.f32 %v2176_v57, %v2177_v0 }
 0x200   : > { %v2185_v8 = vsel %vm265_vm6, %v2136_v40, -inf  ;;  %v2153_v29 = vmax.f32 %v2151_v23, %v2152_v11  ;;  %v2170_v24 = vrot.slane %v2169_v62, 4  ;;  %v2186_v51 = vsel %vm265_vm6, %v2137_v45, -inf }
 0x201   : > { %v2162_v18 = vmax.f32 %v2160_v60, %v2161_v27  ;;  %v2110_v35 = vsel %vm6170_vm8, %v2104_v12, %v2109_v17  ;;  %v2145_v22 = vrot.slane %v2144_v61, 2  ;;  %v2179_v28 = vrot.slane %v2178_v34, 4 }
 0x202   : > { %v2187_v1 = vmax.f32 %v2185_v8, %v2186_v51  ;;  %2111 = vst [vmem:[%s6158_s8] sm:$0xf] %v2110_v35  ;;  %v2154_v26 = vrot.slane %v2153_v29, 2  ;;  %v2171_v38 = vmax.f32 %v2169_v62, %v2170_v24  ;;  %v2194_v48 = vsel %vm265_vm6, %v2138_v55, -inf }
 0x203   : > { %v2163_v13 = vrot.slane %v2162_v18, 2  ;;  %v2146_v5 = vmax.f32 %v2144_v61, %v2145_v22  ;;  %v2180_v2 = vmax.f32 %v2178_v34, %v2179_v28  ;;  %v2195_v40 = vsel %vm265_vm6, %v2139_v39, -inf }
 0x204   : > { %v2188_v53 = vrot.slane %v2187_v1, 4  ;;  %v2155_v45 = vmax.f32 %v2153_v29, %v2154_v26  ;;  %v2172_v25 = vrot.slane %v2171_v38, 2  ;;  %v2196_v6 = vmax.f32 %v2194_v48, %v2195_v40 }
 0x205   : > { %v2164_v20 = vmax.f32 %v2162_v18, %v2163_v13  ;;  %v2147_v31 = vrot.slane %v2146_v5, 1  ;;  %v2181_v33 = vrot.slane %v2180_v2, 2  ;;  %vm6188_vm3 = vcmp.eq.s32.totalorder %v2205_v54, 1 }
 0x206   : > { %v2189_v7 = vmax.f32 %v2187_v1, %v2188_v53  ;;  %v2156_v55 = vrot.slane %v2155_v45, 1  ;;  %v2173_v21 = vmax.f32 %v2171_v38, %v2172_v25  ;;  %v2197_v39 = vrot.slane %v2196_v6, 4 }
 0x207   : > { %v2165_v4 = vrot.slane %v2164_v20, 1  ;;  %v2148_v16 = vmax.f32 %v2146_v5, %v2147_v31  ;;  %v2182_v52 = vmax.f32 %v2180_v2, %v2181_v33  ;;  %v2263_v24 = vstv %s6183_s10 }
 0x208   : > { %v2190_v23 = vrot.slane %v2189_v7, 2  ;;  %v2157_v60 = vmax.f32 %v2155_v45, %v2156_v55  ;;  %v2174_v46 = vrot.slane %v2173_v21, 1  ;;  %v2198_v42 = vmax.f32 %v2196_v6, %v2197_v39 }
 0x209   : > { %v2166_v59 = vmax.f32 %v2164_v20, %v2165_v4  ;;  %v2183_v57 = vrot.slane %v2182_v52, 1  ;;  %v2207_v54 = vsel %vm6188_vm3, %v2148_v16, 0.0  ;;  %vm2264_vm9 = vcmp.ge.s32.totalorder %v7224_v19, %v2263_v24 }
 0x20a   : > { %v2191_v0 = vmax.f32 %v2189_v7, %v2190_v23  ;;  %v2175_v15 = vmax.f32 %v2173_v21, %v2174_v46  ;;  %v2199_v17 = vrot.slane %v2198_v42, 2  ;;  %v2208_v11 = vsel %vm6188_vm3, %v2157_v60, 0.0 }
 0x20b   : > { %v2209_v27 = vsel %vm6188_vm3, %v2166_v59, 0.0  ;;  %v2184_v62 = vmax.f32 %v2182_v52, %v2183_v57  ;;  %v3140_v61 = vpack.c.bf16 %v2207_v54, %v2207_v54  ;;  %v3141_v34 = vpack.c.bf16 %v2208_v11, %v2208_v11  ;;  %v3083_v57 = vld [vmem:[%s6158_s8 + $0x4] sm:$0xf] }
 0x20c   : > { %v2192_v12 = vrot.slane %v2191_v0, 1  ;;  %v2200_v8 = vmax.f32 %v2198_v42, %v2199_v17  ;;  %v2210_v29 = vsel %vm6188_vm3, %v2175_v15, 0.0  ;;  %v3142_v18 = vpack.c.bf16 %v2209_v27, %v2209_v27 }
 0x20d   : > { %v2211_v35 = vsel %vm6188_vm3, %v2184_v62, 0.0  ;;  %v3143_v22 = vpack.c.bf16 %v2210_v29, %v2210_v29  ;;  %v2242_v28 = vunpack.c.l.b16 %v3140_v61  ;;  %v2243_v13 = vunpack.c.l.b16 %v3141_v34 }
 0x20e   : > { %v2193_v51 = vmax.f32 %v2191_v0, %v2192_v12  ;;  %v2201_v1 = vrot.slane %v2200_v8, 1  ;;  %v3144_v26 = vpack.c.bf16 %v2211_v35, %v2211_v35  ;;  %v2244_v38 = vunpack.c.l.b16 %v3142_v18 }
 0x20f   : > { %vm6217_vm10 = vcmp.ge.s32.totalorder %v7232_v9, %v2263_v24  ;;  %v2266_v2 = vstv %s6186_s11  ;;  %v2245_v45 = vunpack.c.l.b16 %v3143_v22  ;;  %v2249_v20 = vsel %vm446_vm11, %v2243_v13, %v2242_v28 }
 0x210   : > { %v2212_v48 = vsel %vm6188_vm3, %v2193_v51, 0.0  ;;  %v2202_v53 = vmax.f32 %v2200_v8, %v2201_v1  ;;  %v2246_v25 = vunpack.c.l.b16 %v3144_v26  ;;  %v2250_v6 = vsel %vm448_vm13, %v2244_v38, %v2249_v20 }
 0x211   : > { %v3145_v40 = vpack.c.bf16 %v2212_v48, %v2212_v48  ;;  %vm2267_vm12 = vcmp.lt.s32.totalorder %v7224_v19, %v2266_v2  ;;  %vm2268_vm15 = vcmp.lt.s32.totalorder %v7232_v9, %v2266_v2  ;;  %v2251_v7 = vsel %vm450_vm14, %v2245_v45, %v2250_v6 }
 0x212   : > { %v2213_v31 = vsel %vm6188_vm3, %v2202_v53, 0.0  ;;  %vm6229_vm4 = vmand %vm2264_vm9, %vm2267_vm12  ;;  %v2354_v4 = vstv %s6211_s12  ;;  %v2252_v39 = vsel %vm452_vm0, %v2246_v25, %v2251_v7  ;;  %v2412_v62 = vstv %s6206_s1 }
 0x213   : > { %v2247_v33 = vunpack.c.l.b16 %v3145_v40  ;;  %v3146_v21 = vpack.c.bf16 %v2213_v31, %v2213_v31  ;;  %vm6237_vm5 = vmand %vm6217_vm10, %vm2268_vm15  ;;  %v2275_v58 = vsel %vm6229_vm4, %v5851_v43, -3.4028235e+38  ;;  %v2277_v52 = vsel %vm6229_vm4, %v5901_v32, -3.4028235e+38 }
 0x214   : > { %v2276_v60 = vsel %vm6237_vm5, %v5899_v30, -3.4028235e+38  ;;  %v2278_v59 = vsel %vm6237_vm5, %v5923_v14, -3.4028235e+38  ;;  %v2279_v46 = vsel %vm6229_vm4, %v5925_v47, -3.4028235e+38  ;;  %vm6297_vm7 = vcmp.ge.s32.totalorder %v7224_v19, %v2412_v62 }
 0x215   : > { %v2253_v23 = vsel %vm454_vm1, %v2247_v33, %v2252_v39  ;;  %v2248_v42 = vunpack.c.l.b16 %v3146_v21  ;;  %v2280_v0 = vsel %vm6237_vm5, %v5929_v63, -3.4028235e+38  ;;  %v2281_v54 = vsel %vm6229_vm4, %v5941_v41, -3.4028235e+38 }
 0x216   : > { %v2282_v15 = vsel %vm6237_vm5, %v5943_v56, -3.4028235e+38  ;;  %v2283_v17 = vsel %vm6229_vm4, %v5947_v49, -3.4028235e+38  ;;  %v2284_v11 = vsel %vm6237_vm5, %v5957_v50, -3.4028235e+38  ;;  %vm6317_vm9 = vcmp.ge.s32.totalorder %v7232_v9, %v2412_v62 }
 0x217   : > { %v2285_v27 = vsel %vm6229_vm4, %v5959_v44, -3.4028235e+38  ;;  %v2254_v12 = vsel %vm456_vm2, %v2248_v42, %v2253_v23  ;;  %v2286_v61 = vsel %vm6237_vm5, %v5966_v36, -3.4028235e+38  ;;  %v2287_v34 = vsel %vm6229_vm4, %v6031_v37, -3.4028235e+38 }
 0x218   : > { %v2288_v8 = vsel %vm6237_vm5, %v6033_v10, -3.4028235e+38  ;;  %v2255_v29 = vpack.c.b16 %v2254_v12, %v2254_v12  ;;  %v2289_v18 = vsel %vm265_vm6, %v2275_v58, -inf  ;;  %v2290_v24 = vsel %vm265_vm6, %v2276_v60, -inf }
 0x219   : > { %v2298_v51 = vsel %vm265_vm6, %v2277_v52, -inf  ;;  %v2291_v35 = vmax.f32 %v2289_v18, %v2290_v24  ;;  %v2299_v22 = vsel %vm265_vm6, %v2278_v59, -inf  ;;  %v2307_v28 = vsel %vm265_vm6, %v2279_v46, -inf }
 0x21a   : > { %v2308_v1 = vsel %vm265_vm6, %v2280_v0, -inf  ;;  %v2259_v13 = vsel %vm6170_vm8, %v2255_v29, %v3083_v57  ;;  %v2300_v38 = vmax.f32 %v2298_v51, %v2299_v22  ;;  %v2316_v5 = vsel %vm265_vm6, %v2281_v54, -inf }
 0x21b   : > { %v2309_v48 = vmax.f32 %v2307_v28, %v2308_v1  ;;  %3084 = vst [vmem:[%s6158_s8 + $0x4] sm:$0xf] %v2259_v13  ;;  %v2292_v2 = vrot.slane %v2291_v35, 4  ;;  %v2317_v53 = vsel %vm265_vm6, %v2282_v15, -inf  ;;  %v2325_v40 = vsel %vm265_vm6, %v2283_v17, -inf }
 0x21c   : > { %v2326_v45 = vsel %vm265_vm6, %v2284_v11, -inf  ;;  %v2301_v20 = vrot.slane %v2300_v38, 4  ;;  %v2318_v6 = vmax.f32 %v2316_v5, %v2317_v53  ;;  %vm6308_vm3 = vcmp.eq.s32.totalorder %v2354_v4, 1 }
 0x21d   : > { %v2310_v25 = vrot.slane %v2309_v48, 4  ;;  %v2327_v31 = vmax.f32 %v2325_v40, %v2326_v45  ;;  %v2293_v7 = vmax.f32 %v2291_v35, %v2292_v2  ;;  %v2334_v55 = vsel %vm265_vm6, %v2285_v27, -inf }
 0x21e   : > { %v2335_v21 = vsel %vm265_vm6, %v2286_v61, -inf  ;;  %v2343_v39 = vsel %vm265_vm6, %v2287_v34, -inf  ;;  %v2302_v16 = vmax.f32 %v2300_v38, %v2301_v20  ;;  %v2319_v52 = vrot.slane %v2318_v6, 4 }
 0x21f   : > { %v2311_v58 = vmax.f32 %v2309_v48, %v2310_v25  ;;  %v2328_v23 = vrot.slane %v2327_v31, 4  ;;  %v2294_v60 = vrot.slane %v2293_v7, 2  ;;  %v2336_v59 = vmax.f32 %v2334_v55, %v2335_v21 }
 0x220   : > { %v2344_v46 = vsel %vm265_vm6, %v2288_v8, -inf  ;;  %v2303_v42 = vrot.slane %v2302_v16, 2  ;;  %v2320_v0 = vmax.f32 %v2318_v6, %v2319_v52  ;;  %v2415_v27 = vstv %s6294_s2 }
 0x221   : > { %v2312_v57 = vrot.slane %v2311_v58, 2  ;;  %v2329_v54 = vmax.f32 %v2327_v31, %v2328_v23  ;;  %v2295_v15 = vmax.f32 %v2293_v7, %v2294_v60  ;;  %v2337_v17 = vrot.slane %v2336_v59, 4 }
 0x222   : > { %v2345_v11 = vmax.f32 %v2343_v39, %v2344_v46  ;;  %v2304_v12 = vmax.f32 %v2302_v16, %v2303_v42  ;;  %v2321_v34 = vrot.slane %v2320_v0, 2  ;;  %vm2416_vm10 = vcmp.lt.s32.totalorder %v7224_v19, %v2415_v27 }
 0x223   : > { %v2313_v61 = vmax.f32 %v2311_v58, %v2312_v57  ;;  %v2330_v29 = vrot.slane %v2329_v54, 2  ;;  %v2296_v18 = vrot.slane %v2295_v15, 1  ;;  %v2338_v24 = vmax.f32 %v2336_v59, %v2337_v17  ;;  %vm6325_vm12 = vmand %vm6297_vm7, %vm2416_vm10 }
 0x224   : > { %v2346_v8 = vrot.slane %v2345_v11, 4  ;;  %v2305_v62 = vrot.slane %v2304_v12, 1  ;;  %v2322_v35 = vmax.f32 %v2320_v0, %v2321_v34  ;;  %vm2417_vm15 = vcmp.lt.s32.totalorder %v7232_v9, %v2415_v27 }
 0x225   : > { %v2314_v51 = vrot.slane %v2313_v61, 1  ;;  %v2331_v22 = vmax.f32 %v2329_v54, %v2330_v29  ;;  %v2297_v1 = vmax.f32 %v2295_v15, %v2296_v18  ;;  %v2339_v13 = vrot.slane %v2338_v24, 2  ;;  %vm6334_vm4 = vmand %vm6317_vm9, %vm2417_vm15 }
 0x226   : > { %v2347_v38 = vmax.f32 %v2345_v11, %v2346_v8  ;;  %v2306_v48 = vmax.f32 %v2304_v12, %v2305_v62  ;;  %v2323_v2 = vrot.slane %v2322_v35, 1  ;;  %v2424_v25 = vsel %vm6325_vm12, %v5851_v43, -3.4028235e+38 }
 0x227   : > { %v2315_v5 = vmax.f32 %v2313_v61, %v2314_v51  ;;  %v2332_v53 = vrot.slane %v2331_v22, 1  ;;  %v2340_v40 = vmax.f32 %v2338_v24, %v2339_v13  ;;  %v2356_v20 = vsel %vm6308_vm3, %v2297_v1, 0.0 }
 0x228   : > { %v2348_v45 = vrot.slane %v2347_v38, 2  ;;  %v2324_v6 = vmax.f32 %v2322_v35, %v2323_v2  ;;  %v2357_v7 = vsel %vm6308_vm3, %v2306_v48, 0.0  ;;  %v3147_v16 = vpack.c.bf16 %v2356_v20, %v2356_v20 }
 0x229   : > { %v2333_v31 = vmax.f32 %v2331_v22, %v2332_v53  ;;  %v2358_v55 = vsel %vm6308_vm3, %v2315_v5, 0.0  ;;  %v2341_v21 = vrot.slane %v2340_v40, 1  ;;  %v3148_v58 = vpack.c.bf16 %v2357_v7, %v2357_v7 }
 0x22a   : > { %v2349_v39 = vmax.f32 %v2347_v38, %v2348_v45  ;;  %v2359_v52 = vsel %vm6308_vm3, %v2324_v6, 0.0  ;;  %v3149_v60 = vpack.c.bf16 %v2358_v55, %v2358_v55  ;;  %v2425_v43 = vsel %vm6334_vm4, %v5899_v30, -3.4028235e+38 }
 0x22b   : > { %v2360_v23 = vsel %vm6308_vm3, %v2333_v31, 0.0  ;;  %v2342_v59 = vmax.f32 %v2340_v40, %v2341_v21  ;;  %v3150_v4 = vpack.c.bf16 %v2359_v52, %v2359_v52  ;;  %v2391_v57 = vunpack.c.l.b16 %v3147_v16  ;;  %v3092_v40 = vld [vmem:[%s6158_s8 + $0x8] sm:$0xf] }
 0x22c   : > { %v2350_v46 = vrot.slane %v2349_v39, 1  ;;  %v3151_v42 = vpack.c.bf16 %v2360_v23, %v2360_v23  ;;  %v2392_v0 = vunpack.c.l.b16 %v3148_v58  ;;  %v2393_v54 = vunpack.c.l.b16 %v3149_v60 }
 0x22d   : > { %v2426_v15 = vsel %vm6325_vm12, %v5901_v32, -3.4028235e+38  ;;  %v2361_v11 = vsel %vm6308_vm3, %v2342_v59, 0.0  ;;  %v2394_v27 = vunpack.c.l.b16 %v3150_v4  ;;  %v2427_v34 = vsel %vm6334_vm4, %v5923_v14, -3.4028235e+38 }
 0x22e   : > { %v2351_v17 = vmax.f32 %v2349_v39, %v2350_v46  ;;  %v2395_v12 = vunpack.c.l.b16 %v3151_v42  ;;  %v3152_v61 = vpack.c.bf16 %v2361_v11, %v2361_v11  ;;  %v2398_v30 = vsel %vm446_vm11, %v2392_v0, %v2391_v57 }
 0x22f   : > { %v2428_v29 = vsel %vm6325_vm12, %v5925_v47, -3.4028235e+38  ;;  %v2399_v18 = vsel %vm448_vm13, %v2393_v54, %v2398_v30  ;;  %v2429_v24 = vsel %vm6334_vm4, %v5929_v63, -3.4028235e+38  ;;  %v2430_v8 = vsel %vm6325_vm12, %v5941_v41, -3.4028235e+38 }
 0x230   : > { %v2362_v32 = vsel %vm6308_vm3, %v2351_v17, 0.0  ;;  %v2396_v14 = vunpack.c.l.b16 %v3152_v61  ;;  %v2400_v51 = vsel %vm450_vm14, %v2394_v27, %v2399_v18  ;;  %v2431_v47 = vsel %vm6334_vm4, %v5943_v56, -3.4028235e+38 }
 0x231   : > { %v3153_v62 = vpack.c.bf16 %v2362_v32, %v2362_v32  ;;  %v2401_v33 = vsel %vm452_vm0, %v2395_v12, %v2400_v51  ;;  %v2432_v63 = vsel %vm6325_vm12, %v5947_v49, -3.4028235e+38  ;;  %v2433_v41 = vsel %vm6334_vm4, %v5957_v50, -3.4028235e+38 }
 0x232   : > { %v2434_v35 = vsel %vm6325_vm12, %v5959_v44, -3.4028235e+38  ;;  %v2402_v1 = vsel %vm454_vm1, %v2396_v14, %v2401_v33  ;;  %v2435_v56 = vsel %vm6334_vm4, %v5966_v36, -3.4028235e+38  ;;  %v2436_v13 = vsel %vm6325_vm12, %v6031_v37, -3.4028235e+38 }
 0x233   : > { %v2397_v22 = vunpack.c.l.b16 %v3153_v62  ;;  %v2437_v38 = vsel %vm6334_vm4, %v6033_v10, -3.4028235e+38  ;;  %v2438_v48 = vsel %vm265_vm6, %v2424_v25, -inf  ;;  %v2439_v5 = vsel %vm265_vm6, %v2425_v43, -inf  ;;  %v6486_v14 = vld [vmem:[#allocation2] sm:$0xff] }
 0x234   : > { %v2447_v2 = vsel %vm265_vm6, %v2426_v15, -inf  ;;  %v2440_v45 = vmax.f32 %v2438_v48, %v2439_v5  ;;  %v2448_v28 = vsel %vm265_vm6, %v2427_v34, -inf  ;;  %v2456_v20 = vsel %vm265_vm6, %v2428_v29, -inf }
 0x235   : > { %v2403_v53 = vsel %vm456_vm2, %v2397_v22, %v2402_v1  ;;  %v2449_v6 = vmax.f32 %v2447_v2, %v2448_v28  ;;  %v2457_v25 = vsel %vm265_vm6, %v2429_v24, -inf  ;;  %v2465_v31 = vsel %vm265_vm6, %v2430_v8, -inf }
 0x236   : > { %v2404_v26 = vpack.c.b16 %v2403_v53, %v2403_v53  ;;  %v2441_v7 = vrot.slane %v2440_v45, 4  ;;  %v2458_v55 = vmax.f32 %v2456_v20, %v2457_v25  ;;  %v2466_v21 = vsel %vm265_vm6, %v2431_v47, -inf }
 0x237   : > { %v2474_v39 = vsel %vm265_vm6, %v2432_v63, -inf  ;;  %v2450_v58 = vrot.slane %v2449_v6, 4  ;;  %v2467_v52 = vmax.f32 %v2465_v31, %v2466_v21  ;;  %v2475_v23 = vsel %vm265_vm6, %v2433_v41, -inf }
 0x238   : > { %v2408_v16 = vsel %vm6170_vm8, %v2404_v26, %v3092_v40  ;;  %v2442_v60 = vmax.f32 %v2440_v45, %v2441_v7  ;;  %v2459_v43 = vrot.slane %v2458_v55, 4  ;;  %v2476_v59 = vmax.f32 %v2474_v39, %v2475_v23  ;;  %v3101_v40 = vld [vmem:[%s6158_s8 + $0xc] sm:$0xf] }
 0x239   : > { %3093 = vst [vmem:[%s6158_s8 + $0x8] sm:$0xf] %v2408_v16  ;;  %v2483_v46 = vsel %vm265_vm6, %v2434_v35, -inf  ;;  %v2451_v4 = vmax.f32 %v2449_v6, %v2450_v58  ;;  %v2468_v42 = vrot.slane %v2467_v52, 4  ;;  %v2484_v57 = vsel %vm265_vm6, %v2435_v56, -inf }
 0x23a   : > { %v2492_v0 = vsel %vm265_vm6, %v2436_v13, -inf  ;;  %v2443_v54 = vrot.slane %v2442_v60, 2  ;;  %v2460_v15 = vmax.f32 %v2458_v55, %v2459_v43  ;;  %v2477_v17 = vrot.slane %v2476_v59, 4 }
 0x23b   : > { %v2485_v11 = vmax.f32 %v2483_v46, %v2484_v57  ;;  %v2452_v27 = vrot.slane %v2451_v4, 2  ;;  %v2469_v12 = vmax.f32 %v2467_v52, %v2468_v42  ;;  %v2493_v61 = vsel %vm265_vm6, %v2437_v38, -inf }
 0x23c   : > { %v2503_v30 = vstv %s2502_s3  ;;  %v2444_v34 = vmax.f32 %v2442_v60, %v2443_v54  ;;  %v2461_v29 = vrot.slane %v2460_v15, 2  ;;  %v2478_v32 = vmax.f32 %v2476_v59, %v2477_v17 }
 0x23d   : > { %v2486_v18 = vrot.slane %v2485_v11, 4  ;;  %v2453_v24 = vmax.f32 %v2451_v4, %v2452_v27  ;;  %v2470_v8 = vrot.slane %v2469_v12, 2  ;;  %v2494_v62 = vmax.f32 %v2492_v0, %v2493_v61 }
 0x23e   : > { %vm6424_vm5 = vcmp.eq.s32.totalorder %v2503_v30, 1  ;;  %v2445_v51 = vrot.slane %v2444_v34, 1  ;;  %v2462_v47 = vmax.f32 %v2460_v15, %v2461_v29  ;;  %v2479_v33 = vrot.slane %v2478_v32, 2 }
 0x23f   : > { %v2487_v63 = vmax.f32 %v2485_v11, %v2486_v18  ;;  %v2454_v41 = vrot.slane %v2453_v24, 1  ;;  %v2471_v35 = vmax.f32 %v2469_v12, %v2470_v8  ;;  %v2495_v22 = vrot.slane %v2494_v62, 4 }
 0x240   : > { %v2561_v1 = vstv %s6411_s9  ;;  %v2446_v56 = vmax.f32 %v2444_v34, %v2445_v51  ;;  %v2463_v13 = vrot.slane %v2462_v47, 1  ;;  %v2480_v38 = vmax.f32 %v2478_v32, %v2479_v33 }
 0x241   : > { %v2488_v48 = vrot.slane %v2487_v63, 2  ;;  %v2455_v5 = vmax.f32 %v2453_v24, %v2454_v41  ;;  %v2472_v2 = vrot.slane %v2471_v35, 1  ;;  %v2496_v53 = vmax.f32 %v2494_v62, %v2495_v22 }
 0x242   : > { %vm6433_vm7 = vcmp.ge.s32.totalorder %v7224_v19, %v2561_v1  ;;  %v2464_v45 = vmax.f32 %v2462_v47, %v2463_v13  ;;  %v2481_v28 = vrot.slane %v2480_v38, 1  ;;  %v2505_v26 = vsel %vm6424_vm5, %v2446_v56, 0.0  ;;  %v6502_v56 = vld [vmem:[#allocation2 + $0x8] sm:$0xff] }
 0x243   : > { %v2489_v20 = vmax.f32 %v2487_v63, %v2488_v48  ;;  %v2473_v6 = vmax.f32 %v2471_v35, %v2472_v2  ;;  %v2497_v25 = vrot.slane %v2496_v53, 2  ;;  %v2506_v31 = vsel %vm6424_vm5, %v2455_v5, 0.0  ;;  %v6491_v63 = vld [vmem:[#allocation2 + $0x10] sm:$0xff]  ;;  %v6496_v35 = vld [vmem:[#allocation2 + $0x20] sm:$0xff]  ;;  %v6512_v5 = vld [vmem:[#allocation2 + $0x28] sm:$0xff] }
 0x244   : > { %v3154_v7 = vpack.c.bf16 %v2505_v26, %v2505_v26  ;;  %v2482_v55 = vmax.f32 %v2480_v38, %v2481_v28  ;;  %v2507_v39 = vsel %vm6424_vm5, %v2464_v45, 0.0  ;;  %v3155_v16 = vpack.c.bf16 %v2506_v31, %v2506_v31  ;;  %v6507_v38 = vld [vmem:[#allocation2 + $0x18] sm:$0xff]  ;;  %v6518_v45 = vld [vmem:[#allocation2 + $0x30] sm:$0xff] }
 0x245   : > { %v2490_v21 = vrot.slane %v2489_v20, 1  ;;  %v2498_v58 = vmax.f32 %v2496_v53, %v2497_v25  ;;  %v2508_v52 = vsel %vm6424_vm5, %v2473_v6, 0.0  ;;  %v3156_v23 = vpack.c.bf16 %v2507_v39, %v2507_v39 }
 0x246   : > { %v2540_v60 = vunpack.c.l.b16 %v3154_v7  ;;  %v2509_v59 = vsel %vm6424_vm5, %v2482_v55, 0.0  ;;  %v3157_v46 = vpack.c.bf16 %v2508_v52, %v2508_v52  ;;  %v2541_v4 = vunpack.c.l.b16 %v3155_v16 }
 0x247   : > { %v2491_v43 = vmax.f32 %v2489_v20, %v2490_v21  ;;  %v2499_v42 = vrot.slane %v2498_v58, 1  ;;  %v3158_v57 = vpack.c.bf16 %v2509_v59, %v2509_v59  ;;  %v2542_v0 = vunpack.c.l.b16 %v3156_v23  ;;  %v6523_v20 = vld [vmem:[#allocation2 + $0x38] sm:$0xff] }
 0x248   : > { %vm6453_vm3 = vcmp.ge.s32.totalorder %v7232_v9, %v2561_v1  ;;  %v2543_v17 = vunpack.c.l.b16 %v3157_v46  ;;  %v2547_v11 = vsel %vm446_vm11, %v2541_v4, %v2540_v60  ;;  %v2564_v27 = vstv %s6429_s14 }
 0x249   : > { %v2510_v15 = vsel %vm6424_vm5, %v2491_v43, 0.0  ;;  %v2500_v12 = vmax.f32 %v2498_v58, %v2499_v42  ;;  %v2544_v30 = vunpack.c.l.b16 %v3158_v57  ;;  %v2548_v34 = vsel %vm448_vm13, %v2542_v0, %v2547_v11 }
 0x24a   : > { %v3159_v61 = vpack.c.bf16 %v2510_v15, %v2510_v15  ;;  %v2549_v29 = vsel %vm450_vm14, %v2543_v17, %v2548_v34  ;;  %vm2565_vm9 = vcmp.lt.s32.totalorder %v7224_v19, %v2564_v27  ;;  %vm2566_vm10 = vcmp.lt.s32.totalorder %v7232_v9, %v2564_v27 }
 0x24b   : > { %v2511_v32 = vsel %vm6424_vm5, %v2500_v12, 0.0  ;;  %v2550_v24 = vsel %vm452_vm0, %v2544_v30, %v2549_v29  ;;  %vm6475_vm12 = vmand %vm6433_vm7, %vm2565_vm9  ;;  %v2652_v62 = vstv %s6460_s16  ;;  %v2710_v55 = vstv %s6450_s13 }
 0x24c   : > { %v2545_v18 = vunpack.c.l.b16 %v3159_v61  ;;  %v3160_v51 = vpack.c.bf16 %v2511_v32, %v2511_v32  ;;  %vm6482_vm15 = vmand %vm6453_vm3, %vm2566_vm10  ;;  %v2573_v33 = vsel %vm6475_vm12, %v6486_v14, -3.4028235e+38  ;;  %v2575_v41 = vsel %vm6475_vm12, %v6491_v63, -3.4028235e+38 }
 0x24d   : > { %v2577_v22 = vsel %vm6475_vm12, %v6496_v35, -3.4028235e+38  ;;  %v2574_v13 = vsel %vm6482_vm15, %v6502_v56, -3.4028235e+38  ;;  %v2576_v48 = vsel %vm6482_vm15, %v6507_v38, -3.4028235e+38  ;;  %vm6573_vm5 = vcmp.ge.s32.totalorder %v7224_v19, %v2710_v55 }
 0x24e   : > { %v2551_v1 = vsel %vm454_vm1, %v2545_v18, %v2550_v24  ;;  %v2578_v2 = vsel %vm6482_vm15, %v6512_v5, -3.4028235e+38  ;;  %v2546_v53 = vunpack.c.l.b16 %v3160_v51  ;;  %v2579_v28 = vsel %vm6475_vm12, %v6518_v45, -3.4028235e+38 }
 0x24f   : > { %v2580_v26 = vsel %vm6482_vm15, %v6523_v20, -3.4028235e+38  ;;  %v2581_v6 = vsel %vm6475_vm12, %v5947_v49, -3.4028235e+38  ;;  %v2582_v25 = vsel %vm6482_vm15, %v5957_v50, -3.4028235e+38  ;;  %vm6578_vm7 = vcmp.ge.s32.totalorder %v7232_v9, %v2710_v55 }
 0x250   : > { %v2583_v31 = vsel %vm6475_vm12, %v5959_v44, -3.4028235e+38  ;;  %v2584_v7 = vsel %vm6482_vm15, %v5966_v36, -3.4028235e+38  ;;  %v2552_v21 = vsel %vm456_vm2, %v2546_v53, %v2551_v1  ;;  %v2585_v49 = vsel %vm6475_vm12, %v6031_v37, -3.4028235e+38 }
 0x251   : > { %v2586_v50 = vsel %vm6482_vm15, %v6033_v10, -3.4028235e+38  ;;  %v2587_v39 = vsel %vm265_vm6, %v2573_v33, -inf  ;;  %v2553_v16 = vpack.c.b16 %v2552_v21, %v2552_v21  ;;  %v2588_v44 = vsel %vm265_vm6, %v2574_v13, -inf }
 0x252   : > { %v2596_v58 = vsel %vm265_vm6, %v2575_v41, -inf  ;;  %v2597_v36 = vsel %vm265_vm6, %v2576_v48, -inf  ;;  %v2589_v52 = vmax.f32 %v2587_v39, %v2588_v44  ;;  %v2605_v60 = vsel %vm265_vm6, %v2577_v22, -inf }
 0x253   : > { %v2598_v23 = vmax.f32 %v2596_v58, %v2597_v36  ;;  %v2606_v37 = vsel %vm265_vm6, %v2578_v2, -inf  ;;  %v2557_v43 = vsel %vm6170_vm8, %v2553_v16, %v3101_v40  ;;  %v2614_v59 = vsel %vm265_vm6, %v2579_v28, -inf }
 0x254   : > { %v2607_v10 = vmax.f32 %v2605_v60, %v2606_v37  ;;  %v2615_v46 = vsel %vm265_vm6, %v2580_v26, -inf  ;;  %3102 = vst [vmem:[%s6158_s8 + $0xc] sm:$0xf] %v2557_v43  ;;  %v2590_v4 = vrot.slane %v2589_v52, 4  ;;  %v2623_v0 = vsel %vm265_vm6, %v2581_v6, -inf }
 0x255   : > { %v2599_v42 = vrot.slane %v2598_v23, 4  ;;  %v2616_v57 = vmax.f32 %v2614_v59, %v2615_v46  ;;  %v2624_v15 = vsel %vm265_vm6, %v2582_v25, -inf  ;;  %v2632_v17 = vsel %vm265_vm6, %v2583_v31, -inf }
 0x256   : > { %v2608_v54 = vrot.slane %v2607_v10, 4  ;;  %v2633_v11 = vsel %vm265_vm6, %v2584_v7, -inf  ;;  %vm6563_vm4 = vcmp.eq.s32.totalorder %v2652_v62, 1  ;;  %v2591_v12 = vmax.f32 %v2589_v52, %v2590_v4 }
 0x257   : > { %v2600_v61 = vmax.f32 %v2598_v23, %v2599_v42  ;;  %v2617_v30 = vrot.slane %v2616_v57, 4  ;;  %v2625_v34 = vmax.f32 %v2623_v0, %v2624_v15  ;;  %v2634_v32 = vmax.f32 %v2632_v17, %v2633_v11 }
 0x258   : > { %v2609_v29 = vmax.f32 %v2607_v10, %v2608_v54  ;;  %v2641_v18 = vsel %vm265_vm6, %v2585_v49, -inf  ;;  %v2642_v24 = vsel %vm265_vm6, %v2586_v50, -inf  ;;  %v2592_v8 = vrot.slane %v2591_v12, 2 }
 0x259   : > { %v2601_v51 = vrot.slane %v2600_v61, 2  ;;  %v2618_v47 = vmax.f32 %v2616_v57, %v2617_v30  ;;  %v2626_v33 = vrot.slane %v2625_v34, 4  ;;  %v2635_v41 = vrot.slane %v2634_v32, 4 }
 0x25a   : > { %v2610_v62 = vrot.slane %v2609_v29, 2  ;;  %v2643_v22 = vmax.f32 %v2641_v18, %v2642_v24  ;;  %v2593_v13 = vmax.f32 %v2591_v12, %v2592_v8  ;;  %v2713_v16 = vstv %s6568_s17 }
 0x25b   : > { %v2602_v48 = vmax.f32 %v2600_v61, %v2601_v51  ;;  %v2619_v2 = vrot.slane %v2618_v47, 2  ;;  %v2627_v53 = vmax.f32 %v2625_v34, %v2626_v33  ;;  %v2636_v28 = vmax.f32 %v2634_v32, %v2635_v41 }
 0x25c   : > { %v2611_v40 = vmax.f32 %v2609_v29, %v2610_v62  ;;  %v2644_v26 = vrot.slane %v2643_v22, 4  ;;  %v2594_v25 = vrot.slane %v2593_v13, 1  ;;  %vm6584_vm3 = vcmp.lt.s32.totalorder %v7224_v19, %v2713_v16 }
 0x25d   : > { %v2603_v31 = vrot.slane %v2602_v48, 1  ;;  %v2620_v7 = vmax.f32 %v2618_v47, %v2619_v2  ;;  %v2628_v21 = vrot.slane %v2627_v53, 2  ;;  %v2637_v50 = vrot.slane %v2636_v28, 2  ;;  %vm6600_vm9 = vmand %vm6573_vm5, %vm6584_vm3 }
 0x25e   : > { %v2612_v49 = vrot.slane %v2611_v40, 1  ;;  %v2645_v39 = vmax.f32 %v2643_v22, %v2644_v26  ;;  %v2595_v44 = vmax.f32 %v2593_v13, %v2594_v25  ;;  %vm2715_vm10 = vcmp.lt.s32.totalorder %v7232_v9, %v2713_v16 }
 0x25f   : > { %v2604_v58 = vmax.f32 %v2602_v48, %v2603_v31  ;;  %v2621_v36 = vrot.slane %v2620_v7, 1  ;;  %v2629_v52 = vmax.f32 %v2627_v53, %v2628_v21  ;;  %v2638_v60 = vmax.f32 %v2636_v28, %v2637_v50  ;;  %vm6613_vm12 = vmand %vm6578_vm7, %vm2715_vm10 }
 0x260   : > { %v2613_v23 = vmax.f32 %v2611_v40, %v2612_v49  ;;  %v2646_v37 = vrot.slane %v2645_v39, 2  ;;  %v2654_v59 = vsel %vm6563_vm4, %v2595_v44, 0.0  ;;  %v2722_v1 = vsel %vm6600_vm9, %v6486_v14, -3.4028235e+38  ;;  %v6654_v44 = vld [vmem:[#allocation2 + $0x40] sm:$0xff] }
 0x261   : > { %v2622_v43 = vmax.f32 %v2620_v7, %v2621_v36  ;;  %v2630_v10 = vrot.slane %v2629_v52, 1  ;;  %v2655_v46 = vsel %vm6563_vm4, %v2604_v58, 0.0  ;;  %v2639_v4 = vrot.slane %v2638_v60, 1  ;;  %v6659_v36 = vld [vmem:[#allocation2 + $0x48] sm:$0xff] }
 0x262   : > { %v2647_v42 = vmax.f32 %v2645_v39, %v2646_v37  ;;  %v2656_v57 = vsel %vm6563_vm4, %v2613_v23, 0.0  ;;  %v3161_v0 = vpack.c.bf16 %v2654_v59, %v2654_v59  ;;  %v3162_v17 = vpack.c.bf16 %v2655_v46, %v2655_v46  ;;  %v3110_v39 = vld [vmem:[%s6158_s8 + $0x10] sm:$0xf]  ;;  %v6669_v37 = vld [vmem:[#allocation2 + $0x58] sm:$0xff]  ;;  %v6676_v59 = vld [vmem:[#allocation2 + $0x60] sm:$0xff] }
 0x263   : > { %v2631_v54 = vmax.f32 %v2629_v52, %v2630_v10  ;;  %v2657_v15 = vsel %vm6563_vm4, %v2622_v43, 0.0  ;;  %v3163_v11 = vpack.c.bf16 %v2656_v57, %v2656_v57  ;;  %v2640_v12 = vmax.f32 %v2638_v60, %v2639_v4  ;;  %v6664_v23 = vld [vmem:[#allocation2 + $0x50] sm:$0xff]  ;;  %v6681_v4 = vld [vmem:[#allocation2 + $0x68] sm:$0xff] }
 0x264   : > { %v2648_v61 = vrot.slane %v2647_v42, 1  ;;  %v3164_v30 = vpack.c.bf16 %v2657_v15, %v2657_v15  ;;  %v2689_v34 = vunpack.c.l.b16 %v3161_v0  ;;  %v2690_v18 = vunpack.c.l.b16 %v3162_v17 }
 0x265   : > { %v2658_v32 = vsel %vm6563_vm4, %v2631_v54, 0.0  ;;  %v2691_v24 = vunpack.c.l.b16 %v3163_v11  ;;  %v2659_v51 = vsel %vm6563_vm4, %v2640_v12, 0.0  ;;  %v2723_v13 = vsel %vm6613_vm12, %v6502_v56, -3.4028235e+38 }
 0x266   : > { %v2649_v8 = vmax.f32 %v2647_v42, %v2648_v61  ;;  %v3165_v47 = vpack.c.bf16 %v2658_v32, %v2658_v32  ;;  %v2692_v33 = vunpack.c.l.b16 %v3164_v30  ;;  %v3166_v41 = vpack.c.bf16 %v2659_v51, %v2659_v51 }
 0x267   : > { %v2696_v22 = vsel %vm446_vm11, %v2690_v18, %v2689_v34  ;;  %v2724_v40 = vsel %vm6600_vm9, %v6491_v63, -3.4028235e+38  ;;  %v2725_v27 = vsel %vm6613_vm12, %v6507_v38, -3.4028235e+38  ;;  %v2726_v31 = vsel %vm6600_vm9, %v6496_v35, -3.4028235e+38 }
 0x268   : > { %v2660_v48 = vsel %vm6563_vm4, %v2649_v8, 0.0  ;;  %v2693_v2 = vunpack.c.l.b16 %v3165_v47  ;;  %v2697_v53 = vsel %vm448_vm13, %v2691_v24, %v2696_v22  ;;  %v2694_v26 = vunpack.c.l.b16 %v3166_v41 }
 0x269   : > { %v3167_v28 = vpack.c.bf16 %v2660_v48, %v2660_v48  ;;  %v2698_v6 = vsel %vm450_vm14, %v2692_v33, %v2697_v53  ;;  %v2727_v7 = vsel %vm6613_vm12, %v6512_v5, -3.4028235e+38  ;;  %v2728_v21 = vsel %vm6600_vm9, %v6518_v45, -3.4028235e+38 }
 0x26a   : > { %v2699_v25 = vsel %vm452_vm0, %v2693_v2, %v2698_v6  ;;  %v2729_v16 = vsel %vm6613_vm12, %v6523_v20, -3.4028235e+38  ;;  %v2730_v58 = vsel %vm6600_vm9, %v6654_v44, -3.4028235e+38  ;;  %v2731_v52 = vsel %vm6613_vm12, %v6659_v36, -3.4028235e+38 }
 0x26b   : > { %v2695_v49 = vunpack.c.l.b16 %v3167_v28  ;;  %v2700_v50 = vsel %vm454_vm1, %v2694_v26, %v2699_v25  ;;  %v2732_v60 = vsel %vm6600_vm9, %v6664_v23, -3.4028235e+38  ;;  %v2733_v55 = vsel %vm6613_vm12, %v6669_v37, -3.4028235e+38 }
 0x26c   : > { %v2801_v43 = vstv %s6633_s15  ;;  %v2734_v46 = vsel %vm6600_vm9, %v6676_v59, -3.4028235e+38  ;;  %v2735_v42 = vsel %vm6613_vm12, %v6681_v4, -3.4028235e+38  ;;  %v2736_v57 = vsel %vm265_vm6, %v2722_v1, -inf }
 0x26d   : > { %v2701_v10 = vsel %vm456_vm2, %v2695_v49, %v2700_v50  ;;  %v2737_v54 = vsel %vm265_vm6, %v2723_v13, -inf  ;;  %v2745_v15 = vsel %vm265_vm6, %v2724_v40, -inf  ;;  %v2746_v17 = vsel %vm265_vm6, %v2725_v27, -inf }
 0x26e   : > { %v2702_v0 = vpack.c.b16 %v2701_v10, %v2701_v10  ;;  %v2738_v11 = vmax.f32 %v2736_v57, %v2737_v54  ;;  %v2747_v12 = vmax.f32 %v2745_v15, %v2746_v17  ;;  %v2754_v61 = vsel %vm265_vm6, %v2726_v31, -inf }
 0x26f   : > { %v2755_v30 = vsel %vm265_vm6, %v2727_v7, -inf  ;;  %v2763_v32 = vsel %vm265_vm6, %v2728_v21, -inf  ;;  %v2764_v18 = vsel %vm265_vm6, %v2729_v16, -inf  ;;  %v2772_v47 = vsel %vm265_vm6, %v2730_v58, -inf }
 0x270   : > { %v2706_v34 = vsel %vm6170_vm8, %v2702_v0, %v3110_v39  ;;  %v2756_v29 = vmax.f32 %v2754_v61, %v2755_v30  ;;  %v2739_v24 = vrot.slane %v2738_v11, 4  ;;  %v2748_v8 = vrot.slane %v2747_v12, 4 }
 0x271   : > { %3111 = vst [vmem:[%s6158_s8 + $0x10] sm:$0xf] %v2706_v34  ;;  %v2765_v51 = vmax.f32 %v2763_v32, %v2764_v18  ;;  %v2773_v62 = vsel %vm265_vm6, %v2731_v52, -inf  ;;  %v2781_v41 = vsel %vm265_vm6, %v2732_v60, -inf  ;;  %v2782_v22 = vsel %vm265_vm6, %v2733_v55, -inf }
 0x272   : > { %v2757_v33 = vrot.slane %v2756_v29, 4  ;;  %v2740_v1 = vmax.f32 %v2738_v11, %v2739_v24  ;;  %v2749_v13 = vmax.f32 %v2747_v12, %v2748_v8  ;;  %v2774_v2 = vmax.f32 %v2772_v47, %v2773_v62 }
 0x273   : > { %v2766_v48 = vrot.slane %v2765_v51, 4  ;;  %v2783_v40 = vmax.f32 %v2781_v41, %v2782_v22  ;;  %v2790_v28 = vsel %vm265_vm6, %v2734_v46, -inf  ;;  %v2791_v26 = vsel %vm265_vm6, %v2735_v42, -inf }
 0x274   : > { %v2758_v53 = vmax.f32 %v2756_v29, %v2757_v33  ;;  %v2741_v6 = vrot.slane %v2740_v1, 2  ;;  %v2750_v27 = vrot.slane %v2749_v13, 2  ;;  %v2775_v31 = vrot.slane %v2774_v2, 4 }
 0x275   : > { %v2767_v25 = vmax.f32 %v2765_v51, %v2766_v48  ;;  %v2784_v21 = vrot.slane %v2783_v40, 4  ;;  %v2792_v49 = vmax.f32 %v2790_v28, %v2791_v26  ;;  %vm6706_vm15 = vcmp.eq.s32.totalorder %v2801_v43, 1 }
 0x276   : > { %v2759_v7 = vrot.slane %v2758_v53, 2  ;;  %v2742_v39 = vmax.f32 %v2740_v1, %v2741_v6  ;;  %v2751_v16 = vmax.f32 %v2749_v13, %v2750_v27  ;;  %v2776_v52 = vmax.f32 %v2774_v2, %v2775_v31 }
 0x277   : > { %v2768_v58 = vrot.slane %v2767_v25, 2  ;;  %v2785_v55 = vmax.f32 %v2783_v40, %v2784_v21  ;;  %v2793_v10 = vrot.slane %v2792_v49, 4  ;;  %v2859_v46 = vstv %s6697_s19 }
 0x278   : > { %v2760_v60 = vmax.f32 %v2758_v53, %v2759_v7  ;;  %v2743_v42 = vrot.slane %v2742_v39, 1  ;;  %v2752_v57 = vrot.slane %v2751_v16, 1  ;;  %v2777_v54 = vrot.slane %v2776_v52, 2 }
 0x279   : > { %v2769_v0 = vmax.f32 %v2767_v25, %v2768_v58  ;;  %v2786_v17 = vrot.slane %v2785_v55, 2  ;;  %v2794_v43 = vmax.f32 %v2792_v49, %v2793_v10  ;;  %vm6715_vm4 = vcmp.ge.s32.totalorder %v7224_v19, %v2859_v46 }
 0x27a   : > { %v2761_v15 = vrot.slane %v2760_v60, 1  ;;  %v2744_v12 = vmax.f32 %v2742_v39, %v2743_v42  ;;  %v2753_v61 = vmax.f32 %v2751_v16, %v2752_v57  ;;  %v2778_v34 = vmax.f32 %v2776_v52, %v2777_v54 }
 0x27b   : > { %v2770_v30 = vrot.slane %v2769_v0, 1  ;;  %v2787_v32 = vmax.f32 %v2785_v55, %v2786_v17  ;;  %v2795_v18 = vrot.slane %v2794_v43, 2  ;;  %vm6720_vm5 = vcmp.ge.s32.totalorder %v7232_v9, %v2859_v46 }
 0x27c   : > { %v2762_v29 = vmax.f32 %v2760_v60, %v2761_v15  ;;  %v2779_v51 = vrot.slane %v2778_v34, 1  ;;  %v2803_v47 = vsel %vm6706_vm15, %v2744_v12, 0.0  ;;  %v2804_v33 = vsel %vm6706_vm15, %v2753_v61, 0.0  ;;  %v3119_v12 = vld [vmem:[%s6158_s8 + $0x14] sm:$0xf] }
 0x27d   : > { %v2771_v8 = vmax.f32 %v2769_v0, %v2770_v30  ;;  %v2788_v62 = vrot.slane %v2787_v32, 1  ;;  %v2796_v41 = vmax.f32 %v2794_v43, %v2795_v18  ;;  %v3168_v1 = vpack.c.bf16 %v2803_v47, %v2803_v47 }
 0x27e   : > { %v2805_v22 = vsel %vm6706_vm15, %v2762_v29, 0.0  ;;  %v2780_v13 = vmax.f32 %v2778_v34, %v2779_v51  ;;  %v3169_v2 = vpack.c.bf16 %v2804_v33, %v2804_v33  ;;  %v2862_v7 = vstv %s6712_s22 }
 0x27f   : > { %v2806_v48 = vsel %vm6706_vm15, %v2771_v8, 0.0  ;;  %v3170_v53 = vpack.c.bf16 %v2805_v22, %v2805_v22  ;;  %v2789_v40 = vmax.f32 %v2787_v32, %v2788_v62  ;;  %v2797_v28 = vrot.slane %v2796_v41, 1 }
 0x280   : > { %v3171_v26 = vpack.c.bf16 %v2806_v48, %v2806_v48  ;;  %v2838_v6 = vunpack.c.l.b16 %v3168_v1  ;;  %v2807_v27 = vsel %vm6706_vm15, %v2780_v13, 0.0  ;;  %v2839_v25 = vunpack.c.l.b16 %v3169_v2 }
 0x281   : > { %v2840_v31 = vunpack.c.l.b16 %v3170_v53  ;;  %v2798_v21 = vmax.f32 %v2796_v41, %v2797_v28  ;;  %v2808_v49 = vsel %vm6706_vm15, %v2789_v40, 0.0  ;;  %v3172_v39 = vpack.c.bf16 %v2807_v27, %v2807_v27 }
 0x282   : > { %v2841_v16 = vunpack.c.l.b16 %v3171_v26  ;;  %v3173_v58 = vpack.c.bf16 %v2808_v49, %v2808_v49  ;;  %v2845_v52 = vsel %vm446_vm11, %v2839_v25, %v2838_v6  ;;  %vm2863_vm7 = vcmp.lt.s32.totalorder %v7224_v19, %v2862_v7 }
 0x283   : > { %vm2864_vm3 = vcmp.lt.s32.totalorder %v7232_v9, %v2862_v7  ;;  %v2809_v60 = vsel %vm6706_vm15, %v2798_v21, 0.0  ;;  %v2842_v55 = vunpack.c.l.b16 %v3172_v39  ;;  %v2846_v10 = vsel %vm448_vm13, %v2840_v31, %v2845_v52  ;;  %vm6745_vm9 = vmand %vm6715_vm4, %vm2863_vm7 }
 0x284   : > { %v3174_v42 = vpack.c.bf16 %v2809_v60, %v2809_v60  ;;  %v2843_v57 = vunpack.c.l.b16 %v3173_v58  ;;  %v2847_v0 = vsel %vm450_vm14, %v2841_v16, %v2846_v10  ;;  %vm6752_vm10 = vmand %vm6720_vm5, %vm2864_vm3  ;;  %v2871_v9 = vsel %vm6745_vm9, %v6486_v14, -3.4028235e+38 }
 0x285   : > { %v2848_v50 = vsel %vm452_vm0, %v2842_v55, %v2847_v0  ;;  %v2872_v54 = vsel %vm6752_vm10, %v6502_v56, -3.4028235e+38  ;;  %v2873_v15 = vsel %vm6745_vm9, %v6491_v63, -3.4028235e+38  ;;  %v2874_v17 = vsel %vm6752_vm10, %v6507_v38, -3.4028235e+38 }
 0x286   : > { %v2844_v43 = vunpack.c.l.b16 %v3174_v42  ;;  %v2849_v11 = vsel %vm454_vm1, %v2843_v57, %v2848_v50  ;;  %v2875_v14 = vsel %vm6745_vm9, %v6496_v35, -3.4028235e+38  ;;  %v2876_v56 = vsel %vm6752_vm10, %v6512_v5, -3.4028235e+38 }
 0x287   : > { %v2877_v63 = vsel %vm6745_vm9, %v6518_v45, -3.4028235e+38  ;;  %v2878_v38 = vsel %vm6752_vm10, %v6523_v20, -3.4028235e+38  ;;  %v2879_v61 = vsel %vm6745_vm9, %v6654_v44, -3.4028235e+38  ;;  %v2950_v55 = vstv %s6822_s21 }
 0x288   : > { %v2850_v35 = vsel %vm456_vm2, %v2844_v43, %v2849_v11  ;;  %v2880_v5 = vsel %vm6752_vm10, %v6659_v36, -3.4028235e+38  ;;  %v2881_v30 = vsel %vm6745_vm9, %v6664_v23, -3.4028235e+38  ;;  %v2882_v45 = vsel %vm6752_vm10, %v6669_v37, -3.4028235e+38 }
 0x289   : > { %v2851_v20 = vpack.c.b16 %v2850_v35, %v2850_v35  ;;  %v2883_v44 = vsel %vm6745_vm9, %v6676_v59, -3.4028235e+38  ;;  %v2884_v34 = vsel %vm6752_vm10, %v6681_v4, -3.4028235e+38  ;;  %v2885_v36 = vsel %vm265_vm6, %v2871_v9, -inf }
 0x28a   : > { %v2886_v29 = vsel %vm265_vm6, %v2872_v54, -inf  ;;  %v2894_v32 = vsel %vm265_vm6, %v2873_v15, -inf  ;;  %v2895_v23 = vsel %vm265_vm6, %v2874_v17, -inf  ;;  %v2903_v18 = vsel %vm265_vm6, %v2875_v14, -inf }
 0x28b   : > { %v2855_v37 = vsel %vm6170_vm8, %v2851_v20, %v3119_v12  ;;  %v2887_v24 = vmax.f32 %v2885_v36, %v2886_v29  ;;  %v2896_v59 = vmax.f32 %v2894_v32, %v2895_v23  ;;  %v2904_v4 = vsel %vm265_vm6, %v2876_v56, -inf }
 0x28c   : > { %3120 = vst [vmem:[%s6158_s8 + $0x14] sm:$0xf] %v2855_v37  ;;  %v2905_v8 = vmax.f32 %v2903_v18, %v2904_v4  ;;  %v2912_v51 = vsel %vm265_vm6, %v2877_v63, -inf  ;;  %v2913_v47 = vsel %vm265_vm6, %v2878_v38, -inf  ;;  %v2921_v33 = vsel %vm265_vm6, %v2879_v61, -inf }
 0x28d   : > { %v2888_v62 = vrot.slane %v2887_v24, 4  ;;  %v2897_v41 = vrot.slane %v2896_v59, 4  ;;  %v2914_v22 = vmax.f32 %v2912_v51, %v2913_v47  ;;  %v2922_v1 = vsel %vm265_vm6, %v2880_v5, -inf }
 0x28e   : > { %v2906_v13 = vrot.slane %v2905_v8, 4  ;;  %v2923_v48 = vmax.f32 %v2921_v33, %v2922_v1  ;;  %v2930_v2 = vsel %vm265_vm6, %v2881_v30, -inf  ;;  %v2931_v53 = vsel %vm265_vm6, %v2882_v45, -inf }
 0x28f   : > { %v2889_v40 = vmax.f32 %v2887_v24, %v2888_v62  ;;  %v2898_v28 = vmax.f32 %v2896_v59, %v2897_v41  ;;  %v2915_v26 = vrot.slane %v2914_v22, 4  ;;  %v2932_v6 = vmax.f32 %v2930_v2, %v2931_v53 }
 0x290   : > { %v2907_v27 = vmax.f32 %v2905_v8, %v2906_v13  ;;  %v2924_v25 = vrot.slane %v2923_v48, 4  ;;  %v2939_v31 = vsel %vm265_vm6, %v2883_v44, -inf  ;;  %v2940_v7 = vsel %vm265_vm6, %v2884_v34, -inf }
 0x291   : > { %v2890_v21 = vrot.slane %v2889_v40, 2  ;;  %v2899_v49 = vrot.slane %v2898_v28, 2  ;;  %v2916_v39 = vmax.f32 %v2914_v22, %v2915_v26  ;;  %v2933_v16 = vrot.slane %v2932_v6, 4 }
 0x292   : > { %v2908_v58 = vrot.slane %v2907_v27, 2  ;;  %v2925_v52 = vmax.f32 %v2923_v48, %v2924_v25  ;;  %v2941_v60 = vmax.f32 %v2939_v31, %v2940_v7  ;;  %vm6827_vm6 = vcmp.eq.s32.totalorder %v2950_v55, 1 }
 0x293   : > { %v2891_v10 = vmax.f32 %v2889_v40, %v2890_v21  ;;  %v2900_v46 = vmax.f32 %v2898_v28, %v2899_v49  ;;  %v2917_v42 = vrot.slane %v2916_v39, 2  ;;  %v2934_v57 = vmax.f32 %v2932_v6, %v2933_v16  ;;  %v3128_v49 = vld [vmem:[%s6158_s8 + $0x18] sm:$0xf] }
 0x294   : > { %v2909_v0 = vmax.f32 %v2907_v27, %v2908_v58  ;;  %v2926_v19 = vrot.slane %v2925_v52, 2  ;;  %v2942_v9 = vrot.slane %v2941_v60, 4 }
 0x295   : > { %v2892_v50 = vrot.slane %v2891_v10, 1  ;;  %v2901_v54 = vrot.slane %v2900_v46, 1  ;;  %v2918_v15 = vmax.f32 %v2916_v39, %v2917_v42  ;;  %v2935_v17 = vrot.slane %v2934_v57, 2 }
 0x296   : > { %v2910_v43 = vrot.slane %v2909_v0, 1  ;;  %v2927_v11 = vmax.f32 %v2925_v52, %v2926_v19  ;;  %v2943_v12 = vmax.f32 %v2941_v60, %v2942_v9 }
 0x297   : > { %v2893_v56 = vmax.f32 %v2891_v10, %v2892_v50  ;;  %v2902_v63 = vmax.f32 %v2900_v46, %v2901_v54  ;;  %v2919_v38 = vrot.slane %v2918_v15, 1  ;;  %v2936_v61 = vmax.f32 %v2934_v57, %v2935_v17 }
 0x298   : > { %v2911_v35 = vmax.f32 %v2909_v0, %v2910_v43  ;;  %v2928_v5 = vrot.slane %v2927_v11, 1  ;;  %v2944_v30 = vrot.slane %v2943_v12, 2 }
 0x299   : > { %v2920_v45 = vmax.f32 %v2918_v15, %v2919_v38  ;;  %v2937_v20 = vrot.slane %v2936_v61, 1  ;;  %v2952_v44 = vsel %vm6827_vm6, %v2893_v56, 0.0  ;;  %v2953_v34 = vsel %vm6827_vm6, %v2902_v63, 0.0 }
 0x29a   : > { %v2929_v36 = vmax.f32 %v2927_v11, %v2928_v5  ;;  %v2945_v29 = vmax.f32 %v2943_v12, %v2944_v30  ;;  %v2954_v32 = vsel %vm6827_vm6, %v2911_v35, 0.0  ;;  %v3175_v23 = vpack.c.bf16 %v2952_v44, %v2952_v44 }
 0x29b   : > { %v2938_v18 = vmax.f32 %v2936_v61, %v2937_v20  ;;  %v2955_v37 = vsel %vm6827_vm6, %v2920_v45, 0.0  ;;  %v3176_v24 = vpack.c.bf16 %v2953_v34, %v2953_v34  ;;  %v3177_v59 = vpack.c.bf16 %v2954_v32, %v2954_v32 }
 0x29c   : > { %v2946_v4 = vrot.slane %v2945_v29, 1  ;;  %v2956_v8 = vsel %vm6827_vm6, %v2929_v36, 0.0  ;;  %v3178_v51 = vpack.c.bf16 %v2955_v37, %v2955_v37  ;;  %v2987_v47 = vunpack.c.l.b16 %v3175_v23 }
 0x29d   : > { %v2957_v33 = vsel %vm6827_vm6, %v2938_v18, 0.0  ;;  %v3179_v62 = vpack.c.bf16 %v2956_v8, %v2956_v8  ;;  %v2988_v41 = vunpack.c.l.b16 %v3176_v24  ;;  %v2989_v22 = vunpack.c.l.b16 %v3177_v59 }
 0x29e   : > { %v2947_v1 = vmax.f32 %v2945_v29, %v2946_v4  ;;  %v3180_v13 = vpack.c.bf16 %v2957_v33, %v2957_v33  ;;  %v2990_v48 = vunpack.c.l.b16 %v3178_v51 }
 0x29f   : > { %v2994_v2 = vsel %vm446_vm11, %v2988_v41, %v2987_v47  ;;  %v2991_v40 = vunpack.c.l.b16 %v3179_v62 }
 0x2a0   : > { %v2958_v53 = vsel %vm6827_vm6, %v2947_v1, 0.0  ;;  %v2995_v28 = vsel %vm448_vm13, %v2989_v22, %v2994_v2  ;;  %v2992_v6 = vunpack.c.l.b16 %v3180_v13 }
 0x2a1   : > { %v3181_v26 = vpack.c.bf16 %v2958_v53, %v2958_v53  ;;  %v2996_v27 = vsel %vm450_vm14, %v2990_v48, %v2995_v28 }
 0x2a2   : > { %v2997_v25 = vsel %vm452_vm0, %v2991_v40, %v2996_v27 }
 0x2a3   : > { %v2993_v31 = vunpack.c.l.b16 %v3181_v26  ;;  %v2998_v7 = vsel %vm454_vm1, %v2992_v6, %v2997_v25 }
 0x2a5   : > { %v2999_v21 = vsel %vm456_vm2, %v2993_v31, %v2998_v7 }
 0x2a6   : > { %v3000_v39 = vpack.c.b16 %v2999_v21, %v2999_v21 }
 0x2a8   : > { %v3004_v16 = vsel %vm6170_vm8, %v3000_v39, %v3128_v49 }
 0x2a9   : > { %3129 = vst [vmem:[%s6158_s8 + $0x18] sm:$0xf] %v3004_v16 }
 0x2aa PF: > { %s38_s18 = sadd.s32 1, %s3357_s18  }
 0x2ab   : > { %p35_p2 = scmp.ge.s32.totalorder %s38_s18, 10  }
 0x2ad   :  { %37 = sbr.rel (!%p35_p2) target bundleno = 57 (0x39), region = 66 }

</bundles_post_ra>
